<compile_context>
chip_gen: v5e
topology: v5e:2x2
jax: 0.10.0
libtpu: 0.0.40
codegen_flags: <defaults>
</compile_context>

<pallas_src>
import functools

import jax
import jax.numpy as jnp
from jax.experimental import pallas as pl
from jax.experimental.pallas import tpu as pltpu


def _disc_kernel(x_ref, w1_ref, b1_ref, w2_ref, b2_ref, w3_ref, b3_ref,
                 w4_ref, b4_ref, o_ref, *, bf16_epilogue):
    """Whole 4-layer MLP for one (block_b, nz) tile of batch rows, in VMEM."""
    # Layer 1: cast f32 input tile to bf16 in-kernel, MXU matmul w/ f32 acc.
    x_bf = x_ref[...].astype(jnp.bfloat16)
    acc = jnp.dot(x_bf, w1_ref[...], preferred_element_type=jnp.float32)
    if bf16_epilogue:
        h = jnp.maximum((acc + b1_ref[...]).astype(jnp.bfloat16), 0)
    else:
        h = jnp.maximum(acc + b1_ref[...], 0.0).astype(jnp.bfloat16)

    # Layer 2.
    acc = jnp.dot(h, w2_ref[...], preferred_element_type=jnp.float32)
    if bf16_epilogue:
        h = jnp.maximum((acc + b2_ref[...]).astype(jnp.bfloat16), 0)
    else:
        h = jnp.maximum(acc + b2_ref[...], 0.0).astype(jnp.bfloat16)

    # Layer 3: keep the f32 epilogue (feeds the f32 VPU reduction below).
    acc = jnp.dot(h, w3_ref[...], preferred_element_type=jnp.float32)
    h = jnp.maximum(acc + b3_ref[...], 0.0)

    # Layer 4 (dim -> 1): VPU multiply + lane reduction instead of an N=1 MXU
    # matmul; emit lane-dense (block_b//128, 128) instead of (block_b, 1).
    bb, dim = h.shape
    contrib = h * w4_ref[...]                                     # (bb, dim) f32
    out = jnp.sum(contrib.reshape(bb // 128, 128, dim), axis=-1)  # (bb//128,128)
    o_ref[0] = (out + b4_ref[0]).astype(o_ref.dtype)


def _round_up(n: int, m: int) -> int:
    return ((n + m - 1) // m) * m


def _device_kind() -> str:
    try:
        return jax.devices()[0].device_kind.lower()
    except Exception:
        return ""


def _num_tensorcores(kind: str) -> int:
    # v7x has 2 TensorCores per chip; v5e/v6e have 1.
    return 2 if ("v7" in kind or "7x" in kind) else 1


def _use_bf16_epilogue(kind: str) -> bool:
    # bf16 VALU exists on v6e/v7x; older chips (v2-v5) keep the f32 epilogue.
    if not kind:
        return False
    return not any(tag in kind for tag in ("v2", "v3", "v4", "v5"))


def _choose_block_b(batch: int, requested: int, num_cores: int) -> int:
    """MXU-aligned batch tile (multiple of 256, also multiple of 128 for the
    lane-dense output layout)."""
    b_aligned = _round_up(max(batch, 1), 256)
    bb = max(256, min(_round_up(requested, 256), b_aligned))
    if num_cores > 1:
        # Aim for >= 2 tiles per TensorCore so each core overlaps DMA/compute.
        target_blocks = 2 * num_cores
        per_block = _round_up(-(-b_aligned // target_blocks), 256)
        bb = min(bb, max(256, per_block))
        # Prefer a block count divisible by the core count (no idle tail core).
        if (-(-b_aligned // bb)) % num_cores != 0:
            for cand in range(bb, 255, -256):
                if (-(-b_aligned // cand)) % num_cores == 0:
                    bb = cand
                    break
    return bb


@functools.partial(jax.jit, static_argnames=("block_b",))
def discriminator_forward(x, params, block_b=2048):
    """x: (..., nz) -> (B, 1), B = prod(leading dims).  Mimics x.view(-1, nz)."""
    w1, b1, w2, b2, w3, b3, w4, b4 = params
    nz, dim = w1.shape
    assert nz % 128 == 0 and dim % 128 == 0, "nz/dim must be lane-aligned"

    x2d = x.reshape(-1, nz).astype(jnp.float32)
    B = x2d.shape[0]

    kind = _device_kind()
    num_cores = _num_tensorcores(kind)
    bf16_epi = _use_bf16_epilogue(kind)

    bb = _choose_block_b(B, block_b, num_cores)
    assert bb % 256 == 0 and bb % 128 == 0, bb   # lane-dense output mapping
    num_blocks = pl.cdiv(B, bb)                  # partial last block; no x pad
    B_pad = num_blocks * bb

    # Resident operands: bf16 weights for the MXU, f32 biases / final row vec.
    w1b = w1.astype(jnp.bfloat16)
    w2b = w2.astype(jnp.bfloat16)
    w3b = w3.astype(jnp.bfloat16)
    b1r = b1.reshape(1, dim).astype(jnp.float32)
    b2r = b2.reshape(1, dim).astype(jnp.float32)
    b3r = b3.reshape(1, dim).astype(jnp.float32)
    w4r = w4.reshape(1, dim).astype(jnp.float32)   # row vector for VPU reduce
    b4r = b4.reshape(1).astype(jnp.float32)        # single scalar -> SMEM

    const = lambda i: (0, 0)   # weights/biases: same block every step (resident)

    out3 = pl.pallas_call(
        functools.partial(_disc_kernel, bf16_epilogue=bf16_epi),
        out_shape=jax.ShapeDtypeStruct((num_blocks, bb // 128, 128), jnp.float32),
        grid_spec=pltpu.PrefetchScalarGridSpec(
            num_scalar_prefetch=0,
            grid=(num_blocks,),
            in_specs=[
                pl.BlockSpec((bb, nz), lambda i: (i, 0)),            # x tile (f32)
                pl.BlockSpec((nz, dim), const),                      # w1 (bf16)
                pl.BlockSpec((1, dim), const),                       # b1
                pl.BlockSpec((dim, dim), const),                     # w2 (bf16)
                pl.BlockSpec((1, dim), const),                       # b2
                pl.BlockSpec((dim, dim), const),                     # w3 (bf16)
                pl.BlockSpec((1, dim), const),                       # b3
                pl.BlockSpec((1, dim), const),                       # w4 row (f32)
                pl.BlockSpec(memory_space=pltpu.MemorySpace.SMEM),   # b4 scalar
            ],
            out_specs=pl.BlockSpec((1, bb // 128, 128), lambda i: (i, 0, 0)),
        ),
        compiler_params=pltpu.CompilerParams(
            dimension_semantics=("parallel",),
            vmem_limit_bytes=32 * 1024 * 1024,
        ),
    )(x2d, w1b, b1r, w2b, b2r, w3b, b3r, w4r, b4r)

    out = out3.reshape(B_pad, 1)
    return out[:B]


def init_params(key, nz=256, dim=256):
    """Deterministic synthetic parameter init (shapes match nn.Linear)."""
    keys = jax.random.split(key, 8)
    # Stored as (in, out) — transposed relative to PyTorch's (out, in).
    w1 = jax.random.normal(keys[0], (nz, dim), jnp.float32) * 0.05
    b1 = jax.random.normal(keys[1], (dim,), jnp.float32) * 0.01
    w2 = jax.random.normal(keys[2], (dim, dim), jnp.float32) * 0.05
    b2 = jax.random.normal(keys[3], (dim,), jnp.float32) * 0.01
    w3 = jax.random.normal(keys[4], (dim, dim), jnp.float32) * 0.05
    b3 = jax.random.normal(keys[5], (dim,), jnp.float32) * 0.01
    w4 = jax.random.normal(keys[6], (dim, 1), jnp.float32) * 0.05
    b4 = jax.random.normal(keys[7], (1,), jnp.float32) * 0.01
    return (w1, b1, w2, b2, w3, b3, w4, b4)


def reference_forward_f32(x, params):
    """Pure-JAX f32 reference of the PyTorch forward."""
    w1, b1, w2, b2, w3, b3, w4, b4 = params
    h = x.reshape(-1, w1.shape[0]).astype(jnp.float32)
    h = jnp.maximum(h @ w1 + b1, 0.0)
    h = jnp.maximum(h @ w2 + b2, 0.0)
    h = jnp.maximum(h @ w3 + b3, 0.0)
    return h @ w4 + b4


def reference_forward_bf16(x, params):
    """Pure-JAX reference mirroring the kernel's bf16-in / f32-acc math."""
    w1, b1, w2, b2, w3, b3, w4, b4 = params
    f32, bf = jnp.float32, jnp.bfloat16
    h = x.reshape(-1, w1.shape[0]).astype(bf)
    h = jnp.maximum(jnp.dot(h, w1.astype(bf), preferred_element_type=f32) + b1, 0.0)
    h = jnp.maximum(jnp.dot(h.astype(bf), w2.astype(bf),
                            preferred_element_type=f32) + b2, 0.0)
    h = jnp.maximum(jnp.dot(h.astype(bf), w3.astype(bf),
                            preferred_element_type=f32) + b3, 0.0)
    return jnp.sum(h * w4.reshape(1, -1), axis=-1, keepdims=True) + b4


if __name__ == "__main__":
    nz, dim = 256, 256   # module defaults

    key = jax.random.PRNGKey(0)
    kx1, kx2, kp = jax.random.split(key, 3)
    params = init_params(kp, nz=nz, dim=dim)

    # Case 1: MXU-aligned batch.  Case 2: ragged batch (partial last block).
    for batch, kx in ((512, kx1), (200, kx2)):
        x = jax.random.normal(kx, (batch, nz), jnp.float32)

        out = jax.block_until_ready(discriminator_forward(x, params))

        assert out.shape == (batch, 1), out.shape
        assert out.dtype == jnp.float32, out.dtype

        # Structural check (kernel vs identical bf16/f32 math in JAX).
        ref_bf16 = reference_forward_bf16(x, params)
        assert jnp.allclose(out, ref_bf16, atol=1e-3, rtol=1e-3), \
            "mismatch vs bf16-accumulation reference"

        # Semantic check vs full-f32 PyTorch-equivalent forward (loose tol
        # accounts for bf16 rounding of the matmul inputs).
        ref_f32 = reference_forward_f32(x, params)
        assert jnp.allclose(out, ref_f32, atol=3e-2, rtol=3e-2), \
            "mismatch vs f32 reference"

    print("KERNEL_OK")
</pallas_src>

<mosaic_0001>
module attributes {stable_mosaic.version = 11 : i64} {
  func.func @_disc_kernel(%arg0: i32, %arg1: memref<512x256xf32, #tpu.memory_space<vmem>>, %arg2: memref<256x256xbf16, #tpu.memory_space<vmem>>, %arg3: memref<1x256xf32, #tpu.memory_space<vmem>>, %arg4: memref<256x256xbf16, #tpu.memory_space<vmem>>, %arg5: memref<1x256xf32, #tpu.memory_space<vmem>>, %arg6: memref<256x256xbf16, #tpu.memory_space<vmem>>, %arg7: memref<1x256xf32, #tpu.memory_space<vmem>>, %arg8: memref<1x256xf32, #tpu.memory_space<vmem>>, %arg9: memref<1xf32, #tpu.memory_space<smem>>, %arg10: memref<1x4x128xf32, #tpu.memory_space<vmem>>) attributes {dimension_semantics = [#tpu.dimension_semantics<parallel>], iteration_bounds = array<i64: 1>, scalar_prefetch = 0 : i64, scratch_operands = 0 : i64, tpu.core_type = #tpu.core_type<tc>, window_params = [{transform_indices = @transform_0, window_bounds = array<i64: 512, 256>}, {pipeline_mode = #tpu.pipeline_mode<synchronous>, transform_indices = @transform_1, window_bounds = array<i64: 256, 256>}, {pipeline_mode = #tpu.pipeline_mode<synchronous>, transform_indices = @transform_2, window_bounds = array<i64: 1, 256>}, {pipeline_mode = #tpu.pipeline_mode<synchronous>, transform_indices = @transform_3, window_bounds = array<i64: 256, 256>}, {pipeline_mode = #tpu.pipeline_mode<synchronous>, transform_indices = @transform_4, window_bounds = array<i64: 1, 256>}, {pipeline_mode = #tpu.pipeline_mode<synchronous>, transform_indices = @transform_5, window_bounds = array<i64: 256, 256>}, {pipeline_mode = #tpu.pipeline_mode<synchronous>, transform_indices = @transform_6, window_bounds = array<i64: 1, 256>}, {pipeline_mode = #tpu.pipeline_mode<synchronous>, transform_indices = @transform_7, window_bounds = array<i64: 1, 256>}, {transform_indices = @transform_8, window_bounds = array<i64: 1>}, {transform_indices = @transform_9, window_bounds = array<i64: 1, 4, 128>}]} {
    %c0 = arith.constant 0 : index
    %c0_0 = arith.constant 0 : index
    %0 = vector.load %arg1[%c0, %c0_0] : memref<512x256xf32, #tpu.memory_space<vmem>>, vector<512x256xf32>
    %1 = arith.truncf %0 : vector<512x256xf32> to vector<512x256xbf16>
    %c0_1 = arith.constant 0 : index
    %c0_2 = arith.constant 0 : index
    %2 = vector.load %arg2[%c0_1, %c0_2] : memref<256x256xbf16, #tpu.memory_space<vmem>>, vector<256x256xbf16>
    %cst = arith.constant dense<0.000000e+00> : vector<512x256xf32>
    %3 = tpu.matmul %1, %2, %cst {dimension_numbers = #tpu.dot_dimension_numbers<[1], [0], [0], [1], [0, 0, 1, 1], [], []>} : vector<512x256xbf16>, vector<256x256xbf16>, vector<512x256xf32> -> vector<512x256xf32>
    %c0_3 = arith.constant 0 : index
    %c0_4 = arith.constant 0 : index
    %4 = vector.load %arg3[%c0_3, %c0_4] : memref<1x256xf32, #tpu.memory_space<vmem>>, vector<1x256xf32>
    %5 = vector.broadcast %4 : vector<1x256xf32> to vector<512x256xf32>
    %6 = arith.addf %3, %5 : vector<512x256xf32>
    %7 = arith.truncf %6 : vector<512x256xf32> to vector<512x256xbf16>
    %cst_5 = arith.constant 0.000000e+00 : bf16
    %8 = vector.broadcast %cst_5 : bf16 to vector<512x256xbf16>
    %9 = arith.maximumf %7, %8 : vector<512x256xbf16>
    %c0_6 = arith.constant 0 : index
    %c0_7 = arith.constant 0 : index
    %10 = vector.load %arg4[%c0_6, %c0_7] : memref<256x256xbf16, #tpu.memory_space<vmem>>, vector<256x256xbf16>
    %cst_8 = arith.constant dense<0.000000e+00> : vector<512x256xf32>
    %11 = tpu.matmul %9, %10, %cst_8 {dimension_numbers = #tpu.dot_dimension_numbers<[1], [0], [0], [1], [0, 0, 1, 1], [], []>} : vector<512x256xbf16>, vector<256x256xbf16>, vector<512x256xf32> -> vector<512x256xf32>
    %c0_9 = arith.constant 0 : index
    %c0_10 = arith.constant 0 : index
    %12 = vector.load %arg5[%c0_9, %c0_10] : memref<1x256xf32, #tpu.memory_space<vmem>>, vector<1x256xf32>
    %13 = vector.broadcast %12 : vector<1x256xf32> to vector<512x256xf32>
    %14 = arith.addf %11, %13 : vector<512x256xf32>
    %15 = arith.truncf %14 : vector<512x256xf32> to vector<512x256xbf16>
    %cst_11 = arith.constant 0.000000e+00 : bf16
    %16 = vector.broadcast %cst_11 : bf16 to vector<512x256xbf16>
    %17 = arith.maximumf %15, %16 : vector<512x256xbf16>
    %c0_12 = arith.constant 0 : index
    %c0_13 = arith.constant 0 : index
    %18 = vector.load %arg6[%c0_12, %c0_13] : memref<256x256xbf16, #tpu.memory_space<vmem>>, vector<256x256xbf16>
    %cst_14 = arith.constant dense<0.000000e+00> : vector<512x256xf32>
    %19 = tpu.matmul %17, %18, %cst_14 {dimension_numbers = #tpu.dot_dimension_numbers<[1], [0], [0], [1], [0, 0, 1, 1], [], []>} : vector<512x256xbf16>, vector<256x256xbf16>, vector<512x256xf32> -> vector<512x256xf32>
    %c0_15 = arith.constant 0 : index
    %c0_16 = arith.constant 0 : index
    %20 = vector.load %arg7[%c0_15, %c0_16] : memref<1x256xf32, #tpu.memory_space<vmem>>, vector<1x256xf32>
    %21 = vector.broadcast %20 : vector<1x256xf32> to vector<512x256xf32>
    %22 = arith.addf %19, %21 : vector<512x256xf32>
    %cst_17 = arith.constant 0.000000e+00 : f32
    %23 = vector.broadcast %cst_17 : f32 to vector<512x256xf32>
    %24 = arith.maximumf %22, %23 : vector<512x256xf32>
    %c0_18 = arith.constant 0 : index
    %c0_19 = arith.constant 0 : index
    %25 = vector.load %arg8[%c0_18, %c0_19] : memref<1x256xf32, #tpu.memory_space<vmem>>, vector<1x256xf32>
    %26 = vector.broadcast %25 : vector<1x256xf32> to vector<512x256xf32>
    %27 = arith.mulf %24, %26 : vector<512x256xf32>
    %28 = vector.shape_cast %27 : vector<512x256xf32> to vector<4x128x256xf32>
    %cst_20 = arith.constant dense<0.000000e+00> : vector<4x128xf32>
    %29 = vector.multi_reduction <add>, %28, %cst_20 [2] : vector<4x128x256xf32> to vector<4x128xf32>
    %c0_21 = arith.constant 0 : index
    %30 = memref.load %arg9[%c0_21] : memref<1xf32, #tpu.memory_space<smem>>
    %31 = vector.broadcast %30 : f32 to vector<4x128xf32>
    %32 = arith.addf %29, %31 : vector<4x128xf32>
    %c0_22 = arith.constant 0 : index
    %c0_23 = arith.constant 0 : index
    %c0_24 = arith.constant 0 : index
    %33 = vector.load %arg10[%c0_22, %c0_23, %c0_24] : memref<1x4x128xf32, #tpu.memory_space<vmem>>, vector<1x4x128xf32>
    %34 = vector.shape_cast %33 : vector<1x4x128xf32> to vector<4x128xf32>
    %35 = vector.shape_cast %32 : vector<4x128xf32> to vector<1x4x128xf32>
    tpu.vector_store %arg10[%c0_22, %c0_23, %c0_24], %35 {strides = array<i32>} : memref<1x4x128xf32, #tpu.memory_space<vmem>>, vector<1x4x128xf32>,
    return
  }
  func.func @transform_0(%arg0: i32) -> (i32, i32) {
    %c0_i32 = arith.constant 0 : i32
    %c0_i32_0 = arith.constant 0 : i32
    return %arg0, %c0_i32 : i32, i32
  }
  func.func @transform_1(%arg0: i32) -> (i32, i32) {
    %c0_i32 = arith.constant 0 : i32
    %c0_i32_0 = arith.constant 0 : i32
    %c0_i32_1 = arith.constant 0 : i32
    return %c0_i32, %c0_i32_0 : i32, i32
  }
  func.func @transform_2(%arg0: i32) -> (i32, i32) {
    %c0_i32 = arith.constant 0 : i32
    %c0_i32_0 = arith.constant 0 : i32
    %c0_i32_1 = arith.constant 0 : i32
    return %c0_i32, %c0_i32_0 : i32, i32
  }
  func.func @transform_3(%arg0: i32) -> (i32, i32) {
    %c0_i32 = arith.constant 0 : i32
    %c0_i32_0 = arith.constant 0 : i32
    %c0_i32_1 = arith.constant 0 : i32
    return %c0_i32, %c0_i32_0 : i32, i32
  }
  func.func @transform_4(%arg0: i32) -> (i32, i32) {
    %c0_i32 = arith.constant 0 : i32
    %c0_i32_0 = arith.constant 0 : i32
    %c0_i32_1 = arith.constant 0 : i32
    return %c0_i32, %c0_i32_0 : i32, i32
  }
  func.func @transform_5(%arg0: i32) -> (i32, i32) {
    %c0_i32 = arith.constant 0 : i32
    %c0_i32_0 = arith.constant 0 : i32
    %c0_i32_1 = arith.constant 0 : i32
    return %c0_i32, %c0_i32_0 : i32, i32
  }
  func.func @transform_6(%arg0: i32) -> (i32, i32) {
    %c0_i32 = arith.constant 0 : i32
    %c0_i32_0 = arith.constant 0 : i32
    %c0_i32_1 = arith.constant 0 : i32
    return %c0_i32, %c0_i32_0 : i32, i32
  }
  func.func @transform_7(%arg0: i32) -> (i32, i32) {
    %c0_i32 = arith.constant 0 : i32
    %c0_i32_0 = arith.constant 0 : i32
    %c0_i32_1 = arith.constant 0 : i32
    return %c0_i32, %c0_i32_0 : i32, i32
  }
  func.func @transform_8(%arg0: i32) -> i32 {
    %c0_i32 = arith.constant 0 : i32
    %c0_i32_0 = arith.constant 0 : i32
    return %c0_i32 : i32
  }
  func.func @transform_9(%arg0: i32) -> (i32, i32, i32) {
    %c0_i32 = arith.constant 0 : i32
    %c0_i32_0 = arith.constant 0 : i32
    %c0_i32_1 = arith.constant 0 : i32
    return %arg0, %c0_i32, %c0_i32_0 : i32, i32, i32
  }
}

</mosaic_0001>

<bundles_post_ra>
// kernel: discriminator_forward.1
= control target key start
LH: loop header
LB: loop body
LE: loop exit
PB: predicated region body
PF: predicated region fallthrough
CT: control target
= control target key end

     0   :  { %s7205_s0 = inlined_call_operand.vmem [shape: f32[512,256], index: 0, kind: input, shape index: {}]   ;;  %s7206_s1 = inlined_call_operand.vmem [shape: bf16[256,256], index: 1, kind: input, shape index: {}]   ;;  %s7207_s2 = inlined_call_operand.vmem [shape: f32[1,256], index: 2, kind: input, shape index: {}]   ;;  %s7208_s3 = inlined_call_operand.vmem [shape: bf16[256,256], index: 3, kind: input, shape index: {}]   ;;  %s7209_s4 = inlined_call_operand.vmem [shape: f32[1,256], index: 4, kind: input, shape index: {}]   ;;  %s7210_s5 = inlined_call_operand.vmem [shape: bf16[256,256], index: 5, kind: input, shape index: {}]   ;;  %s7211_s6 = inlined_call_operand.vmem [shape: f32[1,256], index: 6, kind: input, shape index: {}]   ;;  %s7212_s7 = inlined_call_operand.vmem [shape: f32[1,256], index: 7, kind: input, shape index: {}]   ;;  %s7213_s8 = inlined_call_operand.<no memory space> [shape: f32[1], index: 8, kind: input, shape index: {}]   ;;  %s7214_s9 = inlined_call_operand.hbm [shape: f32[1,4,128], index: 9, kind: output, shape index: {}]  }
   0x1   :  { %v4438_v0 = vld [vmem:[%s7206_s1 + $0x70] sm:$0xf]  ;;  %v4779_v1 = vld [vmem:[%s7206_s1 + $0x74] sm:$0xf0]  ;;  %v4778_v5 = vld [vmem:[%s7206_s1 + $0x74] sm:$0xf] }
   0x2   :  { %v4502_v2 = vld [vmem:[%s7206_s1 + $0xf0] sm:$0xf]  ;;  %v4439_v3 = vor.u32 %v4779_v1, %v4438_v0  ;;  %v4795_v4 = vld [vmem:[%s7206_s1 + $0xf4] sm:$0xf0]  ;;  %v4440_v6 = vld [vmem:[%s7206_s1 + $0x78] sm:$0xf0] }
   0x3   :  { %v4503_v7 = vor.u32 %v4795_v4, %v4502_v2  ;;  %v4443_v8 = vor.u32 %v4778_v5, %v4440_v6  ;;  %v4794_v9 = vld [vmem:[%s7206_s1 + $0xf4] sm:$0xf]  ;;  %v4504_v10 = vld [vmem:[%s7206_s1 + $0xf8] sm:$0xf0]  ;;  %v4430_v11 = vld [vmem:[%s7206_s1 + $0x60] sm:$0xf] }
   0x4   :  { %424 = vmatpush.bf16.msra.mxu0 %v4439_v3  ;;  %v4507_v12 = vor.u32 %v4794_v9, %v4504_v10  ;;  %v4777_v13 = vld [vmem:[%s7206_s1 + $0x64] sm:$0xf0]  ;;  %v4494_v14 = vld [vmem:[%s7206_s1 + $0xe0] sm:$0xf]  ;;  %v4776_v18 = vld [vmem:[%s7206_s1 + $0x64] sm:$0xf] }
   0x5   :  { %v4793_v15 = vld [vmem:[%s7206_s1 + $0xe4] sm:$0xf0]  ;;  %593 = vmatpush.bf16.msra.mxu1 %v4503_v7  ;;  %762 = vmatpush.bf16.msra.mxu2 %v4443_v8  ;;  %v4431_v16 = vor.u32 %v4777_v13, %v4430_v11  ;;  %v4432_v19 = vld [vmem:[%s7206_s1 + $0x68] sm:$0xf0]  ;;  %v4792_v20 = vld [vmem:[%s7206_s1 + $0xe4] sm:$0xf] }
   0x6   :  { %v4495_v17 = vor.u32 %v4793_v15, %v4494_v14  ;;  %931 = vmatpush.bf16.msra.mxu3 %v4507_v12  ;;  %v4435_v21 = vor.u32 %v4776_v18, %v4432_v19  ;;  %v4496_v22 = vld [vmem:[%s7206_s1 + $0xe8] sm:$0xf0]  ;;  %v4422_v23 = vld [vmem:[%s7206_s1 + $0x50] sm:$0xf]  ;;  %v4775_v24 = vld [vmem:[%s7206_s1 + $0x54] sm:$0xf0] }
   0x7   :  { %v4499_v25 = vor.u32 %v4792_v20, %v4496_v22  ;;  %v4486_v26 = vld [vmem:[%s7206_s1 + $0xd0] sm:$0xf]  ;;  %v4791_v27 = vld [vmem:[%s7206_s1 + $0xd4] sm:$0xf0]  ;;  %v4774_v28 = vld [vmem:[%s7206_s1 + $0x54] sm:$0xf]  ;;  %v4423_v29 = vor.u32 %v4775_v24, %v4422_v23 }
   0x8   :  { %425 = vmatpush.bf16.msra.mxu0 %v4431_v16  ;;  %v4424_v30 = vld [vmem:[%s7206_s1 + $0x58] sm:$0xf0]  ;;  %v4790_v31 = vld [vmem:[%s7206_s1 + $0xd4] sm:$0xf]  ;;  %v4487_v33 = vor.u32 %v4791_v27, %v4486_v26  ;;  %v4414_v35 = vld [vmem:[%s7206_s1 + $0x40] sm:$0xf] }
   0x9   :  { %v4488_v32 = vld [vmem:[%s7206_s1 + $0xd8] sm:$0xf0]  ;;  %594 = vmatpush.bf16.msra.mxu1 %v4495_v17  ;;  %763 = vmatpush.bf16.msra.mxu2 %v4435_v21  ;;  %v4427_v34 = vor.u32 %v4774_v28, %v4424_v30  ;;  %v4773_v36 = vld [vmem:[%s7206_s1 + $0x44] sm:$0xf0]  ;;  %v4478_v37 = vld [vmem:[%s7206_s1 + $0xc0] sm:$0xf] }
   0xa   :  { %932 = vmatpush.bf16.msra.mxu3 %v4499_v25  ;;  %v4491_v38 = vor.u32 %v4790_v31, %v4488_v32  ;;  %v4789_v39 = vld [vmem:[%s7206_s1 + $0xc4] sm:$0xf0]  ;;  %v4772_v40 = vld [vmem:[%s7206_s1 + $0x44] sm:$0xf]  ;;  %v4416_v41 = vld [vmem:[%s7206_s1 + $0x48] sm:$0xf0]  ;;  %v4415_v44 = vor.u32 %v4773_v36, %v4414_v35 }
   0xb   :  { %v4788_v42 = vld [vmem:[%s7206_s1 + $0xc4] sm:$0xf]  ;;  %v4480_v43 = vld [vmem:[%s7206_s1 + $0xc8] sm:$0xf0]  ;;  %v4479_v45 = vor.u32 %v4789_v39, %v4478_v37  ;;  %v4419_v46 = vor.u32 %v4772_v40, %v4416_v41  ;;  %v4406_v47 = vld [vmem:[%s7206_s1 + $0x30] sm:$0xf] }
   0xc   :  { %426 = vmatpush.bf16.msra.mxu0 %v4423_v29  ;;  %v4771_v48 = vld [vmem:[%s7206_s1 + $0x34] sm:$0xf0]  ;;  %v4470_v49 = vld [vmem:[%s7206_s1 + $0xb0] sm:$0xf]  ;;  %v4483_v50 = vor.u32 %v4788_v42, %v4480_v43  ;;  %v4770_v52 = vld [vmem:[%s7206_s1 + $0x34] sm:$0xf] }
   0xd   :  { %595 = vmatpush.bf16.msra.mxu1 %v4487_v33  ;;  %764 = vmatpush.bf16.msra.mxu2 %v4427_v34  ;;  %v4787_v51 = vld [vmem:[%s7206_s1 + $0xb4] sm:$0xf0]  ;;  %v4408_v53 = vld [vmem:[%s7206_s1 + $0x38] sm:$0xf0]  ;;  %v4786_v54 = vld [vmem:[%s7206_s1 + $0xb4] sm:$0xf]  ;;  %v4407_v56 = vor.u32 %v4771_v48, %v4406_v47 }
   0xe   :  { %933 = vmatpush.bf16.msra.mxu3 %v4491_v38  ;;  %v4472_v55 = vld [vmem:[%s7206_s1 + $0xb8] sm:$0xf0]  ;;  %v4471_v57 = vor.u32 %v4787_v51, %v4470_v49  ;;  %v4411_v58 = vor.u32 %v4770_v52, %v4408_v53  ;;  %v4398_v59 = vld [vmem:[%s7206_s1 + $0x20] sm:$0xf]  ;;  %v4769_v60 = vld [vmem:[%s7206_s1 + $0x24] sm:$0xf0] }
   0xf   :  { %v4462_v61 = vld [vmem:[%s7206_s1 + $0xa0] sm:$0xf]  ;;  %v4475_v62 = vor.u32 %v4786_v54, %v4472_v55  ;;  %v4785_v63 = vld [vmem:[%s7206_s1 + $0xa4] sm:$0xf0]  ;;  %v4768_v0 = vld [vmem:[%s7206_s1 + $0x24] sm:$0xf]  ;;  %v4399_v4 = vor.u32 %v4769_v60, %v4398_v59 }
  0x10   :  { %427 = vmatpush.bf16.msra.mxu0 %v4415_v44  ;;  %v4400_v1 = vld [vmem:[%s7206_s1 + $0x28] sm:$0xf0]  ;;  %v4784_v2 = vld [vmem:[%s7206_s1 + $0xa4] sm:$0xf]  ;;  %v4463_v5 = vor.u32 %v4785_v63, %v4462_v61  ;;  %v4390_v7 = vld [vmem:[%s7206_s1 + $0x10] sm:$0xf] }
  0x11   :  { %596 = vmatpush.bf16.msra.mxu1 %v4479_v45  ;;  %765 = vmatpush.bf16.msra.mxu2 %v4419_v46  ;;  %v4464_v3 = vld [vmem:[%s7206_s1 + $0xa8] sm:$0xf0]  ;;  %v4403_v6 = vor.u32 %v4768_v0, %v4400_v1  ;;  %v4767_v8 = vld [vmem:[%s7206_s1 + $0x14] sm:$0xf0]  ;;  %v4454_v9 = vld [vmem:[%s7206_s1 + $0x90] sm:$0xf] }
  0x12   :  { %934 = vmatpush.bf16.msra.mxu3 %v4483_v50  ;;  %v4467_v10 = vor.u32 %v4784_v2, %v4464_v3  ;;  %v4783_v11 = vld [vmem:[%s7206_s1 + $0x94] sm:$0xf0]  ;;  %v4766_v12 = vld [vmem:[%s7206_s1 + $0x14] sm:$0xf]  ;;  %v4392_v13 = vld [vmem:[%s7206_s1 + $0x18] sm:$0xf0]  ;;  %v4391_v16 = vor.u32 %v4767_v8, %v4390_v7 }
  0x13   :  { %v4782_v14 = vld [vmem:[%s7206_s1 + $0x94] sm:$0xf]  ;;  %v4456_v15 = vld [vmem:[%s7206_s1 + $0x98] sm:$0xf0]  ;;  %v4382_v17 = vld [vmem:[%s7206_s1] sm:$0xf]  ;;  %v4455_v20 = vor.u32 %v4783_v11, %v4454_v9  ;;  %v4395_v21 = vor.u32 %v4766_v12, %v4392_v13 }
  0x14   :  { %428 = vmatpush.bf16.msra.mxu0 %v4407_v56  ;;  %v4765_v18 = vld [vmem:[%s7206_s1 + $0x4] sm:$0xf0]  ;;  %v4446_v19 = vld [vmem:[%s7206_s1 + $0x80] sm:$0xf]  ;;  %v4764_v23 = vld [vmem:[%s7206_s1 + $0x4] sm:$0xf]  ;;  %v4459_v25 = vor.u32 %v4782_v14, %v4456_v15 }
  0x15   :  { %597 = vmatpush.bf16.msra.mxu1 %v4471_v57  ;;  %766 = vmatpush.bf16.msra.mxu2 %v4411_v58  ;;  %v4781_v22 = vld [vmem:[%s7206_s1 + $0x84] sm:$0xf0]  ;;  %v4384_v24 = vld [vmem:[%s7206_s1 + $0x8] sm:$0xf0]  ;;  %v4780_v26 = vld [vmem:[%s7206_s1 + $0x84] sm:$0xf]  ;;  %v4383_v32 = vor.u32 %v4765_v18, %v4382_v17 }
  0x16   :  { %935 = vmatpush.bf16.msra.mxu3 %v4475_v62  ;;  %v4448_v27 = vld [vmem:[%s7206_s1 + $0x88] sm:$0xf0]  ;;  %v34_v28 = vld [vmem:[%s7205_s0] sm:$0xff]  ;;  %v36_v29 = vld [vmem:[%s7205_s0 + $0x10] sm:$0xff] }
  0x17   :  { %v4810_v30 = vld [vmem:[%s7208_s3 + $0x74] sm:$0xf]  ;;  %v4568_v31 = vld [vmem:[%s7208_s3 + $0x78] sm:$0xf0] }
  0x18   :  { %429 = vmatpush.bf16.msra.mxu0 %v4399_v4  ;;  %v4826_v33 = vld [vmem:[%s7208_s3 + $0xf4] sm:$0xf]  ;;  %v4632_v34 = vld [vmem:[%s7208_s3 + $0xf8] sm:$0xf0] }
  0x19   :  { %598 = vmatpush.bf16.msra.mxu1 %v4463_v5  ;;  %767 = vmatpush.bf16.msra.mxu2 %v4403_v6 }
  0x1a   :  { %936 = vmatpush.bf16.msra.mxu3 %v4467_v10 }
  0x1c   :  { %430 = vmatpush.bf16.msra.mxu0 %v4391_v16 }
  0x1d   :  { %15 = vsyncpa [#allocation4], 0  ;;  %599 = vmatpush.bf16.msra.mxu1 %v4455_v20  ;;  %768 = vmatpush.bf16.msra.mxu2 %v4395_v21  ;;  %v4447_v35 = vor.u32 %v4781_v22, %v4446_v19  ;;  %v4387_v36 = vor.u32 %v4764_v23, %v4384_v24  ;;  %v35_v37 = vld [vmem:[%s7205_s0 + $0x8] sm:$0xff]  ;;  %v37_v38 = vld [vmem:[%s7205_s0 + $0x18] sm:$0xff]  ;;  %v4451_v39 = vor.u32 %v4780_v26, %v4448_v27  ;;  %vm4205_vm0 = vcmask 130112   ;;  %s4371_s16 = sshll.u32 %s7214_s9, 4  ;;  %s4372_s16 = int_to_ptr.hbm [resolvable:$true] %s4371_s16 }
  0x1e   :  { %937 = vmatpush.bf16.msra.mxu3 %v4459_v25  ;;  %v4571_v40 = vor.u32 %v4810_v30, %v4568_v31  ;;  %v4566_v41 = vld [vmem:[%s7208_s3 + $0x70] sm:$0xf]  ;;  %v4811_v42 = vld [vmem:[%s7208_s3 + $0x74] sm:$0xf0]  ;;  %v162_v43 = vpack.c.bf16 %v36_v29, %v34_v28  ;;  %v4635_v44 = vor.u32 %v4826_v33, %v4632_v34  ;;  %v163_v47 = vpack.c.bf16 %v37_v38, %v35_v37  ;;  %v38_v50 = vld [vmem:[%s7205_s0 + $0x20] sm:$0xff] }
  0x1f   :  { %v4630_v45 = vld [vmem:[%s7208_s3 + $0xf0] sm:$0xf]  ;;  %v4827_v46 = vld [vmem:[%s7208_s3 + $0xf4] sm:$0xf0]  ;;  %v4567_v48 = vor.u32 %v4811_v42, %v4566_v41  ;;  %v39_v52 = vld [vmem:[%s7205_s0 + $0x28] sm:$0xff]  ;;  %vm4209_vm1 = vcmask 195712  }
  0x20   :  { %431 = vmatpush.bf16.msra.mxu0 %v4383_v32  ;;  %v4631_v49 = vor.u32 %v4827_v46, %v4630_v45  ;;  %v40_v51 = vld [vmem:[%s7205_s0 + $0x30] sm:$0xff]  ;;  %v41_v53 = vld [vmem:[%s7205_s0 + $0x38] sm:$0xff]  ;;  %v42_v56 = vld [vmem:[%s7205_s0 + $0x40] sm:$0xff]  ;;  %vm4213_vm2 = vcmask 261312   ;;  %vm4217_vm3 = vcmask 326912   ;;  %vm4221_vm4 = vcmask 392512  }
  0x21   :  { %600 = vmatpush.bf16.msra.mxu1 %v4447_v35  ;;  %769 = vmatpush.bf16.msra.mxu2 %v4387_v36  ;;  %v164_v54 = vpack.c.bf16 %v40_v51, %v38_v50  ;;  %v165_v55 = vpack.c.bf16 %v41_v53, %v39_v52  ;;  %v44_v57 = vld [vmem:[%s7205_s0 + $0x50] sm:$0xff]  ;;  %v43_v58 = vld [vmem:[%s7205_s0 + $0x48] sm:$0xff]  ;;  %v45_v59 = vld [vmem:[%s7205_s0 + $0x58] sm:$0xff]  ;;  %vm4225_vm5 = vcmask 458112   ;;  %vm4229_vm6 = vcmask 523712  }
  0x22   :  { %938 = vmatpush.bf16.msra.mxu3 %v4451_v39  ;;  %v166_v60 = vpack.c.bf16 %v44_v57, %v42_v56  ;;  %v167_v61 = vpack.c.bf16 %v45_v59, %v43_v58  ;;  %v4808_v62 = vld [vmem:[%s7208_s3 + $0x64] sm:$0xf]  ;;  %v4560_v63 = vld [vmem:[%s7208_s3 + $0x68] sm:$0xf0]  ;;  %v4558_v3 = vld [vmem:[%s7208_s3 + $0x60] sm:$0xf] }
  0x23   :  { %432 = vmatmul.bf16.vlgmr.msra.gmra.mxu0 %v162_v43  ;;  %v4824_v0 = vld [vmem:[%s7208_s3 + $0xe4] sm:$0xf]  ;;  %v4563_v1 = vor.u32 %v4808_v62, %v4560_v63  ;;  %v4624_v2 = vld [vmem:[%s7208_s3 + $0xe8] sm:$0xf0]  ;;  %v4809_v4 = vld [vmem:[%s7208_s3 + $0x64] sm:$0xf0] }
  0x24   :  { %601 = vmatmul.bf16.vlgmr.msra.gmra.mxu1 %v163_v47  ;;  %770 = vmatmul.bf16.vlgmr.msra.gmra.mxu2 %v162_v43  ;;  %v4627_v5 = vor.u32 %v4824_v0, %v4624_v2  ;;  %v4559_v6 = vor.u32 %v4809_v4, %v4558_v3  ;;  %v4622_v7 = vld [vmem:[%s7208_s3 + $0xe0] sm:$0xf]  ;;  %v4825_v8 = vld [vmem:[%s7208_s3 + $0xe4] sm:$0xf0]  ;;  %v48_v11 = vld [vmem:[%s7205_s0 + $0x70] sm:$0xff]  ;;  %vm4233_vm7 = vcmask 589312  }
  0x25   :  { %2020 = vmatpush.bf16.msrb.mxu2 %v4571_v40  ;;  %939 = vmatmul.bf16.vlgmr.msra.gmra.mxu3 %v163_v47  ;;  %v4623_v9 = vor.u32 %v4825_v8, %v4622_v7  ;;  %v46_v10 = vld [vmem:[%s7205_s0 + $0x60] sm:$0xff]  ;;  %v47_v12 = vld [vmem:[%s7205_s0 + $0x68] sm:$0xff]  ;;  %v49_v13 = vld [vmem:[%s7205_s0 + $0x78] sm:$0xff]  ;;  %vm4237_vm8 = vcmask 654912   ;;  %vm4241_vm9 = vcmask 720512   ;;  %vm4245_vm10 = vcmask 786112  }
  0x26   :  { %2189 = vmatpush.bf16.msrb.mxu3 %v4635_v44  ;;  %1682 = vmatpush.bf16.msrb.mxu0 %v4567_v48  ;;  %v168_v14 = vpack.c.bf16 %v48_v11, %v46_v10  ;;  %v169_v15 = vpack.c.bf16 %v49_v13, %v47_v12  ;;  %v50_v16 = vld [vmem:[%s7205_s0 + $0x80] sm:$0xff]  ;;  %v52_v17 = vld [vmem:[%s7205_s0 + $0x90] sm:$0xff]  ;;  %v51_v18 = vld [vmem:[%s7205_s0 + $0x88] sm:$0xff]  ;;  %vm4249_vm11 = vcmask 851712   ;;  %vm4253_vm12 = vcmask 917312  }
  0x27   :  { %1851 = vmatpush.bf16.msrb.mxu1 %v4631_v49  ;;  %v53_v19 = vld [vmem:[%s7205_s0 + $0x98] sm:$0xff]  ;;  %v170_v20 = vpack.c.bf16 %v52_v17, %v50_v16  ;;  %v54_v22 = vld [vmem:[%s7205_s0 + $0xa0] sm:$0xff]  ;;  %v56_v23 = vld [vmem:[%s7205_s0 + $0xb0] sm:$0xff]  ;;  %vm4257_vm13 = vcmask 982912   ;;  %vm4261_vm14 = vcmask 1048512   ;;  %vm4356_vm15 = vcmask 1041409  }
  0x28   :  { %v171_v21 = vpack.c.bf16 %v53_v19, %v51_v18  ;;  %v55_v24 = vld [vmem:[%s7205_s0 + $0xa8] sm:$0xff]  ;;  %v57_v25 = vld [vmem:[%s7205_s0 + $0xb8] sm:$0xff]  ;;  %v172_v26 = vpack.c.bf16 %v56_v23, %v54_v22  ;;  %v58_v28 = vld [vmem:[%s7205_s0 + $0xc0] sm:$0xff] }
  0x29   :  { %2021 = vmatpush.bf16.msrb.mxu2 %v4563_v1  ;;  %v173_v27 = vpack.c.bf16 %v57_v25, %v55_v24  ;;  %v60_v29 = vld [vmem:[%s7205_s0 + $0xd0] sm:$0xff]  ;;  %v59_v30 = vld [vmem:[%s7205_s0 + $0xc8] sm:$0xff]  ;;  %v61_v31 = vld [vmem:[%s7205_s0 + $0xd8] sm:$0xff] }
  0x2a   :  { %2190 = vmatpush.bf16.msrb.mxu3 %v4627_v5  ;;  %1683 = vmatpush.bf16.msrb.mxu0 %v4559_v6  ;;  %v174_v32 = vpack.c.bf16 %v60_v29, %v58_v28  ;;  %v175_v33 = vpack.c.bf16 %v61_v31, %v59_v30  ;;  %v4806_v34 = vld [vmem:[%s7208_s3 + $0x54] sm:$0xf]  ;;  %v4552_v35 = vld [vmem:[%s7208_s3 + $0x58] sm:$0xf0]  ;;  %v62_v40 = vld [vmem:[%s7205_s0 + $0xe0] sm:$0xff] }
  0x2b   :  { %1852 = vmatpush.bf16.msrb.mxu1 %v4623_v9  ;;  %v4822_v36 = vld [vmem:[%s7208_s3 + $0xd4] sm:$0xf]  ;;  %v4555_v37 = vor.u32 %v4806_v34, %v4552_v35  ;;  %v4616_v38 = vld [vmem:[%s7208_s3 + $0xd8] sm:$0xf0]  ;;  %v63_v42 = vld [vmem:[%s7205_s0 + $0xe8] sm:$0xff] }
  0x2c   :  { %v4619_v39 = vor.u32 %v4822_v36, %v4616_v38  ;;  %v64_v41 = vld [vmem:[%s7205_s0 + $0xf0] sm:$0xff]  ;;  %v65_v43 = vld [vmem:[%s7205_s0 + $0xf8] sm:$0xff]  ;;  %v258_v52 = vld [vmem:[%s7207_s2] sm:$0x3] }
  0x2d   :  { %2022 = vmatpush.bf16.msrb.mxu2 %v4555_v37  ;;  %v176_v44 = vpack.c.bf16 %v64_v41, %v62_v40  ;;  %v4550_v45 = vld [vmem:[%s7208_s3 + $0x50] sm:$0xf]  ;;  %v4807_v46 = vld [vmem:[%s7208_s3 + $0x54] sm:$0xf0]  ;;  %v177_v48 = vpack.c.bf16 %v65_v43, %v63_v42  ;;  %v66_v53 = vld [vmem:[%s7205_s0 + $0x100] sm:$0xff]  ;;  %v5316_v0 = vperm.slane %v258_v52, 1 }
  0x2e   :  { %2191 = vmatpush.bf16.msrb.mxu3 %v4619_v39  ;;  %v4614_v47 = vld [vmem:[%s7208_s3 + $0xd0] sm:$0xf]  ;;  %v4551_v49 = vor.u32 %v4807_v46, %v4550_v45  ;;  %v4823_v50 = vld [vmem:[%s7208_s3 + $0xd4] sm:$0xf0]  ;;  %v67_v56 = vld [vmem:[%s7205_s0 + $0x108] sm:$0xff] }
  0x2f   :  { %v4615_v51 = vor.u32 %v4823_v50, %v4614_v47  ;;  %v69_v57 = vld [vmem:[%s7205_s0 + $0x118] sm:$0xff]  ;;  %v70_v9 = vld [vmem:[%s7205_s0 + $0x120] sm:$0xff]  ;;  %v72_v10 = vld [vmem:[%s7205_s0 + $0x130] sm:$0xff] }
  0x30   :  { %1684 = vmatpush.bf16.msrb.mxu0 %v4551_v49  ;;  %v71_v13 = vld [vmem:[%s7205_s0 + $0x128] sm:$0xff]  ;;  %v180_v17 = vpack.c.bf16 %v72_v10, %v70_v9  ;;  %v74_v37 = vld [vmem:[%s7205_s0 + $0x140] sm:$0xff]  ;;  %v76_v38 = vld [vmem:[%s7205_s0 + $0x150] sm:$0xff] }
  0x31   :  { %1853 = vmatpush.bf16.msrb.mxu1 %v4615_v51  ;;  %v75_v41 = vld [vmem:[%s7205_s0 + $0x148] sm:$0xff]  ;;  %v77_v42 = vld [vmem:[%s7205_s0 + $0x158] sm:$0xff]  ;;  %v78_v9 = vld [vmem:[%s7205_s0 + $0x160] sm:$0xff] }
  0x32   :  { %v183_v49 = vpack.c.bf16 %v77_v42, %v75_v41  ;;  %v80_v10 = vld [vmem:[%s7205_s0 + $0x170] sm:$0xff] }
  0x33   :  { %437 = vmatmul.bf16.gmra.mxu0 %v164_v54 }
  0x34   :  { %606 = vmatmul.bf16.gmra.mxu1 %v165_v55  ;;  %775 = vmatmul.bf16.gmra.mxu2 %v164_v54  ;;  %v68_v54 = vld [vmem:[%s7205_s0 + $0x110] sm:$0xff] }
  0x35   :  { %944 = vmatmul.bf16.gmra.mxu3 %v165_v55  ;;  %v5307_v55 = vperm.slane %v258_v52, 0  ;;  %v178_v58 = vpack.c.bf16 %v68_v54, %v66_v53 }
  0x43   :  { %442 = vmatmul.bf16.gmra.mxu0 %v166_v60 }
  0x44   :  { %611 = vmatmul.bf16.gmra.mxu1 %v167_v61  ;;  %780 = vmatmul.bf16.gmra.mxu2 %v166_v60  ;;  %v179_v60 = vpack.c.bf16 %v69_v57, %v67_v56  ;;  %v4804_v57 = vld [vmem:[%s7208_s3 + $0x44] sm:$0xf] }
  0x45   :  { %949 = vmatmul.bf16.gmra.mxu3 %v167_v61 }
  0x53   :  { %447 = vmatmul.bf16.gmra.mxu0 %v168_v14 }
  0x54   :  { %616 = vmatmul.bf16.gmra.mxu1 %v169_v15  ;;  %785 = vmatmul.bf16.gmra.mxu2 %v168_v14  ;;  %v73_v14 = vld [vmem:[%s7205_s0 + $0x138] sm:$0xff] }
  0x55   :  { %954 = vmatmul.bf16.gmra.mxu3 %v169_v15 }
  0x63   :  { %452 = vmatmul.bf16.gmra.mxu0 %v170_v20 }
  0x64   :  { %621 = vmatmul.bf16.gmra.mxu1 %v171_v21  ;;  %790 = vmatmul.bf16.gmra.mxu2 %v170_v20 }
  0x65   :  { %959 = vmatmul.bf16.gmra.mxu3 %v171_v21  ;;  %v181_v21 = vpack.c.bf16 %v73_v14, %v71_v13 }
  0x73   :  { %457 = vmatmul.bf16.gmra.mxu0 %v172_v26 }
  0x74   :  { %626 = vmatmul.bf16.gmra.mxu1 %v173_v27  ;;  %795 = vmatmul.bf16.gmra.mxu2 %v172_v26 }
  0x75   :  { %964 = vmatmul.bf16.gmra.mxu3 %v173_v27 }
  0x83   :  { %462 = vmatmul.bf16.gmra.mxu0 %v174_v32 }
  0x84   :  { %631 = vmatmul.bf16.gmra.mxu1 %v175_v33  ;;  %800 = vmatmul.bf16.gmra.mxu2 %v174_v32 }
  0x85   :  { %969 = vmatmul.bf16.gmra.mxu3 %v175_v33 }
  0x93   :  { %467 = vmatmul.bf16.gmra.mxu0 %v176_v44 }
  0x94   :  { %636 = vmatmul.bf16.gmra.mxu1 %v177_v48  ;;  %805 = vmatmul.bf16.gmra.mxu2 %v176_v44  ;;  %v182_v44 = vpack.c.bf16 %v76_v38, %v74_v37 }
  0x95   :  { %974 = vmatmul.bf16.gmra.mxu3 %v177_v48 }
  0xa0   :  { %v433_v59 = vpop.f32.mrf.mxu0 }
  0xa1   :  { %v434_v61 = vadd.f32 %v433_v59, %v5307_v55  ;;  %v602_v62 = vpop.f32.mrf.mxu1 }
  0xa3   :  { %v603_v63 = vadd.f32 %v602_v62, %v434_v61  ;;  %472 = vmatmul.bf16.gmra.mxu0 %v178_v58  ;;  %v4608_v61 = vld [vmem:[%s7208_s3 + $0xc8] sm:$0xf0] }
  0xa4   :  { %641 = vmatmul.bf16.gmra.mxu1 %v179_v60  ;;  %810 = vmatmul.bf16.gmra.mxu2 %v178_v58  ;;  %v4544_v58 = vld [vmem:[%s7208_s3 + $0x48] sm:$0xf0] }
  0xa5   :  { %979 = vmatmul.bf16.gmra.mxu3 %v179_v60  ;;  %v1292_v11 = vmax.f32 %v603_v63, 0.0  ;;  %v4547_v59 = vor.u32 %v4804_v57, %v4544_v58  ;;  %v4820_v60 = vld [vmem:[%s7208_s3 + $0xc4] sm:$0xf] }
  0xa7   :  { %v771_v1 = vpop.f32.mrf.mxu2  ;;  %2023 = vmatpush.bf16.msrb.mxu2 %v4547_v59 }
  0xa8   :  { %v772_v2 = vadd.f32 %v771_v1, %v5316_v0  ;;  %v940_v3 = vpop.f32.mrf.mxu3  ;;  %v435_v4 = vpop.f32.mrf.mxu0  ;;  %v4611_v1 = vor.u32 %v4820_v60, %v4608_v61 }
  0xa9   :  { %v436_v5 = vadd.f32 %v435_v4, %v5307_v55  ;;  %v604_v6 = vpop.f32.mrf.mxu1 }
  0xaa   :  { %v941_v7 = vadd.f32 %v940_v3, %v772_v2  ;;  %2192 = vmatpush.bf16.msrb.mxu3 %v4611_v1 }
  0xab   :  { %v605_v8 = vadd.f32 %v604_v6, %v436_v5 }
  0xac   :  { %v1293_v26 = vmax.f32 %v941_v7, 0.0 }
  0xad   :  { %v1294_v12 = vmax.f32 %v605_v8, 0.0 }
  0xaf   :  { %v5332_v15 = vpack.c.bf16 %v1294_v12, %v1292_v11  ;;  %v773_v16 = vpop.f32.mrf.mxu2  ;;  %v79_v11 = vld [vmem:[%s7205_s0 + $0x168] sm:$0xff]  ;;  %v81_v12 = vld [vmem:[%s7205_s0 + $0x178] sm:$0xff] }
  0xb0   :  { %v774_v18 = vadd.f32 %v773_v16, %v5316_v0  ;;  %v942_v19 = vpop.f32.mrf.mxu3  ;;  %v438_v20 = vpop.f32.mrf.mxu0  ;;  %v4542_v16 = vld [vmem:[%s7208_s3 + $0x40] sm:$0xf] }
  0xb1   :  { %v439_v22 = vadd.f32 %v438_v20, %v5307_v55  ;;  %v607_v23 = vpop.f32.mrf.mxu1  ;;  %v4821_v20 = vld [vmem:[%s7208_s3 + $0xc4] sm:$0xf0] }
  0xb2   :  { %v943_v24 = vadd.f32 %v942_v19, %v774_v18  ;;  %v4606_v19 = vld [vmem:[%s7208_s3 + $0xc0] sm:$0xf] }
  0xb3   :  { %v608_v25 = vadd.f32 %v607_v23, %v439_v22  ;;  %477 = vmatmul.bf16.gmra.mxu0 %v180_v17  ;;  %v184_v22 = vpack.c.bf16 %v80_v10, %v78_v9  ;;  %v4607_v23 = vor.u32 %v4821_v20, %v4606_v19  ;;  %v89_v19 = vld [vmem:[%s7205_s0 + $0x1b8] sm:$0xff] }
  0xb4   :  { %v1295_v27 = vmax.f32 %v943_v24, 0.0  ;;  %646 = vmatmul.bf16.gmra.mxu1 %v181_v21  ;;  %815 = vmatmul.bf16.gmra.mxu2 %v180_v17  ;;  %v4805_v17 = vld [vmem:[%s7208_s3 + $0x44] sm:$0xf0] }
  0xb5   :  { %984 = vmatmul.bf16.gmra.mxu3 %v181_v21  ;;  %v1296_v39 = vmax.f32 %v608_v25, 0.0  ;;  %v4543_v18 = vor.u32 %v4805_v17, %v4542_v16  ;;  %1854 = vmatpush.bf16.msrb.mxu1 %v4607_v23 }
  0xb6   :  { %v5336_v28 = vpack.c.bf16 %v1295_v27, %v1293_v26 }
  0xb7   :  { %v776_v29 = vpop.f32.mrf.mxu2  ;;  %1685 = vmatpush.bf16.msrb.mxu0 %v4543_v18  ;;  %v87_v18 = vld [vmem:[%s7205_s0 + $0x1a8] sm:$0xff] }
  0xb8   :  { %v777_v30 = vadd.f32 %v776_v29, %v5316_v0  ;;  %v945_v31 = vpop.f32.mrf.mxu3  ;;  %v440_v32 = vpop.f32.mrf.mxu0  ;;  %v185_v29 = vpack.c.bf16 %v81_v12, %v79_v11 }
  0xb9   :  { %v441_v33 = vadd.f32 %v440_v32, %v5307_v55  ;;  %v609_v34 = vpop.f32.mrf.mxu1 }
  0xba   :  { %v946_v35 = vadd.f32 %v945_v31, %v777_v30 }
  0xbb   :  { %v610_v36 = vadd.f32 %v609_v34, %v441_v33 }
  0xbc   :  { %v1297_v54 = vmax.f32 %v946_v35, 0.0 }
  0xbd   :  { %v1298_v40 = vmax.f32 %v610_v36, 0.0 }
  0xbf   :  { %v778_v43 = vpop.f32.mrf.mxu2  ;;  %v5352_v45 = vpack.c.bf16 %v1298_v40, %v1296_v39 }
  0xc0   :  { %v779_v46 = vadd.f32 %v778_v43, %v5316_v0  ;;  %v947_v47 = vpop.f32.mrf.mxu3  ;;  %v443_v48 = vpop.f32.mrf.mxu0 }
  0xc1   :  { %v444_v50 = vadd.f32 %v443_v48, %v5307_v55  ;;  %v612_v51 = vpop.f32.mrf.mxu1 }
  0xc2   :  { %v948_v52 = vadd.f32 %v947_v47, %v779_v46  ;;  %v82_v46 = vld [vmem:[%s7205_s0 + $0x180] sm:$0xff]  ;;  %v84_v47 = vld [vmem:[%s7205_s0 + $0x190] sm:$0xff] }
  0xc3   :  { %v613_v53 = vadd.f32 %v612_v51, %v444_v50  ;;  %482 = vmatmul.bf16.gmra.mxu0 %v182_v44  ;;  %v83_v50 = vld [vmem:[%s7205_s0 + $0x188] sm:$0xff]  ;;  %v85_v51 = vld [vmem:[%s7205_s0 + $0x198] sm:$0xff] }
  0xc4   :  { %v1299_v56 = vmax.f32 %v948_v52, 0.0  ;;  %651 = vmatmul.bf16.gmra.mxu1 %v183_v49  ;;  %820 = vmatmul.bf16.gmra.mxu2 %v182_v44  ;;  %v187_v59 = vpack.c.bf16 %v85_v51, %v83_v50  ;;  %v91_v50 = vld [vmem:[%s7205_s0 + $0x1c8] sm:$0xff]  ;;  %v93_v51 = vld [vmem:[%s7205_s0 + $0x1d8] sm:$0xff] }
  0xc5   :  { %989 = vmatmul.bf16.gmra.mxu3 %v183_v49  ;;  %v1300_v13 = vmax.f32 %v613_v53, 0.0  ;;  %v186_v53 = vpack.c.bf16 %v84_v47, %v82_v46  ;;  %v90_v46 = vld [vmem:[%s7205_s0 + $0x1c0] sm:$0xff]  ;;  %v92_v47 = vld [vmem:[%s7205_s0 + $0x1d0] sm:$0xff] }
  0xc6   :  { %v5368_v62 = vpack.c.bf16 %v1299_v56, %v1297_v54 }
  0xc7   :  { %v781_v63 = vpop.f32.mrf.mxu2 }
  0xc8   :  { %v782_v2 = vadd.f32 %v781_v63, %v5316_v0  ;;  %v950_v3 = vpop.f32.mrf.mxu3  ;;  %v445_v4 = vpop.f32.mrf.mxu0 }
  0xc9   :  { %v446_v5 = vadd.f32 %v445_v4, %v5307_v55  ;;  %v614_v6 = vpop.f32.mrf.mxu1 }
  0xca   :  { %v951_v7 = vadd.f32 %v950_v3, %v782_v2 }
  0xcb   :  { %v615_v8 = vadd.f32 %v614_v6, %v446_v5 }
  0xcc   :  { %v1301_v34 = vmax.f32 %v951_v7, 0.0 }
  0xcd   :  { %v1302_v14 = vmax.f32 %v615_v8, 0.0 }
  0xcf   :  { %v783_v21 = vpop.f32.mrf.mxu2  ;;  %v5396_v24 = vpack.c.bf16 %v1302_v14, %v1300_v13  ;;  %v86_v13 = vld [vmem:[%s7205_s0 + $0x1a0] sm:$0xff]  ;;  %v88_v14 = vld [vmem:[%s7205_s0 + $0x1b0] sm:$0xff] }
  0xd0   :  { %v784_v25 = vadd.f32 %v783_v21, %v5316_v0  ;;  %v952_v26 = vpop.f32.mrf.mxu3  ;;  %v448_v27 = vpop.f32.mrf.mxu0  ;;  %v188_v21 = vpack.c.bf16 %v88_v14, %v86_v13 }
  0xd1   :  { %v449_v30 = vadd.f32 %v448_v27, %v5307_v55  ;;  %v617_v31 = vpop.f32.mrf.mxu1  ;;  %v189_v27 = vpack.c.bf16 %v89_v19, %v87_v18 }
  0xd2   :  { %v953_v32 = vadd.f32 %v952_v26, %v784_v25 }
  0xd3   :  { %v618_v33 = vadd.f32 %v617_v31, %v449_v30  ;;  %487 = vmatmul.bf16.gmra.mxu0 %v184_v22 }
  0xd4   :  { %v1303_v35 = vmax.f32 %v953_v32, 0.0  ;;  %656 = vmatmul.bf16.gmra.mxu1 %v185_v29  ;;  %825 = vmatmul.bf16.gmra.mxu2 %v184_v22 }
  0xd5   :  { %994 = vmatmul.bf16.gmra.mxu3 %v185_v29  ;;  %v1304_v48 = vmax.f32 %v618_v33, 0.0 }
  0xd6   :  { %v5400_v36 = vpack.c.bf16 %v1303_v35, %v1301_v34 }
  0xd7   :  { %v786_v37 = vpop.f32.mrf.mxu2 }
  0xd8   :  { %v787_v38 = vadd.f32 %v786_v37, %v5316_v0  ;;  %v955_v39 = vpop.f32.mrf.mxu3  ;;  %v450_v40 = vpop.f32.mrf.mxu0 }
  0xd9   :  { %v451_v41 = vadd.f32 %v450_v40, %v5307_v55  ;;  %v619_v42 = vpop.f32.mrf.mxu1 }
  0xda   :  { %v956_v43 = vadd.f32 %v955_v39, %v787_v38 }
  0xdb   :  { %v620_v44 = vadd.f32 %v619_v42, %v451_v41 }
  0xdc   :  { %v1305_v2 = vmax.f32 %v956_v43, 0.0 }
  0xdd   :  { %v1306_v49 = vmax.f32 %v620_v44, 0.0 }
  0xdf   :  { %v788_v52 = vpop.f32.mrf.mxu2  ;;  %v5416_v54 = vpack.c.bf16 %v1306_v49, %v1304_v48 }
  0xe0   :  { %v789_v56 = vadd.f32 %v788_v52, %v5316_v0  ;;  %v957_v57 = vpop.f32.mrf.mxu3  ;;  %v453_v58 = vpop.f32.mrf.mxu0 }
  0xe1   :  { %v454_v60 = vadd.f32 %v453_v58, %v5307_v55  ;;  %v622_v61 = vpop.f32.mrf.mxu1 }
  0xe2   :  { %v958_v63 = vadd.f32 %v957_v57, %v789_v56 }
  0xe3   :  { %v623_v1 = vadd.f32 %v622_v61, %v454_v60  ;;  %492 = vmatmul.bf16.gmra.mxu0 %v186_v53  ;;  %v191_v60 = vpack.c.bf16 %v93_v51, %v91_v50 }
  0xe4   :  { %v1307_v3 = vmax.f32 %v958_v63, 0.0  ;;  %661 = vmatmul.bf16.gmra.mxu1 %v187_v59  ;;  %830 = vmatmul.bf16.gmra.mxu2 %v186_v53  ;;  %v190_v53 = vpack.c.bf16 %v92_v47, %v90_v46 }
  0xe5   :  { %999 = vmatmul.bf16.gmra.mxu3 %v187_v59  ;;  %v1308_v16 = vmax.f32 %v623_v1, 0.0 }
  0xe6   :  { %v5420_v4 = vpack.c.bf16 %v1307_v3, %v1305_v2 }
  0xe7   :  { %v791_v5 = vpop.f32.mrf.mxu2 }
  0xe8   :  { %v792_v6 = vadd.f32 %v791_v5, %v5316_v0  ;;  %v960_v7 = vpop.f32.mrf.mxu3  ;;  %v455_v8 = vpop.f32.mrf.mxu0 }
  0xe9   :  { %v456_v9 = vadd.f32 %v455_v8, %v5307_v55  ;;  %v624_v10 = vpop.f32.mrf.mxu1 }
  0xea   :  { %v961_v11 = vadd.f32 %v960_v7, %v792_v6  ;;  %v4802_v6 = vld [vmem:[%s7208_s3 + $0x34] sm:$0xf]  ;;  %v4536_v7 = vld [vmem:[%s7208_s3 + $0x38] sm:$0xf0] }
  0xeb   :  { %v625_v12 = vadd.f32 %v624_v10, %v456_v9  ;;  %v4539_v8 = vor.u32 %v4802_v6, %v4536_v7  ;;  %v4818_v9 = vld [vmem:[%s7208_s3 + $0xb4] sm:$0xf]  ;;  %v4600_v10 = vld [vmem:[%s7208_s3 + $0xb8] sm:$0xf0] }
  0xec   :  { %v1309_v33 = vmax.f32 %v961_v11, 0.0  ;;  %v4603_v13 = vor.u32 %v4818_v9, %v4600_v10  ;;  %v101_v9 = vld [vmem:[%s7205_s0 + $0x218] sm:$0xff] }
  0xed   :  { %v1310_v17 = vmax.f32 %v625_v12, 0.0  ;;  %2024 = vmatpush.bf16.msrb.mxu2 %v4539_v8  ;;  %v99_v8 = vld [vmem:[%s7205_s0 + $0x208] sm:$0xff] }
  0xee   :  { %2193 = vmatpush.bf16.msrb.mxu3 %v4603_v13 }
  0xef   :  { %v793_v20 = vpop.f32.mrf.mxu2  ;;  %v5436_v22 = vpack.c.bf16 %v1310_v17, %v1308_v16 }
  0xf0   :  { %v794_v23 = vadd.f32 %v793_v20, %v5316_v0  ;;  %v962_v25 = vpop.f32.mrf.mxu3  ;;  %v458_v26 = vpop.f32.mrf.mxu0 }
  0xf1   :  { %v459_v29 = vadd.f32 %v458_v26, %v5307_v55  ;;  %v627_v30 = vpop.f32.mrf.mxu1  ;;  %v95_v26 = vld [vmem:[%s7205_s0 + $0x1e8] sm:$0xff] }
  0xf2   :  { %v963_v31 = vadd.f32 %v962_v25, %v794_v23  ;;  %v94_v23 = vld [vmem:[%s7205_s0 + $0x1e0] sm:$0xff]  ;;  %v96_v25 = vld [vmem:[%s7205_s0 + $0x1f0] sm:$0xff] }
  0xf3   :  { %v628_v32 = vadd.f32 %v627_v30, %v459_v29  ;;  %497 = vmatmul.bf16.gmra.mxu0 %v188_v21 }
  0xf4   :  { %v1311_v34 = vmax.f32 %v963_v31, 0.0  ;;  %666 = vmatmul.bf16.gmra.mxu1 %v189_v27  ;;  %835 = vmatmul.bf16.gmra.mxu2 %v188_v21  ;;  %v4534_v31 = vld [vmem:[%s7208_s3 + $0x30] sm:$0xf] }
  0xf5   :  { %1004 = vmatmul.bf16.gmra.mxu3 %v189_v27  ;;  %v1312_v48 = vmax.f32 %v628_v32, 0.0  ;;  %v97_v27 = vld [vmem:[%s7205_s0 + $0x1f8] sm:$0xff] }
  0xf6   :  { %v5440_v35 = vpack.c.bf16 %v1311_v34, %v1309_v33  ;;  %v4803_v32 = vld [vmem:[%s7208_s3 + $0x34] sm:$0xf0]  ;;  %v4598_v34 = vld [vmem:[%s7208_s3 + $0xb0] sm:$0xf]  ;;  %v193_v46 = vpack.c.bf16 %v97_v27, %v95_v26 }
  0xf7   :  { %v796_v37 = vpop.f32.mrf.mxu2  ;;  %v4535_v33 = vor.u32 %v4803_v32, %v4534_v31 }
  0xf8   :  { %v797_v38 = vadd.f32 %v796_v37, %v5316_v0  ;;  %v965_v39 = vpop.f32.mrf.mxu3  ;;  %v460_v40 = vpop.f32.mrf.mxu0  ;;  %v4819_v37 = vld [vmem:[%s7208_s3 + $0xb4] sm:$0xf0] }
  0xf9   :  { %v461_v41 = vadd.f32 %v460_v40, %v5307_v55  ;;  %v629_v42 = vpop.f32.mrf.mxu1  ;;  %v4599_v40 = vor.u32 %v4819_v37, %v4598_v34  ;;  %1686 = vmatpush.bf16.msrb.mxu0 %v4535_v33 }
  0xfa   :  { %v966_v43 = vadd.f32 %v965_v39, %v797_v38  ;;  %v192_v39 = vpack.c.bf16 %v96_v25, %v94_v23 }
  0xfb   :  { %v630_v44 = vadd.f32 %v629_v42, %v461_v41  ;;  %1855 = vmatpush.bf16.msrb.mxu1 %v4599_v40  ;;  %v104_v40 = vld [vmem:[%s7205_s0 + $0x230] sm:$0xff] }
  0xfc   :  { %v1313_v3 = vmax.f32 %v966_v43, 0.0 }
  0xfd   :  { %v1314_v49 = vmax.f32 %v630_v44, 0.0 }
  0xff   :  { %v798_v52 = vpop.f32.mrf.mxu2  ;;  %v5456_v56 = vpack.c.bf16 %v1314_v49, %v1312_v48 }
 0x100   :  { %v799_v57 = vadd.f32 %v798_v52, %v5316_v0  ;;  %v967_v58 = vpop.f32.mrf.mxu3  ;;  %v463_v59 = vpop.f32.mrf.mxu0 }
 0x101   :  { %v464_v61 = vadd.f32 %v463_v59, %v5307_v55  ;;  %v632_v63 = vpop.f32.mrf.mxu1 }
 0x102   :  { %v968_v1 = vadd.f32 %v967_v58, %v799_v57 }
 0x103   :  { %v633_v2 = vadd.f32 %v632_v63, %v464_v61  ;;  %502 = vmatmul.bf16.gmra.mxu0 %v190_v53 }
 0x104   :  { %v1315_v5 = vmax.f32 %v968_v1, 0.0  ;;  %671 = vmatmul.bf16.gmra.mxu1 %v191_v60  ;;  %840 = vmatmul.bf16.gmra.mxu2 %v190_v53 }
 0x105   :  { %1009 = vmatmul.bf16.gmra.mxu3 %v191_v60  ;;  %v1316_v29 = vmax.f32 %v633_v2, 0.0 }
 0x106   :  { %v5472_v11 = vpack.c.bf16 %v1315_v5, %v1313_v3  ;;  %v98_v3 = vld [vmem:[%s7205_s0 + $0x200] sm:$0xff]  ;;  %v100_v5 = vld [vmem:[%s7205_s0 + $0x210] sm:$0xff] }
 0x107   :  { %v801_v12 = vpop.f32.mrf.mxu2 }
 0x108   :  { %v802_v14 = vadd.f32 %v801_v12, %v5316_v0  ;;  %v970_v16 = vpop.f32.mrf.mxu3  ;;  %v465_v17 = vpop.f32.mrf.mxu0  ;;  %v194_v12 = vpack.c.bf16 %v100_v5, %v98_v3 }
 0x109   :  { %v466_v18 = vadd.f32 %v465_v17, %v5307_v55  ;;  %v634_v19 = vpop.f32.mrf.mxu1 }
 0x10a   :  { %v971_v20 = vadd.f32 %v970_v16, %v802_v14 }
 0x10b   :  { %v635_v21 = vadd.f32 %v634_v19, %v466_v18  ;;  %v195_v18 = vpack.c.bf16 %v101_v9, %v99_v8 }
 0x10c   :  { %v1317_v51 = vmax.f32 %v971_v20, 0.0 }
 0x10d   :  { %v1318_v30 = vmax.f32 %v635_v21, 0.0 }
 0x10f   :  { %v803_v38 = vpop.f32.mrf.mxu2  ;;  %v5500_v41 = vpack.c.bf16 %v1318_v30, %v1316_v29 }
 0x110   :  { %v804_v42 = vadd.f32 %v803_v38, %v5316_v0  ;;  %v972_v43 = vpop.f32.mrf.mxu3  ;;  %v468_v44 = vpop.f32.mrf.mxu0 }
 0x111   :  { %v469_v47 = vadd.f32 %v468_v44, %v5307_v55  ;;  %v637_v48 = vpop.f32.mrf.mxu1  ;;  %v103_v44 = vld [vmem:[%s7205_s0 + $0x228] sm:$0xff] }
 0x112   :  { %v973_v49 = vadd.f32 %v972_v43, %v804_v42 }
 0x113   :  { %v638_v50 = vadd.f32 %v637_v48, %v469_v47  ;;  %507 = vmatmul.bf16.gmra.mxu0 %v192_v39 }
 0x114   :  { %v1319_v52 = vmax.f32 %v973_v49, 0.0  ;;  %676 = vmatmul.bf16.gmra.mxu1 %v193_v46  ;;  %845 = vmatmul.bf16.gmra.mxu2 %v192_v39  ;;  %v102_v39 = vld [vmem:[%s7205_s0 + $0x220] sm:$0xff] }
 0x115   :  { %1014 = vmatmul.bf16.gmra.mxu3 %v193_v46  ;;  %v1320_v6 = vmax.f32 %v638_v50, 0.0  ;;  %v105_v46 = vld [vmem:[%s7205_s0 + $0x238] sm:$0xff]  ;;  %v196_v48 = vpack.c.bf16 %v104_v40, %v102_v39  ;;  %v4800_v40 = vld [vmem:[%s7208_s3 + $0x24] sm:$0xf] }
 0x116   :  { %v5504_v53 = vpack.c.bf16 %v1319_v52, %v1317_v51 }
 0x117   :  { %v806_v57 = vpop.f32.mrf.mxu2 }
 0x118   :  { %v807_v58 = vadd.f32 %v806_v57, %v5316_v0  ;;  %v975_v59 = vpop.f32.mrf.mxu3  ;;  %v470_v60 = vpop.f32.mrf.mxu0  ;;  %v197_v57 = vpack.c.bf16 %v105_v46, %v103_v44  ;;  %v4816_v44 = vld [vmem:[%s7208_s3 + $0xa4] sm:$0xf]  ;;  %v4592_v46 = vld [vmem:[%s7208_s3 + $0xa8] sm:$0xf0] }
 0x119   :  { %v471_v61 = vadd.f32 %v470_v60, %v5307_v55  ;;  %v639_v63 = vpop.f32.mrf.mxu1 }
 0x11a   :  { %v976_v1 = vadd.f32 %v975_v59, %v807_v58 }
 0x11b   :  { %v640_v2 = vadd.f32 %v639_v63, %v471_v61 }
 0x11c   :  { %v1321_v25 = vmax.f32 %v976_v1, 0.0 }
 0x11d   :  { %v1322_v7 = vmax.f32 %v640_v2, 0.0 }
 0x11f   :  { %v808_v10 = vpop.f32.mrf.mxu2  ;;  %v5520_v13 = vpack.c.bf16 %v1322_v7, %v1320_v6 }
 0x120   :  { %v809_v14 = vadd.f32 %v808_v10, %v5316_v0  ;;  %v977_v16 = vpop.f32.mrf.mxu3  ;;  %v473_v17 = vpop.f32.mrf.mxu0 }
 0x121   :  { %v474_v19 = vadd.f32 %v473_v17, %v5307_v55  ;;  %v642_v20 = vpop.f32.mrf.mxu1 }
 0x122   :  { %v978_v21 = vadd.f32 %v977_v16, %v809_v14  ;;  %v106_v14 = vld [vmem:[%s7205_s0 + $0x240] sm:$0xff]  ;;  %v108_v16 = vld [vmem:[%s7205_s0 + $0x250] sm:$0xff] }
 0x123   :  { %v643_v23 = vadd.f32 %v642_v20, %v474_v19  ;;  %512 = vmatmul.bf16.gmra.mxu0 %v194_v12  ;;  %v107_v19 = vld [vmem:[%s7205_s0 + $0x248] sm:$0xff]  ;;  %v109_v20 = vld [vmem:[%s7205_s0 + $0x258] sm:$0xff] }
 0x124   :  { %v1323_v26 = vmax.f32 %v978_v21, 0.0  ;;  %681 = vmatmul.bf16.gmra.mxu1 %v195_v18  ;;  %850 = vmatmul.bf16.gmra.mxu2 %v194_v12 }
 0x125   :  { %1019 = vmatmul.bf16.gmra.mxu3 %v195_v18  ;;  %v1324_v42 = vmax.f32 %v643_v23, 0.0  ;;  %v198_v23 = vpack.c.bf16 %v108_v16, %v106_v14  ;;  %v4817_v14 = vld [vmem:[%s7208_s3 + $0xa4] sm:$0xf0] }
 0x126   :  { %v5524_v27 = vpack.c.bf16 %v1323_v26, %v1321_v25 }
 0x127   :  { %v811_v29 = vpop.f32.mrf.mxu2 }
 0x128   :  { %v812_v30 = vadd.f32 %v811_v29, %v5316_v0  ;;  %v980_v31 = vpop.f32.mrf.mxu3  ;;  %v475_v32 = vpop.f32.mrf.mxu0 }
 0x129   :  { %v476_v33 = vadd.f32 %v475_v32, %v5307_v55  ;;  %v644_v34 = vpop.f32.mrf.mxu1 }
 0x12a   :  { %v981_v37 = vadd.f32 %v980_v31, %v812_v30  ;;  %v199_v31 = vpack.c.bf16 %v109_v20, %v107_v19 }
 0x12b   :  { %v645_v38 = vadd.f32 %v644_v34, %v476_v33 }
 0x12c   :  { %v1325_v63 = vmax.f32 %v981_v37, 0.0 }
 0x12d   :  { %v1326_v43 = vmax.f32 %v645_v38, 0.0 }
 0x12f   :  { %v813_v47 = vpop.f32.mrf.mxu2  ;;  %v5540_v49 = vpack.c.bf16 %v1326_v43, %v1324_v42  ;;  %v4528_v42 = vld [vmem:[%s7208_s3 + $0x28] sm:$0xf0] }
 0x130   :  { %v814_v50 = vadd.f32 %v813_v47, %v5316_v0  ;;  %v982_v51 = vpop.f32.mrf.mxu3  ;;  %v478_v52 = vpop.f32.mrf.mxu0  ;;  %v4531_v43 = vor.u32 %v4800_v40, %v4528_v42 }
 0x131   :  { %v479_v58 = vadd.f32 %v478_v52, %v5307_v55  ;;  %v647_v59 = vpop.f32.mrf.mxu1 }
 0x132   :  { %v983_v60 = vadd.f32 %v982_v51, %v814_v50  ;;  %v4595_v50 = vor.u32 %v4816_v44, %v4592_v46  ;;  %2025 = vmatpush.bf16.msrb.mxu2 %v4531_v43 }
 0x133   :  { %v648_v61 = vadd.f32 %v647_v59, %v479_v58  ;;  %517 = vmatmul.bf16.gmra.mxu0 %v196_v48 }
 0x134   :  { %v1327_v1 = vmax.f32 %v983_v60, 0.0  ;;  %686 = vmatmul.bf16.gmra.mxu1 %v197_v57  ;;  %855 = vmatmul.bf16.gmra.mxu2 %v196_v48 }
 0x135   :  { %1024 = vmatmul.bf16.gmra.mxu3 %v197_v57  ;;  %v1328_v17 = vmax.f32 %v648_v61, 0.0 }
 0x136   :  { %v5544_v2 = vpack.c.bf16 %v1327_v1, %v1325_v63  ;;  %2194 = vmatpush.bf16.msrb.mxu3 %v4595_v50  ;;  %v110_v63 = vld [vmem:[%s7205_s0 + $0x260] sm:$0xff]  ;;  %v112_v1 = vld [vmem:[%s7205_s0 + $0x270] sm:$0xff] }
 0x137   :  { %v816_v3 = vpop.f32.mrf.mxu2  ;;  %v114_v50 = vld [vmem:[%s7205_s0 + $0x280] sm:$0xff] }
 0x138   :  { %v817_v5 = vadd.f32 %v816_v3, %v5316_v0  ;;  %v985_v6 = vpop.f32.mrf.mxu3  ;;  %v480_v7 = vpop.f32.mrf.mxu0  ;;  %v111_v3 = vld [vmem:[%s7205_s0 + $0x268] sm:$0xff] }
 0x139   :  { %v481_v8 = vadd.f32 %v480_v7, %v5307_v55  ;;  %v649_v9 = vpop.f32.mrf.mxu1 }
 0x13a   :  { %v986_v10 = vadd.f32 %v985_v6, %v817_v5  ;;  %v113_v5 = vld [vmem:[%s7205_s0 + $0x278] sm:$0xff] }
 0x13b   :  { %v650_v12 = vadd.f32 %v649_v9, %v481_v8  ;;  %v4526_v8 = vld [vmem:[%s7208_s3 + $0x20] sm:$0xf]  ;;  %v4801_v9 = vld [vmem:[%s7208_s3 + $0x24] sm:$0xf0] }
 0x13c   :  { %v1329_v38 = vmax.f32 %v986_v10, 0.0  ;;  %v4527_v10 = vor.u32 %v4801_v9, %v4526_v8 }
 0x13d   :  { %v1330_v18 = vmax.f32 %v650_v12, 0.0  ;;  %v4590_v12 = vld [vmem:[%s7208_s3 + $0xa0] sm:$0xf] }
 0x13e   :  { %1687 = vmatpush.bf16.msrb.mxu0 %v4527_v10 }
 0x13f   :  { %v818_v21 = vpop.f32.mrf.mxu2  ;;  %v5560_v25 = vpack.c.bf16 %v1330_v18, %v1328_v17  ;;  %v200_v17 = vpack.c.bf16 %v112_v1, %v110_v63  ;;  %v4591_v18 = vor.u32 %v4817_v14, %v4590_v12 }
 0x140   :  { %v819_v26 = vadd.f32 %v818_v21, %v5316_v0  ;;  %v987_v29 = vpop.f32.mrf.mxu3  ;;  %v483_v30 = vpop.f32.mrf.mxu0 }
 0x141   :  { %v484_v32 = vadd.f32 %v483_v30, %v5307_v55  ;;  %v652_v33 = vpop.f32.mrf.mxu1  ;;  %1856 = vmatpush.bf16.msrb.mxu1 %v4591_v18 }
 0x142   :  { %v988_v34 = vadd.f32 %v987_v29, %v819_v26  ;;  %v201_v26 = vpack.c.bf16 %v113_v5, %v111_v3 }
 0x143   :  { %v653_v37 = vadd.f32 %v652_v33, %v484_v32  ;;  %522 = vmatmul.bf16.gmra.mxu0 %v198_v23 }
 0x144   :  { %v1331_v39 = vmax.f32 %v988_v34, 0.0  ;;  %691 = vmatmul.bf16.gmra.mxu1 %v199_v31  ;;  %860 = vmatmul.bf16.gmra.mxu2 %v198_v23 }
 0x145   :  { %1029 = vmatmul.bf16.gmra.mxu3 %v199_v31  ;;  %v1332_v6 = vmax.f32 %v653_v37, 0.0 }
 0x146   :  { %v5576_v47 = vpack.c.bf16 %v1331_v39, %v1329_v38 }
 0x147   :  { %v821_v48 = vpop.f32.mrf.mxu2 }
 0x148   :  { %v822_v51 = vadd.f32 %v821_v48, %v5316_v0  ;;  %v990_v52 = vpop.f32.mrf.mxu3  ;;  %v485_v57 = vpop.f32.mrf.mxu0 }
 0x149   :  { %v486_v58 = vadd.f32 %v485_v57, %v5307_v55  ;;  %v654_v59 = vpop.f32.mrf.mxu1 }
 0x14a   :  { %v991_v60 = vadd.f32 %v990_v52, %v822_v51  ;;  %v116_v51 = vld [vmem:[%s7205_s0 + $0x290] sm:$0xff] }
 0x14b   :  { %v655_v61 = vadd.f32 %v654_v59, %v486_v58  ;;  %v115_v58 = vld [vmem:[%s7205_s0 + $0x288] sm:$0xff]  ;;  %v117_v59 = vld [vmem:[%s7205_s0 + $0x298] sm:$0xff] }
 0x14c   :  { %v1333_v33 = vmax.f32 %v991_v60, 0.0 }
 0x14d   :  { %v1334_v7 = vmax.f32 %v655_v61, 0.0  ;;  %v202_v61 = vpack.c.bf16 %v116_v51, %v114_v50 }
 0x14f   :  { %v823_v16 = vpop.f32.mrf.mxu2  ;;  %v5604_v19 = vpack.c.bf16 %v1334_v7, %v1332_v6  ;;  %v203_v6 = vpack.c.bf16 %v117_v59, %v115_v58 }
 0x150   :  { %v824_v20 = vadd.f32 %v823_v16, %v5316_v0  ;;  %v992_v21 = vpop.f32.mrf.mxu3  ;;  %v488_v23 = vpop.f32.mrf.mxu0 }
 0x151   :  { %v489_v29 = vadd.f32 %v488_v23, %v5307_v55  ;;  %v657_v30 = vpop.f32.mrf.mxu1 }
 0x152   :  { %v993_v31 = vadd.f32 %v992_v21, %v824_v20 }
 0x153   :  { %v658_v32 = vadd.f32 %v657_v30, %v489_v29  ;;  %527 = vmatmul.bf16.gmra.mxu0 %v200_v17 }
 0x154   :  { %v1335_v34 = vmax.f32 %v993_v31, 0.0  ;;  %696 = vmatmul.bf16.gmra.mxu1 %v201_v26  ;;  %865 = vmatmul.bf16.gmra.mxu2 %v200_v17  ;;  %v118_v31 = vld [vmem:[%s7205_s0 + $0x2a0] sm:$0xff] }
 0x155   :  { %1034 = vmatmul.bf16.gmra.mxu3 %v201_v26  ;;  %v1336_v52 = vmax.f32 %v658_v32, 0.0  ;;  %v120_v32 = vld [vmem:[%s7205_s0 + $0x2b0] sm:$0xff] }
 0x156   :  { %v5608_v37 = vpack.c.bf16 %v1335_v34, %v1333_v33 }
 0x157   :  { %v826_v38 = vpop.f32.mrf.mxu2 }
 0x158   :  { %v827_v39 = vadd.f32 %v826_v38, %v5316_v0  ;;  %v995_v40 = vpop.f32.mrf.mxu3  ;;  %v490_v42 = vpop.f32.mrf.mxu0  ;;  %v119_v38 = vld [vmem:[%s7205_s0 + $0x2a8] sm:$0xff] }
 0x159   :  { %v491_v43 = vadd.f32 %v490_v42, %v5307_v55  ;;  %v659_v44 = vpop.f32.mrf.mxu1  ;;  %v204_v42 = vpack.c.bf16 %v120_v32, %v118_v31 }
 0x15a   :  { %v996_v46 = vadd.f32 %v995_v40, %v827_v39  ;;  %v121_v39 = vld [vmem:[%s7205_s0 + $0x2b8] sm:$0xff] }
 0x15b   :  { %v660_v48 = vadd.f32 %v659_v44, %v491_v43  ;;  %v205_v50 = vpack.c.bf16 %v121_v39, %v119_v38 }
 0x15c   :  { %v1337_v12 = vmax.f32 %v996_v46, 0.0 }
 0x15d   :  { %v1338_v57 = vmax.f32 %v660_v48, 0.0 }
 0x15f   :  { %v828_v60 = vpop.f32.mrf.mxu2  ;;  %v5624_v63 = vpack.c.bf16 %v1338_v57, %v1336_v52 }
 0x160   :  { %v829_v1 = vadd.f32 %v828_v60, %v5316_v0  ;;  %v997_v3 = vpop.f32.mrf.mxu3  ;;  %v493_v5 = vpop.f32.mrf.mxu0 }
 0x161   :  { %v494_v7 = vadd.f32 %v493_v5, %v5307_v55  ;;  %v662_v8 = vpop.f32.mrf.mxu1 }
 0x162   :  { %v998_v9 = vadd.f32 %v997_v3, %v829_v1 }
 0x163   :  { %v663_v10 = vadd.f32 %v662_v8, %v494_v7  ;;  %532 = vmatmul.bf16.gmra.mxu0 %v202_v61 }
 0x164   :  { %v1339_v14 = vmax.f32 %v998_v9, 0.0  ;;  %701 = vmatmul.bf16.gmra.mxu1 %v203_v6  ;;  %870 = vmatmul.bf16.gmra.mxu2 %v202_v61 }
 0x165   :  { %1039 = vmatmul.bf16.gmra.mxu3 %v203_v6  ;;  %v1340_v33 = vmax.f32 %v663_v10, 0.0 }
 0x166   :  { %v5628_v16 = vpack.c.bf16 %v1339_v14, %v1337_v12  ;;  %v122_v12 = vld [vmem:[%s7205_s0 + $0x2c0] sm:$0xff]  ;;  %v124_v14 = vld [vmem:[%s7205_s0 + $0x2d0] sm:$0xff] }
 0x167   :  { %v831_v17 = vpop.f32.mrf.mxu2 }
 0x168   :  { %v832_v18 = vadd.f32 %v831_v17, %v5316_v0  ;;  %v1000_v20 = vpop.f32.mrf.mxu3  ;;  %v495_v21 = vpop.f32.mrf.mxu0 }
 0x169   :  { %v496_v23 = vadd.f32 %v495_v21, %v5307_v55  ;;  %v664_v26 = vpop.f32.mrf.mxu1  ;;  %v125_v21 = vld [vmem:[%s7205_s0 + $0x2d8] sm:$0xff] }
 0x16a   :  { %v1001_v29 = vadd.f32 %v1000_v20, %v832_v18  ;;  %v123_v20 = vld [vmem:[%s7205_s0 + $0x2c8] sm:$0xff] }
 0x16b   :  { %v665_v30 = vadd.f32 %v664_v26, %v496_v23  ;;  %v206_v26 = vpack.c.bf16 %v124_v14, %v122_v12  ;;  %v127_v12 = vld [vmem:[%s7205_s0 + $0x2e8] sm:$0xff]  ;;  %v129_v14 = vld [vmem:[%s7205_s0 + $0x2f8] sm:$0xff] }
 0x16c   :  { %v1341_v59 = vmax.f32 %v1001_v29, 0.0 }
 0x16d   :  { %v1342_v34 = vmax.f32 %v665_v30, 0.0 }
 0x16f   :  { %v833_v40 = vpop.f32.mrf.mxu2  ;;  %v5644_v43 = vpack.c.bf16 %v1342_v34, %v1340_v33  ;;  %v207_v33 = vpack.c.bf16 %v125_v21, %v123_v20  ;;  %v4518_v20 = vld [vmem:[%s7208_s3 + $0x10] sm:$0xf]  ;;  %v4799_v21 = vld [vmem:[%s7208_s3 + $0x14] sm:$0xf0] }
 0x170   :  { %v834_v44 = vadd.f32 %v833_v40, %v5316_v0  ;;  %v1002_v46 = vpop.f32.mrf.mxu3  ;;  %v498_v48 = vpop.f32.mrf.mxu0 }
 0x171   :  { %v499_v51 = vadd.f32 %v498_v48, %v5307_v55  ;;  %v667_v52 = vpop.f32.mrf.mxu1  ;;  %v4520_v48 = vld [vmem:[%s7208_s3 + $0x18] sm:$0xf0] }
 0x172   :  { %v1003_v57 = vadd.f32 %v1002_v46, %v834_v44  ;;  %v4798_v46 = vld [vmem:[%s7208_s3 + $0x14] sm:$0xf] }
 0x173   :  { %v668_v58 = vadd.f32 %v667_v52, %v499_v51  ;;  %537 = vmatmul.bf16.gmra.mxu0 %v204_v42  ;;  %v4814_v51 = vld [vmem:[%s7208_s3 + $0x94] sm:$0xf]  ;;  %v4584_v52 = vld [vmem:[%s7208_s3 + $0x98] sm:$0xf0] }
 0x174   :  { %v1343_v60 = vmax.f32 %v1003_v57, 0.0  ;;  %706 = vmatmul.bf16.gmra.mxu1 %v205_v50  ;;  %875 = vmatmul.bf16.gmra.mxu2 %v204_v42 }
 0x175   :  { %1044 = vmatmul.bf16.gmra.mxu3 %v205_v50  ;;  %v1344_v17 = vmax.f32 %v668_v58, 0.0  ;;  %v4523_v50 = vor.u32 %v4798_v46, %v4520_v48 }
 0x176   :  { %v5648_v61 = vpack.c.bf16 %v1343_v60, %v1341_v59  ;;  %v4587_v59 = vor.u32 %v4814_v51, %v4584_v52 }
 0x177   :  { %v836_v1 = vpop.f32.mrf.mxu2  ;;  %2026 = vmatpush.bf16.msrb.mxu2 %v4523_v50 }
 0x178   :  { %v837_v3 = vadd.f32 %v836_v1, %v5316_v0  ;;  %v1005_v5 = vpop.f32.mrf.mxu3  ;;  %v500_v6 = vpop.f32.mrf.mxu0  ;;  %2195 = vmatpush.bf16.msrb.mxu3 %v4587_v59 }
 0x179   :  { %v501_v7 = vadd.f32 %v500_v6, %v5307_v55  ;;  %v669_v8 = vpop.f32.mrf.mxu1 }
 0x17a   :  { %v1006_v9 = vadd.f32 %v1005_v5, %v837_v3 }
 0x17b   :  { %v670_v10 = vadd.f32 %v669_v8, %v501_v7 }
 0x17c   :  { %v1345_v42 = vmax.f32 %v1006_v9, 0.0  ;;  %v126_v9 = vld [vmem:[%s7205_s0 + $0x2e0] sm:$0xff] }
 0x17d   :  { %v1346_v18 = vmax.f32 %v670_v10, 0.0  ;;  %v128_v10 = vld [vmem:[%s7205_s0 + $0x2f0] sm:$0xff] }
 0x17f   :  { %v838_v23 = vpop.f32.mrf.mxu2  ;;  %v5664_v29 = vpack.c.bf16 %v1346_v18, %v1344_v17 }
 0x180   :  { %v839_v30 = vadd.f32 %v838_v23, %v5316_v0  ;;  %v1007_v31 = vpop.f32.mrf.mxu3  ;;  %v503_v32 = vpop.f32.mrf.mxu0  ;;  %v4519_v23 = vor.u32 %v4799_v21, %v4518_v20 }
 0x181   :  { %v504_v34 = vadd.f32 %v503_v32, %v5307_v55  ;;  %v672_v38 = vpop.f32.mrf.mxu1  ;;  %v208_v32 = vpack.c.bf16 %v128_v10, %v126_v9  ;;  %v132_v10 = vld [vmem:[%s7205_s0 + $0x310] sm:$0xff] }
 0x182   :  { %v1008_v39 = vadd.f32 %v1007_v31, %v839_v30  ;;  %v4815_v30 = vld [vmem:[%s7208_s3 + $0x94] sm:$0xf0]  ;;  %1688 = vmatpush.bf16.msrb.mxu0 %v4519_v23 }
 0x183   :  { %v673_v40 = vadd.f32 %v672_v38, %v504_v34  ;;  %542 = vmatmul.bf16.gmra.mxu0 %v206_v26 }
 0x184   :  { %v1347_v44 = vmax.f32 %v1008_v39, 0.0  ;;  %711 = vmatmul.bf16.gmra.mxu1 %v207_v33  ;;  %880 = vmatmul.bf16.gmra.mxu2 %v206_v26  ;;  %v4582_v26 = vld [vmem:[%s7208_s3 + $0x90] sm:$0xf] }
 0x185   :  { %1049 = vmatmul.bf16.gmra.mxu3 %v207_v33  ;;  %v1348_v17 = vmax.f32 %v673_v40, 0.0  ;;  %v4583_v33 = vor.u32 %v4815_v30, %v4582_v26 }
 0x186   :  { %v5680_v57 = vpack.c.bf16 %v1347_v44, %v1345_v42  ;;  %v209_v42 = vpack.c.bf16 %v129_v14, %v127_v12 }
 0x187   :  { %v841_v58 = vpop.f32.mrf.mxu2  ;;  %1857 = vmatpush.bf16.msrb.mxu1 %v4583_v33 }
 0x188   :  { %v842_v60 = vadd.f32 %v841_v58, %v5316_v0  ;;  %v1010_v1 = vpop.f32.mrf.mxu3  ;;  %v505_v3 = vpop.f32.mrf.mxu0 }
 0x189   :  { %v506_v5 = vadd.f32 %v505_v3, %v5307_v55  ;;  %v674_v6 = vpop.f32.mrf.mxu1 }
 0x18a   :  { %v1011_v7 = vadd.f32 %v1010_v1, %v842_v60 }
 0x18b   :  { %v675_v8 = vadd.f32 %v674_v6, %v506_v5 }
 0x18c   :  { %v1349_v51 = vmax.f32 %v1011_v7, 0.0  ;;  %v130_v7 = vld [vmem:[%s7205_s0 + $0x300] sm:$0xff] }
 0x18d   :  { %v1350_v18 = vmax.f32 %v675_v8, 0.0  ;;  %v210_v21 = vpack.c.bf16 %v132_v10, %v130_v7  ;;  %v135_v7 = vld [vmem:[%s7205_s0 + $0x328] sm:$0xff]  ;;  %v137_v10 = vld [vmem:[%s7205_s0 + $0x338] sm:$0xff] }
 0x18f   :  { %v843_v31 = vpop.f32.mrf.mxu2  ;;  %v5708_v34 = vpack.c.bf16 %v1350_v18, %v1348_v17  ;;  %v131_v17 = vld [vmem:[%s7205_s0 + $0x308] sm:$0xff]  ;;  %v133_v18 = vld [vmem:[%s7205_s0 + $0x318] sm:$0xff] }
 0x190   :  { %v844_v38 = vadd.f32 %v843_v31, %v5316_v0  ;;  %v1012_v39 = vpop.f32.mrf.mxu3  ;;  %v508_v40 = vpop.f32.mrf.mxu0 }
 0x191   :  { %v509_v44 = vadd.f32 %v508_v40, %v5307_v55  ;;  %v677_v46 = vpop.f32.mrf.mxu1 }
 0x192   :  { %v1013_v48 = vadd.f32 %v1012_v39, %v844_v38 }
 0x193   :  { %v678_v50 = vadd.f32 %v677_v46, %v509_v44  ;;  %547 = vmatmul.bf16.gmra.mxu0 %v208_v32 }
 0x194   :  { %v1351_v52 = vmax.f32 %v1013_v48, 0.0  ;;  %716 = vmatmul.bf16.gmra.mxu1 %v209_v42  ;;  %885 = vmatmul.bf16.gmra.mxu2 %v208_v32  ;;  %v211_v32 = vpack.c.bf16 %v133_v18, %v131_v17 }
 0x195   :  { %1054 = vmatmul.bf16.gmra.mxu3 %v209_v42  ;;  %v1352_v12 = vmax.f32 %v678_v50, 0.0 }
 0x196   :  { %v5712_v58 = vpack.c.bf16 %v1351_v52, %v1349_v51 }
 0x197   :  { %v846_v59 = vpop.f32.mrf.mxu2 }
 0x198   :  { %v847_v60 = vadd.f32 %v846_v59, %v5316_v0  ;;  %v1015_v1 = vpop.f32.mrf.mxu3  ;;  %v510_v3 = vpop.f32.mrf.mxu0 }
 0x199   :  { %v511_v5 = vadd.f32 %v510_v3, %v5307_v55  ;;  %v679_v6 = vpop.f32.mrf.mxu1 }
 0x19a   :  { %v1016_v8 = vadd.f32 %v1015_v1, %v847_v60 }
 0x19b   :  { %v680_v9 = vadd.f32 %v679_v6, %v511_v5  ;;  %v134_v5 = vld [vmem:[%s7205_s0 + $0x320] sm:$0xff]  ;;  %v136_v6 = vld [vmem:[%s7205_s0 + $0x330] sm:$0xff] }
 0x19c   :  { %v1353_v42 = vmax.f32 %v1016_v8, 0.0 }
 0x19d   :  { %v1354_v14 = vmax.f32 %v680_v9, 0.0 }
 0x19f   :  { %v848_v20 = vpop.f32.mrf.mxu2  ;;  %v5728_v23 = vpack.c.bf16 %v1354_v14, %v1352_v12  ;;  %v212_v14 = vpack.c.bf16 %v136_v6, %v134_v5 }
 0x1a0   :  { %v849_v26 = vadd.f32 %v848_v20, %v5316_v0  ;;  %v1017_v30 = vpop.f32.mrf.mxu3  ;;  %v513_v31 = vpop.f32.mrf.mxu0 }
 0x1a1   :  { %v514_v33 = vadd.f32 %v513_v31, %v5307_v55  ;;  %v682_v38 = vpop.f32.mrf.mxu1 }
 0x1a2   :  { %v1018_v39 = vadd.f32 %v1017_v30, %v849_v26  ;;  %v213_v26 = vpack.c.bf16 %v137_v10, %v135_v7 }
 0x1a3   :  { %v683_v40 = vadd.f32 %v682_v38, %v514_v33  ;;  %552 = vmatmul.bf16.gmra.mxu0 %v210_v21 }
 0x1a4   :  { %v1355_v44 = vmax.f32 %v1018_v39, 0.0  ;;  %721 = vmatmul.bf16.gmra.mxu1 %v211_v32  ;;  %890 = vmatmul.bf16.gmra.mxu2 %v210_v21 }
 0x1a5   :  { %1059 = vmatmul.bf16.gmra.mxu3 %v211_v32  ;;  %v1356_v8 = vmax.f32 %v683_v40, 0.0 }
 0x1a6   :  { %v5732_v46 = vpack.c.bf16 %v1355_v44, %v1353_v42 }
 0x1a7   :  { %v851_v48 = vpop.f32.mrf.mxu2 }
 0x1a8   :  { %v852_v50 = vadd.f32 %v851_v48, %v5316_v0  ;;  %v1020_v51 = vpop.f32.mrf.mxu3  ;;  %v515_v52 = vpop.f32.mrf.mxu0 }
 0x1a9   :  { %v516_v59 = vadd.f32 %v515_v52, %v5307_v55  ;;  %v684_v60 = vpop.f32.mrf.mxu1 }
 0x1aa   :  { %v1021_v1 = vadd.f32 %v1020_v51, %v852_v50 }
 0x1ab   :  { %v685_v3 = vadd.f32 %v684_v60, %v516_v59 }
 0x1ac   :  { %v1357_v38 = vmax.f32 %v1021_v1, 0.0  ;;  %v138_v1 = vld [vmem:[%s7205_s0 + $0x340] sm:$0xff] }
 0x1ad   :  { %v1358_v9 = vmax.f32 %v685_v3, 0.0  ;;  %v140_v3 = vld [vmem:[%s7205_s0 + $0x350] sm:$0xff] }
 0x1ae   :  { %v214_v10 = vpack.c.bf16 %v140_v3, %v138_v1 }
 0x1af   :  { %v853_v12 = vpop.f32.mrf.mxu2  ;;  %v5748_v17 = vpack.c.bf16 %v1358_v9, %v1356_v8  ;;  %v139_v8 = vld [vmem:[%s7205_s0 + $0x348] sm:$0xff]  ;;  %v141_v9 = vld [vmem:[%s7205_s0 + $0x358] sm:$0xff] }
 0x1b0   :  { %v854_v18 = vadd.f32 %v853_v12, %v5316_v0  ;;  %v1022_v20 = vpop.f32.mrf.mxu3  ;;  %v518_v21 = vpop.f32.mrf.mxu0 }
 0x1b1   :  { %v519_v30 = vadd.f32 %v518_v21, %v5307_v55  ;;  %v687_v31 = vpop.f32.mrf.mxu1  ;;  %v215_v21 = vpack.c.bf16 %v141_v9, %v139_v8 }
 0x1b2   :  { %v1023_v32 = vadd.f32 %v1022_v20, %v854_v18 }
 0x1b3   :  { %v688_v33 = vadd.f32 %v687_v31, %v519_v30  ;;  %557 = vmatmul.bf16.gmra.mxu0 %v212_v14 }
 0x1b4   :  { %v1359_v39 = vmax.f32 %v1023_v32, 0.0  ;;  %726 = vmatmul.bf16.gmra.mxu1 %v213_v26  ;;  %895 = vmatmul.bf16.gmra.mxu2 %v212_v14 }
 0x1b5   :  { %1064 = vmatmul.bf16.gmra.mxu3 %v213_v26  ;;  %v1360_v5 = vmax.f32 %v688_v33, 0.0 }
 0x1b6   :  { %v5752_v40 = vpack.c.bf16 %v1359_v39, %v1357_v38  ;;  %v4796_v39 = vld [vmem:[%s7208_s3 + $0x4] sm:$0xf] }
 0x1b7   :  { %v856_v42 = vpop.f32.mrf.mxu2 }
 0x1b8   :  { %v857_v44 = vadd.f32 %v856_v42, %v5316_v0  ;;  %v1025_v48 = vpop.f32.mrf.mxu3  ;;  %v520_v50 = vpop.f32.mrf.mxu0  ;;  %v4512_v42 = vld [vmem:[%s7208_s3 + $0x8] sm:$0xf0] }
 0x1b9   :  { %v521_v51 = vadd.f32 %v520_v50, %v5307_v55  ;;  %v689_v52 = vpop.f32.mrf.mxu1  ;;  %v4576_v50 = vld [vmem:[%s7208_s3 + $0x88] sm:$0xf0] }
 0x1ba   :  { %v1026_v59 = vadd.f32 %v1025_v48, %v857_v44  ;;  %v4515_v44 = vor.u32 %v4796_v39, %v4512_v42  ;;  %v4812_v48 = vld [vmem:[%s7208_s3 + $0x84] sm:$0xf] }
 0x1bb   :  { %v690_v60 = vadd.f32 %v689_v52, %v521_v51 }
 0x1bc   :  { %v1361_v33 = vmax.f32 %v1026_v59, 0.0  ;;  %v4579_v59 = vor.u32 %v4812_v48, %v4576_v50  ;;  %2027 = vmatpush.bf16.msrb.mxu2 %v4515_v44 }
 0x1bd   :  { %v1362_v6 = vmax.f32 %v690_v60, 0.0 }
 0x1be   :  { %2196 = vmatpush.bf16.msrb.mxu3 %v4579_v59 }
 0x1bf   :  { %v858_v7 = vpop.f32.mrf.mxu2  ;;  %v5768_v12 = vpack.c.bf16 %v1362_v6, %v1360_v5 }
 0x1c0   :  { %v859_v14 = vadd.f32 %v858_v7, %v5316_v0  ;;  %v1027_v18 = vpop.f32.mrf.mxu3  ;;  %v523_v20 = vpop.f32.mrf.mxu0  ;;  %v142_v7 = vld [vmem:[%s7205_s0 + $0x360] sm:$0xff] }
 0x1c1   :  { %v524_v26 = vadd.f32 %v523_v20, %v5307_v55  ;;  %v692_v30 = vpop.f32.mrf.mxu1 }
 0x1c2   :  { %v1028_v31 = vadd.f32 %v1027_v18, %v859_v14  ;;  %v143_v14 = vld [vmem:[%s7205_s0 + $0x368] sm:$0xff]  ;;  %v145_v18 = vld [vmem:[%s7205_s0 + $0x378] sm:$0xff] }
 0x1c3   :  { %v693_v32 = vadd.f32 %v692_v30, %v524_v26  ;;  %562 = vmatmul.bf16.gmra.mxu0 %v214_v10  ;;  %v4510_v26 = vld [vmem:[%s7208_s3] sm:$0xf]  ;;  %v4797_v30 = vld [vmem:[%s7208_s3 + $0x4] sm:$0xf0]  ;;  %v217_v59 = vpack.c.bf16 %v145_v18, %v143_v14 }
 0x1c4   :  { %v1363_v38 = vmax.f32 %v1028_v31, 0.0  ;;  %731 = vmatmul.bf16.gmra.mxu1 %v215_v21  ;;  %900 = vmatmul.bf16.gmra.mxu2 %v214_v10  ;;  %v144_v10 = vld [vmem:[%s7205_s0 + $0x370] sm:$0xff]  ;;  %v4511_v31 = vor.u32 %v4797_v30, %v4510_v26 }
 0x1c5   :  { %1069 = vmatmul.bf16.gmra.mxu3 %v215_v21  ;;  %v1364_v20 = vmax.f32 %v693_v32, 0.0  ;;  %v216_v32 = vpack.c.bf16 %v144_v10, %v142_v7 }
 0x1c6   :  { %v5784_v51 = vpack.c.bf16 %v1363_v38, %v1361_v33  ;;  %v4574_v33 = vld [vmem:[%s7208_s3 + $0x80] sm:$0xf]  ;;  %v4813_v38 = vld [vmem:[%s7208_s3 + $0x84] sm:$0xf0]  ;;  %1689 = vmatpush.bf16.msrb.mxu0 %v4511_v31 }
 0x1c7   :  { %v861_v52 = vpop.f32.mrf.mxu2  ;;  %v4575_v42 = vor.u32 %v4813_v38, %v4574_v33  ;;  %v148_v33 = vld [vmem:[%s7205_s0 + $0x390] sm:$0xff] }
 0x1c8   :  { %v862_v60 = vadd.f32 %v861_v52, %v5316_v0  ;;  %v1030_v1 = vpop.f32.mrf.mxu3  ;;  %v525_v3 = vpop.f32.mrf.mxu0 }
 0x1c9   :  { %v526_v5 = vadd.f32 %v525_v3, %v5307_v55  ;;  %v694_v6 = vpop.f32.mrf.mxu1  ;;  %1858 = vmatpush.bf16.msrb.mxu1 %v4575_v42  ;;  %v149_v42 = vld [vmem:[%s7205_s0 + $0x398] sm:$0xff] }
 0x1ca   :  { %v1031_v8 = vadd.f32 %v1030_v1, %v862_v60 }
 0x1cb   :  { %v695_v9 = vadd.f32 %v694_v6, %v526_v5 }
 0x1cc   :  { %v1365_v6 = vmax.f32 %v1031_v8, 0.0  ;;  %v146_v8 = vld [vmem:[%s7205_s0 + $0x380] sm:$0xff] }
 0x1cd   :  { %v1366_v21 = vmax.f32 %v695_v9, 0.0 }
 0x1cf   :  { %v863_v39 = vpop.f32.mrf.mxu2  ;;  %v5812_v44 = vpack.c.bf16 %v1366_v21, %v1364_v20 }
 0x1d0   :  { %v864_v48 = vadd.f32 %v863_v39, %v5316_v0  ;;  %v1032_v50 = vpop.f32.mrf.mxu3  ;;  %v528_v52 = vpop.f32.mrf.mxu0 }
 0x1d1   :  { %v529_v60 = vadd.f32 %v528_v52, %v5307_v55  ;;  %v697_v1 = vpop.f32.mrf.mxu1 }
 0x1d2   :  { %v1033_v3 = vadd.f32 %v1032_v50, %v864_v48  ;;  %v218_v50 = vpack.c.bf16 %v148_v33, %v146_v8 }
 0x1d3   :  { %v698_v5 = vadd.f32 %v697_v1, %v529_v60  ;;  %567 = vmatmul.bf16.gmra.mxu0 %v216_v32 }
 0x1d4   :  { %v1367_v9 = vmax.f32 %v1033_v3, 0.0  ;;  %736 = vmatmul.bf16.gmra.mxu1 %v217_v59  ;;  %905 = vmatmul.bf16.gmra.mxu2 %v216_v32  ;;  %v147_v32 = vld [vmem:[%s7205_s0 + $0x388] sm:$0xff] }
 0x1d5   :  { %1074 = vmatmul.bf16.gmra.mxu3 %v217_v59  ;;  %v1368_v38 = vmax.f32 %v698_v5, 0.0  ;;  %v219_v3 = vpack.c.bf16 %v149_v42, %v147_v32  ;;  %v152_v42 = vld [vmem:[%s7205_s0 + $0x3b0] sm:$0xff] }
 0x1d6   :  { %v5816_v7 = vpack.c.bf16 %v1367_v9, %v1365_v6 }
 0x1d7   :  { %v866_v10 = vpop.f32.mrf.mxu2 }
 0x1d8   :  { %v867_v20 = vadd.f32 %v866_v10, %v5316_v0  ;;  %v1035_v21 = vpop.f32.mrf.mxu3  ;;  %v530_v14 = vpop.f32.mrf.mxu0 }
 0x1d9   :  { %v531_v18 = vadd.f32 %v530_v14, %v5307_v55  ;;  %v699_v26 = vpop.f32.mrf.mxu1 }
 0x1da   :  { %v1036_v30 = vadd.f32 %v1035_v21, %v867_v20 }
 0x1db   :  { %v700_v31 = vadd.f32 %v699_v26, %v531_v18 }
 0x1dc   :  { %v1369_v20 = vmax.f32 %v1036_v30, 0.0  ;;  %v150_v30 = vld [vmem:[%s7205_s0 + $0x3a0] sm:$0xff] }
 0x1dd   :  { %v1370_v39 = vmax.f32 %v700_v31, 0.0 }
 0x1df   :  { %v868_v48 = vpop.f32.mrf.mxu2  ;;  %v5832_v52 = vpack.c.bf16 %v1370_v39, %v1368_v38 }
 0x1e0   :  { %v869_v59 = vadd.f32 %v868_v48, %v5316_v0  ;;  %v1037_v60 = vpop.f32.mrf.mxu3  ;;  %v533_v1 = vpop.f32.mrf.mxu0 }
 0x1e1   :  { %7227 = vst [vmem:[#allocation6_spill] sm:$0xff] %v5832_v52  ;;  %v534_v5 = vadd.f32 %v533_v1, %v5307_v55  ;;  %v702_v6 = vpop.f32.mrf.mxu1 }
 0x1e2   :  { %v1038_v9 = vadd.f32 %v1037_v60, %v869_v59  ;;  %v151_v59 = vld [vmem:[%s7205_s0 + $0x3a8] sm:$0xff]  ;;  %v153_v60 = vld [vmem:[%s7205_s0 + $0x3b8] sm:$0xff] }
 0x1e3   :  { %v703_v10 = vadd.f32 %v702_v6, %v534_v5  ;;  %572 = vmatmul.bf16.gmra.mxu0 %v218_v50 }
 0x1e4   :  { %v1371_v21 = vmax.f32 %v1038_v9, 0.0  ;;  %741 = vmatmul.bf16.gmra.mxu1 %v219_v3  ;;  %910 = vmatmul.bf16.gmra.mxu2 %v218_v50 }
 0x1e5   :  { %1079 = vmatmul.bf16.gmra.mxu3 %v219_v3  ;;  %v1372_v48 = vmax.f32 %v703_v10, 0.0  ;;  %v220_v3 = vpack.c.bf16 %v152_v42, %v150_v30 }
 0x1e6   :  { %v5836_v14 = vpack.c.bf16 %v1371_v21, %v1369_v20  ;;  %v221_v21 = vpack.c.bf16 %v153_v60, %v151_v59 }
 0x1e7   :  { %v871_v18 = vpop.f32.mrf.mxu2 }
 0x1e8   :  { %7228 = vst [vmem:[#allocation7_spill] sm:$0xff] %v5836_v14  ;;  %v872_v26 = vadd.f32 %v871_v18, %v5316_v0  ;;  %v1040_v31 = vpop.f32.mrf.mxu3  ;;  %v535_v8 = vpop.f32.mrf.mxu0 }
 0x1e9   :  { %v536_v33 = vadd.f32 %v535_v8, %v5307_v55  ;;  %v704_v38 = vpop.f32.mrf.mxu1 }
 0x1ea   :  { %v1041_v39 = vadd.f32 %v1040_v31, %v872_v26 }
 0x1eb   :  { %v705_v32 = vadd.f32 %v704_v38, %v536_v33 }
 0x1ec   :  { %v1373_v8 = vmax.f32 %v1041_v39, 0.0  ;;  %v154_v39 = vld [vmem:[%s7205_s0 + $0x3c0] sm:$0xff] }
 0x1ed   :  { %v1374_v50 = vmax.f32 %v705_v32, 0.0 }
 0x1ef   :  { %v873_v1 = vpop.f32.mrf.mxu2  ;;  %v5852_v5 = vpack.c.bf16 %v1374_v50, %v1372_v48 }
 0x1f0   :  { %v874_v6 = vadd.f32 %v873_v1, %v5316_v0  ;;  %v1042_v9 = vpop.f32.mrf.mxu3  ;;  %v538_v20 = vpop.f32.mrf.mxu0 }
 0x1f1   :  { %7229 = vst [vmem:[#allocation8_spill] sm:$0xff] %v5852_v5  ;;  %v539_v10 = vadd.f32 %v538_v20, %v5307_v55  ;;  %v707_v18 = vpop.f32.mrf.mxu1  ;;  %v155_v20 = vld [vmem:[%s7205_s0 + $0x3c8] sm:$0xff] }
 0x1f2   :  { %v1043_v26 = vadd.f32 %v1042_v9, %v874_v6 }
 0x1f3   :  { %v708_v31 = vadd.f32 %v707_v18, %v539_v10  ;;  %577 = vmatmul.bf16.gmra.mxu0 %v220_v3 }
 0x1f4   :  { %v1375_v33 = vmax.f32 %v1043_v26, 0.0  ;;  %746 = vmatmul.bf16.gmra.mxu1 %v221_v21  ;;  %915 = vmatmul.bf16.gmra.mxu2 %v220_v3  ;;  %v156_v3 = vld [vmem:[%s7205_s0 + $0x3d0] sm:$0xff] }
 0x1f5   :  { %1084 = vmatmul.bf16.gmra.mxu3 %v221_v21  ;;  %v1376_v6 = vmax.f32 %v708_v31, 0.0  ;;  %v157_v21 = vld [vmem:[%s7205_s0 + $0x3d8] sm:$0xff]  ;;  %v222_v18 = vpack.c.bf16 %v156_v3, %v154_v39  ;;  %v4842_v39 = vld [vmem:[%s7210_s5 + $0x74] sm:$0xf] }
 0x1f6   :  { %v5856_v38 = vpack.c.bf16 %v1375_v33, %v1373_v8  ;;  %v4696_v3 = vld [vmem:[%s7210_s5 + $0x78] sm:$0xf0] }
 0x1f7   :  { %v876_v32 = vpop.f32.mrf.mxu2 }
 0x1f8   :  { %7230 = vst [vmem:[#allocation9_spill] sm:$0xff] %v5856_v38  ;;  %v877_v30 = vadd.f32 %v876_v32, %v5316_v0  ;;  %v1045_v42 = vpop.f32.mrf.mxu3  ;;  %v540_v48 = vpop.f32.mrf.mxu0 }
 0x1f9   :  { %v541_v50 = vadd.f32 %v540_v48, %v5307_v55  ;;  %v709_v59 = vpop.f32.mrf.mxu1 }
 0x1fa   :  { %v1046_v60 = vadd.f32 %v1045_v42, %v877_v30  ;;  %v223_v30 = vpack.c.bf16 %v157_v21, %v155_v20 }
 0x1fb   :  { %v710_v1 = vadd.f32 %v709_v59, %v541_v50 }
 0x1fc   :  { %v1377_v59 = vmax.f32 %v1046_v60, 0.0  ;;  %v4760_v60 = vld [vmem:[%s7210_s5 + $0xf8] sm:$0xf0] }
 0x1fd   :  { %v1378_v9 = vmax.f32 %v710_v1, 0.0 }
 0x1ff   :  { %v878_v10 = vpop.f32.mrf.mxu2  ;;  %v5872_v26 = vpack.c.bf16 %v1378_v9, %v1376_v6  ;;  %v4699_v6 = vor.u32 %v4842_v39, %v4696_v3  ;;  %v4858_v9 = vld [vmem:[%s7210_s5 + $0xf4] sm:$0xf]  ;;  %v161_v39 = vld [vmem:[%s7205_s0 + $0x3f8] sm:$0xff] }
 0x200   :  { %v879_v8 = vadd.f32 %v878_v10, %v5316_v0  ;;  %v1047_v33 = vpop.f32.mrf.mxu3  ;;  %v543_v32 = vpop.f32.mrf.mxu0  ;;  %v4763_v10 = vor.u32 %v4858_v9, %v4760_v60  ;;  %v4694_v9 = vld [vmem:[%s7210_s5 + $0x70] sm:$0xf]  ;;  %v4843_v60 = vld [vmem:[%s7210_s5 + $0x74] sm:$0xf0] }
 0x201   :  { %7231 = vst [vmem:[#allocation10_spill] sm:$0xff] %v5872_v26  ;;  %v544_v31 = vadd.f32 %v543_v32, %v5307_v55  ;;  %v712_v42 = vpop.f32.mrf.mxu1  ;;  %3278 = vmatpush.bf16.msra.mxu2 %v4699_v6 }
 0x202   :  { %v1048_v48 = vadd.f32 %v1047_v33, %v879_v8  ;;  %3447 = vmatpush.bf16.msra.mxu3 %v4763_v10  ;;  %v4758_v10 = vld [vmem:[%s7210_s5 + $0xf0] sm:$0xf] }
 0x203   :  { %v713_v50 = vadd.f32 %v712_v42, %v544_v31  ;;  %582 = vmatmul.bf16.gmra.mxu0 %v222_v18 }
 0x204   :  { %v1379_v1 = vmax.f32 %v1048_v48, 0.0  ;;  %751 = vmatmul.bf16.gmra.mxu1 %v223_v30  ;;  %920 = vmatmul.bf16.gmra.mxu2 %v222_v18  ;;  %v158_v48 = vld [vmem:[%s7205_s0 + $0x3e0] sm:$0xff] }
 0x205   :  { %1089 = vmatmul.bf16.gmra.mxu3 %v223_v30  ;;  %v1380_v3 = vmax.f32 %v713_v50, 0.0 }
 0x206   :  { %v5888_v20 = vpack.c.bf16 %v1379_v1, %v1377_v59  ;;  %v160_v59 = vld [vmem:[%s7205_s0 + $0x3f0] sm:$0xff]  ;;  %v159_v1 = vld [vmem:[%s7205_s0 + $0x3e8] sm:$0xff] }
 0x207   :  { %v881_v21 = vpop.f32.mrf.mxu2  ;;  %v224_v50 = vpack.c.bf16 %v160_v59, %v158_v48  ;;  %v225_v26 = vpack.c.bf16 %v161_v39, %v159_v1 }
 0x208   :  { %7232 = vst [vmem:[#allocation11_spill] sm:$0xff] %v5888_v20  ;;  %v882_v18 = vadd.f32 %v881_v21, %v5316_v0  ;;  %v1050_v8 = vpop.f32.mrf.mxu3  ;;  %v545_v33 = vpop.f32.mrf.mxu0  ;;  %v4695_v21 = vor.u32 %v4843_v60, %v4694_v9 }
 0x209   :  { %v546_v32 = vadd.f32 %v545_v33, %v5307_v55  ;;  %v714_v30 = vpop.f32.mrf.mxu1 }
 0x20a   :  { %v1051_v31 = vadd.f32 %v1050_v8, %v882_v18  ;;  %v4859_v18 = vld [vmem:[%s7210_s5 + $0xf4] sm:$0xf0]  ;;  %2940 = vmatpush.bf16.msra.mxu0 %v4695_v21 }
 0x20b   :  { %v715_v42 = vadd.f32 %v714_v30, %v546_v32  ;;  %v4759_v33 = vor.u32 %v4859_v18, %v4758_v10 }
 0x20c   :  { %v1381_v14 = vmax.f32 %v1051_v31, 0.0 }
 0x20d   :  { %v1382_v6 = vmax.f32 %v715_v42, 0.0  ;;  %3109 = vmatpush.bf16.msra.mxu1 %v4759_v33 }
 0x20f   :  { %v883_v8 = vpop.f32.mrf.mxu2  ;;  %v5916_v32 = vpack.c.bf16 %v1382_v6, %v1380_v3 }
 0x210   :  { %v884_v30 = vadd.f32 %v883_v8, %v5316_v0  ;;  %v1052_v42 = vpop.f32.mrf.mxu3  ;;  %v548_v20 = vpop.f32.mrf.mxu0 }
 0x211   :  { %v549_v9 = vadd.f32 %v548_v20, %v5307_v55  ;;  %v717_v60 = vpop.f32.mrf.mxu1 }
 0x212   :  { %v1053_v38 = vadd.f32 %v1052_v42, %v884_v30 }
 0x213   :  { %v718_v5 = vadd.f32 %v717_v60, %v549_v9  ;;  %587 = vmatmul.bf16.gmra.mxu0 %v224_v50 }
 0x214   :  { %v1383_v52 = vmax.f32 %v1053_v38, 0.0  ;;  %756 = vmatmul.bf16.gmra.mxu1 %v225_v26  ;;  %925 = vmatmul.bf16.gmra.mxu2 %v224_v50 }
 0x215   :  { %1094 = vmatmul.bf16.gmra.mxu3 %v225_v26  ;;  %v1384_v18 = vmax.f32 %v718_v5, 0.0 }
 0x216   :  { %v5920_v48 = vpack.c.bf16 %v1383_v52, %v1381_v14 }
 0x217   :  { %v886_v59 = vpop.f32.mrf.mxu2 }
 0x218   :  { %v887_v3 = vadd.f32 %v886_v59, %v5316_v0  ;;  %v1055_v6 = vpop.f32.mrf.mxu3  ;;  %v550_v1 = vpop.f32.mrf.mxu0 }
 0x219   :  { %v551_v39 = vadd.f32 %v550_v1, %v5307_v55  ;;  %v719_v20 = vpop.f32.mrf.mxu1 }
 0x21a   :  { %v1056_v21 = vadd.f32 %v1055_v6, %v887_v3 }
 0x21b   :  { %v720_v10 = vadd.f32 %v719_v20, %v551_v39 }
 0x21c   :  { %v1385_v9 = vmax.f32 %v1056_v21, 0.0 }
 0x21d   :  { %v1386_v8 = vmax.f32 %v720_v10, 0.0 }
 0x21f   :  { %v888_v33 = vpop.f32.mrf.mxu2  ;;  %v5924_v31 = vpack.c.bf16 %v1386_v8, %v1384_v18 }
 0x220   :  { %v889_v38 = vadd.f32 %v888_v33, %v5316_v0  ;;  %v1057_v26 = vpop.f32.mrf.mxu3  ;;  %v553_v52 = vpop.f32.mrf.mxu0 }
 0x221   :  { %v554_v14 = vadd.f32 %v553_v52, %v5307_v55  ;;  %v722_v50 = vpop.f32.mrf.mxu1 }
 0x222   :  { %v1058_v30 = vadd.f32 %v1057_v26, %v889_v38 }
 0x223   :  { %v723_v42 = vadd.f32 %v722_v50, %v554_v14  ;;  %1690 = vmatmul.bf16.vlgmr.msrb.gmra.mxu0 %v5332_v15 }
 0x224   :  { %v1387_v60 = vmax.f32 %v1058_v30, 0.0  ;;  %1859 = vmatmul.bf16.vlgmr.msrb.gmra.mxu1 %v5336_v28  ;;  %2028 = vmatmul.bf16.vlgmr.msrb.gmra.mxu2 %v5332_v15 }
 0x225   :  { %2197 = vmatmul.bf16.vlgmr.msrb.gmra.mxu3 %v5336_v28  ;;  %v1388_v21 = vmax.f32 %v723_v42, 0.0 }
 0x226   :  { %v5932_v5 = vpack.c.bf16 %v1387_v60, %v1385_v9 }
 0x227   :  { %v891_v59 = vpop.f32.mrf.mxu2 }
 0x228   :  { %v892_v3 = vadd.f32 %v891_v59, %v5316_v0  ;;  %v1060_v6 = vpop.f32.mrf.mxu3  ;;  %v555_v1 = vpop.f32.mrf.mxu0 }
 0x229   :  { %v556_v39 = vadd.f32 %v555_v1, %v5307_v55  ;;  %v724_v20 = vpop.f32.mrf.mxu1 }
 0x22a   :  { %v1061_v10 = vadd.f32 %v1060_v6, %v892_v3 }
 0x22b   :  { %v725_v18 = vadd.f32 %v724_v20, %v556_v39 }
 0x22c   :  { %v1389_v9 = vmax.f32 %v1061_v10, 0.0 }
 0x22d   :  { %v1390_v8 = vmax.f32 %v725_v18, 0.0 }
 0x22f   :  { %v893_v33 = vpop.f32.mrf.mxu2  ;;  %v5936_v38 = vpack.c.bf16 %v1390_v8, %v1388_v21 }
 0x230   :  { %v894_v15 = vadd.f32 %v893_v33, %v5316_v0  ;;  %v1062_v28 = vpop.f32.mrf.mxu3  ;;  %v558_v26 = vpop.f32.mrf.mxu0 }
 0x231   :  { %v559_v52 = vadd.f32 %v558_v26, %v5307_v55  ;;  %v727_v14 = vpop.f32.mrf.mxu1 }
 0x232   :  { %v1063_v50 = vadd.f32 %v1062_v28, %v894_v15 }
 0x233   :  { %v728_v30 = vadd.f32 %v727_v14, %v559_v52  ;;  %1695 = vmatmul.bf16.gmra.mxu0 %v5352_v45 }
 0x234   :  { %v1391_v60 = vmax.f32 %v1063_v50, 0.0  ;;  %1864 = vmatmul.bf16.gmra.mxu1 %v5368_v62  ;;  %2033 = vmatmul.bf16.gmra.mxu2 %v5352_v45 }
 0x235   :  { %2202 = vmatmul.bf16.gmra.mxu3 %v5368_v62  ;;  %v1392_v10 = vmax.f32 %v728_v30, 0.0  ;;  %v4840_v30 = vld [vmem:[%s7210_s5 + $0x64] sm:$0xf] }
 0x236   :  { %v5944_v42 = vpack.c.bf16 %v1391_v60, %v1389_v9 }
 0x237   :  { %v896_v59 = vpop.f32.mrf.mxu2 }
 0x238   :  { %v897_v3 = vadd.f32 %v896_v59, %v5316_v0  ;;  %v1065_v6 = vpop.f32.mrf.mxu3  ;;  %v560_v1 = vpop.f32.mrf.mxu0  ;;  %v4688_v59 = vld [vmem:[%s7210_s5 + $0x68] sm:$0xf0] }
 0x239   :  { %v561_v39 = vadd.f32 %v560_v1, %v5307_v55  ;;  %v729_v20 = vpop.f32.mrf.mxu1  ;;  %v4752_v1 = vld [vmem:[%s7210_s5 + $0xe8] sm:$0xf0] }
 0x23a   :  { %v1066_v18 = vadd.f32 %v1065_v6, %v897_v3  ;;  %v4691_v3 = vor.u32 %v4840_v30, %v4688_v59  ;;  %v4856_v6 = vld [vmem:[%s7210_s5 + $0xe4] sm:$0xf] }
 0x23b   :  { %v730_v21 = vadd.f32 %v729_v20, %v561_v39  ;;  %v4755_v39 = vor.u32 %v4856_v6, %v4752_v1 }
 0x23c   :  { %v1393_v9 = vmax.f32 %v1066_v18, 0.0  ;;  %3279 = vmatpush.bf16.msra.mxu2 %v4691_v3 }
 0x23d   :  { %v1394_v8 = vmax.f32 %v730_v21, 0.0  ;;  %3448 = vmatpush.bf16.msra.mxu3 %v4755_v39 }
 0x23f   :  { %v898_v33 = vpop.f32.mrf.mxu2  ;;  %v5948_v15 = vpack.c.bf16 %v1394_v8, %v1392_v10 }
 0x240   :  { %v899_v45 = vadd.f32 %v898_v33, %v5316_v0  ;;  %v1067_v62 = vpop.f32.mrf.mxu3  ;;  %v563_v28 = vpop.f32.mrf.mxu0 }
 0x241   :  { %v564_v26 = vadd.f32 %v563_v28, %v5307_v55  ;;  %v732_v52 = vpop.f32.mrf.mxu1 }
 0x242   :  { %v1068_v14 = vadd.f32 %v1067_v62, %v899_v45 }
 0x243   :  { %v733_v50 = vadd.f32 %v732_v52, %v564_v26  ;;  %1700 = vmatmul.bf16.gmra.mxu0 %v5396_v24  ;;  %v4686_v26 = vld [vmem:[%s7210_s5 + $0x60] sm:$0xf]  ;;  %v4841_v52 = vld [vmem:[%s7210_s5 + $0x64] sm:$0xf0] }
 0x244   :  { %v1395_v60 = vmax.f32 %v1068_v14, 0.0  ;;  %1869 = vmatmul.bf16.gmra.mxu1 %v5400_v36  ;;  %2038 = vmatmul.bf16.gmra.mxu2 %v5396_v24  ;;  %v4687_v14 = vor.u32 %v4841_v52, %v4686_v26 }
 0x245   :  { %2207 = vmatmul.bf16.gmra.mxu3 %v5400_v36  ;;  %v1396_v62 = vmax.f32 %v733_v50, 0.0 }
 0x246   :  { %v5968_v24 = vpack.c.bf16 %v1395_v60, %v1393_v9  ;;  %v4750_v9 = vld [vmem:[%s7210_s5 + $0xe0] sm:$0xf]  ;;  %v4857_v60 = vld [vmem:[%s7210_s5 + $0xe4] sm:$0xf0]  ;;  %2941 = vmatpush.bf16.msra.mxu0 %v4687_v14 }
 0x247   :  { %v901_v36 = vpop.f32.mrf.mxu2  ;;  %v4751_v50 = vor.u32 %v4857_v60, %v4750_v9 }
 0x248   :  { %v902_v20 = vadd.f32 %v901_v36, %v5316_v0  ;;  %v1070_v18 = vpop.f32.mrf.mxu3  ;;  %v565_v21 = vpop.f32.mrf.mxu0 }
 0x249   :  { %v566_v10 = vadd.f32 %v565_v21, %v5307_v55  ;;  %v734_v8 = vpop.f32.mrf.mxu1  ;;  %3110 = vmatpush.bf16.msra.mxu1 %v4751_v50 }
 0x24a   :  { %v1071_v33 = vadd.f32 %v1070_v18, %v902_v20 }
 0x24b   :  { %v735_v45 = vadd.f32 %v734_v8, %v566_v10 }
 0x24c   :  { %v1397_v21 = vmax.f32 %v1071_v33, 0.0 }
 0x24d   :  { %v1398_v28 = vmax.f32 %v735_v45, 0.0 }
 0x24f   :  { %v903_v30 = vpop.f32.mrf.mxu2  ;;  %v5984_v59 = vpack.c.bf16 %v1398_v28, %v1396_v62 }
 0x250   :  { %v904_v3 = vadd.f32 %v903_v30, %v5316_v0  ;;  %v1072_v6 = vpop.f32.mrf.mxu3  ;;  %v568_v1 = vpop.f32.mrf.mxu0 }
 0x251   :  { %v569_v36 = vadd.f32 %v568_v1, %v5307_v55  ;;  %v737_v39 = vpop.f32.mrf.mxu1 }
 0x252   :  { %v1073_v20 = vadd.f32 %v1072_v6, %v904_v3 }
 0x253   :  { %v738_v18 = vadd.f32 %v737_v39, %v569_v36  ;;  %1705 = vmatmul.bf16.gmra.mxu0 %v5416_v54 }
 0x254   :  { %v1399_v10 = vmax.f32 %v1073_v20, 0.0  ;;  %1874 = vmatmul.bf16.gmra.mxu1 %v5420_v4  ;;  %2043 = vmatmul.bf16.gmra.mxu2 %v5416_v54 }
 0x255   :  { %2212 = vmatmul.bf16.gmra.mxu3 %v5420_v4  ;;  %v1400_v33 = vmax.f32 %v738_v18, 0.0 }
 0x256   :  { %v5992_v8 = vpack.c.bf16 %v1399_v10, %v1397_v21 }
 0x257   :  { %v906_v45 = vpop.f32.mrf.mxu2 }
 0x258   :  { %v907_v62 = vadd.f32 %v906_v45, %v5316_v0  ;;  %v1075_v28 = vpop.f32.mrf.mxu3  ;;  %v570_v26 = vpop.f32.mrf.mxu0 }
 0x259   :  { %v571_v52 = vadd.f32 %v570_v26, %v5307_v55  ;;  %v739_v14 = vpop.f32.mrf.mxu1 }
 0x25a   :  { %v1076_v9 = vadd.f32 %v1075_v28, %v907_v62 }
 0x25b   :  { %v740_v60 = vadd.f32 %v739_v14, %v571_v52 }
 0x25c   :  { %v1401_v21 = vmax.f32 %v1076_v9, 0.0 }
 0x25d   :  { %v1402_v30 = vmax.f32 %v740_v60, 0.0 }
 0x25f   :  { %v908_v50 = vpop.f32.mrf.mxu2  ;;  %v5996_v3 = vpack.c.bf16 %v1402_v30, %v1400_v33 }
 0x260   :  { %v909_v54 = vadd.f32 %v908_v50, %v5316_v0  ;;  %v1077_v4 = vpop.f32.mrf.mxu3  ;;  %v573_v6 = vpop.f32.mrf.mxu0 }
 0x261   :  { %v574_v1 = vadd.f32 %v573_v6, %v5307_v55  ;;  %v742_v36 = vpop.f32.mrf.mxu1 }
 0x262   :  { %v1078_v39 = vadd.f32 %v1077_v4, %v909_v54 }
 0x263   :  { %v743_v20 = vadd.f32 %v742_v36, %v574_v1  ;;  %1710 = vmatmul.bf16.gmra.mxu0 %v5436_v22 }
 0x264   :  { %v1403_v10 = vmax.f32 %v1078_v39, 0.0  ;;  %1879 = vmatmul.bf16.gmra.mxu1 %v5440_v35  ;;  %2048 = vmatmul.bf16.gmra.mxu2 %v5436_v22 }
 0x265   :  { %2217 = vmatmul.bf16.gmra.mxu3 %v5440_v35  ;;  %v1404_v9 = vmax.f32 %v743_v20, 0.0 }
 0x266   :  { %v6004_v18 = vpack.c.bf16 %v1403_v10, %v1401_v21 }
 0x267   :  { %v911_v45 = vpop.f32.mrf.mxu2 }
 0x268   :  { %v912_v62 = vadd.f32 %v911_v45, %v5316_v0  ;;  %v1080_v28 = vpop.f32.mrf.mxu3  ;;  %v575_v26 = vpop.f32.mrf.mxu0 }
 0x269   :  { %v576_v52 = vadd.f32 %v575_v26, %v5307_v55  ;;  %v744_v14 = vpop.f32.mrf.mxu1 }
 0x26a   :  { %v1081_v60 = vadd.f32 %v1080_v28, %v912_v62 }
 0x26b   :  { %v745_v33 = vadd.f32 %v744_v14, %v576_v52 }
 0x26c   :  { %v1405_v21 = vmax.f32 %v1081_v60, 0.0 }
 0x26d   :  { %v1406_v30 = vmax.f32 %v745_v33, 0.0 }
 0x26f   :  { %v913_v50 = vpop.f32.mrf.mxu2  ;;  %v6008_v54 = vpack.c.bf16 %v1406_v30, %v1404_v9 }
 0x270   :  { %v914_v22 = vadd.f32 %v913_v50, %v5316_v0  ;;  %v1082_v35 = vpop.f32.mrf.mxu3  ;;  %v578_v4 = vpop.f32.mrf.mxu0 }
 0x271   :  { %v579_v6 = vadd.f32 %v578_v4, %v5307_v55  ;;  %v747_v1 = vpop.f32.mrf.mxu1 }
 0x272   :  { %v1083_v36 = vadd.f32 %v1082_v35, %v914_v22 }
 0x273   :  { %v748_v39 = vadd.f32 %v747_v1, %v579_v6  ;;  %1715 = vmatmul.bf16.gmra.mxu0 %v5456_v56 }
 0x274   :  { %v1407_v10 = vmax.f32 %v1083_v36, 0.0  ;;  %1884 = vmatmul.bf16.gmra.mxu1 %v5472_v11  ;;  %2053 = vmatmul.bf16.gmra.mxu2 %v5456_v56 }
 0x275   :  { %2222 = vmatmul.bf16.gmra.mxu3 %v5472_v11  ;;  %v1408_v60 = vmax.f32 %v748_v39, 0.0  ;;  %v4838_v39 = vld [vmem:[%s7210_s5 + $0x54] sm:$0xf] }
 0x276   :  { %v6016_v20 = vpack.c.bf16 %v1407_v10, %v1405_v21 }
 0x277   :  { %v916_v45 = vpop.f32.mrf.mxu2 }
 0x278   :  { %v917_v62 = vadd.f32 %v916_v45, %v5316_v0  ;;  %v1085_v28 = vpop.f32.mrf.mxu3  ;;  %v580_v26 = vpop.f32.mrf.mxu0  ;;  %v4680_v45 = vld [vmem:[%s7210_s5 + $0x58] sm:$0xf0] }
 0x279   :  { %v581_v52 = vadd.f32 %v580_v26, %v5307_v55  ;;  %v749_v14 = vpop.f32.mrf.mxu1  ;;  %v4744_v26 = vld [vmem:[%s7210_s5 + $0xd8] sm:$0xf0] }
 0x27a   :  { %v1086_v33 = vadd.f32 %v1085_v28, %v917_v62  ;;  %v4683_v62 = vor.u32 %v4838_v39, %v4680_v45  ;;  %v4854_v28 = vld [vmem:[%s7210_s5 + $0xd4] sm:$0xf] }
 0x27b   :  { %v750_v9 = vadd.f32 %v749_v14, %v581_v52  ;;  %v4747_v52 = vor.u32 %v4854_v28, %v4744_v26  ;;  %v4855_v28 = vld [vmem:[%s7210_s5 + $0xd4] sm:$0xf0] }
 0x27c   :  { %v1409_v21 = vmax.f32 %v1086_v33, 0.0  ;;  %3280 = vmatpush.bf16.msra.mxu2 %v4683_v62 }
 0x27d   :  { %v1410_v30 = vmax.f32 %v750_v9, 0.0  ;;  %3449 = vmatpush.bf16.msra.mxu3 %v4747_v52 }
 0x27f   :  { %v918_v50 = vpop.f32.mrf.mxu2  ;;  %v6020_v22 = vpack.c.bf16 %v1410_v30, %v1408_v60 }
 0x280   :  { %v919_v56 = vadd.f32 %v918_v50, %v5316_v0  ;;  %v1087_v11 = vpop.f32.mrf.mxu3  ;;  %v583_v35 = vpop.f32.mrf.mxu0 }
 0x281   :  { %v584_v4 = vadd.f32 %v583_v35, %v5307_v55  ;;  %v752_v6 = vpop.f32.mrf.mxu1 }
 0x282   :  { %v1088_v1 = vadd.f32 %v1087_v11, %v919_v56 }
 0x283   :  { %v753_v36 = vadd.f32 %v752_v6, %v584_v4  ;;  %1720 = vmatmul.bf16.gmra.mxu0 %v5500_v41  ;;  %v4678_v6 = vld [vmem:[%s7210_s5 + $0x50] sm:$0xf] }
 0x284   :  { %v1411_v10 = vmax.f32 %v1088_v1, 0.0  ;;  %1889 = vmatmul.bf16.gmra.mxu1 %v5504_v53  ;;  %2058 = vmatmul.bf16.gmra.mxu2 %v5500_v41  ;;  %v4839_v1 = vld [vmem:[%s7210_s5 + $0x54] sm:$0xf0] }
 0x285   :  { %2227 = vmatmul.bf16.gmra.mxu3 %v5504_v53  ;;  %v1412_v11 = vmax.f32 %v753_v36, 0.0  ;;  %v4679_v62 = vor.u32 %v4839_v1, %v4678_v6 }
 0x286   :  { %v6040_v41 = vpack.c.bf16 %v1411_v10, %v1409_v21  ;;  %v4742_v21 = vld [vmem:[%s7210_s5 + $0xd0] sm:$0xf] }
 0x287   :  { %v921_v53 = vpop.f32.mrf.mxu2  ;;  %v4743_v52 = vor.u32 %v4855_v28, %v4742_v21  ;;  %2942 = vmatpush.bf16.msra.mxu0 %v4679_v62 }
 0x288   :  { %v922_v14 = vadd.f32 %v921_v53, %v5316_v0  ;;  %v1090_v33 = vpop.f32.mrf.mxu3  ;;  %v585_v9 = vpop.f32.mrf.mxu0 }
 0x289   :  { %v586_v60 = vadd.f32 %v585_v9, %v5307_v55  ;;  %v754_v30 = vpop.f32.mrf.mxu1  ;;  %3111 = vmatpush.bf16.msra.mxu1 %v4743_v52 }
 0x28a   :  { %v1091_v50 = vadd.f32 %v1090_v33, %v922_v14 }
 0x28b   :  { %v755_v56 = vadd.f32 %v754_v30, %v586_v60 }
 0x28c   :  { %v1413_v9 = vmax.f32 %v1091_v50, 0.0  ;;  %v1516_v50 = vld [vmem:[%s7209_s4] sm:$0x3] }
 0x28d   :  { %v1414_v35 = vmax.f32 %v755_v56, 0.0 }
 0x28f   :  { %v923_v4 = vpop.f32.mrf.mxu2  ;;  %v6053_v10 = vpack.c.bf16 %v1414_v35, %v1412_v11 }
 0x290   :  { %v924_v39 = vadd.f32 %v923_v4, %v5316_v0  ;;  %v1092_v45 = vpop.f32.mrf.mxu3  ;;  %v588_v36 = vpop.f32.mrf.mxu0 }
 0x291   :  { %v589_v26 = vadd.f32 %v588_v36, %v5307_v55  ;;  %v757_v53 = vpop.f32.mrf.mxu1  ;;  %v6071_v36 = vperm.slane %v1516_v50, 0 }
 0x292   :  { %v1093_v14 = vadd.f32 %v1092_v45, %v924_v39 }
 0x293   :  { %v758_v33 = vadd.f32 %v757_v53, %v589_v26  ;;  %1725 = vmatmul.bf16.gmra.mxu0 %v5520_v13 }
 0x294   :  { %v1415_v60 = vmax.f32 %v1093_v14, 0.0  ;;  %1894 = vmatmul.bf16.gmra.mxu1 %v5524_v27  ;;  %2063 = vmatmul.bf16.gmra.mxu2 %v5520_v13 }
 0x295   :  { %2232 = vmatmul.bf16.gmra.mxu3 %v5524_v27  ;;  %v1416_v45 = vmax.f32 %v758_v33, 0.0  ;;  %v6080_v33 = vperm.slane %v1516_v50, 1 }
 0x296   :  { %v6064_v30 = vpack.c.bf16 %v1415_v60, %v1413_v9 }
 0x297   :  { %v926_v56 = vpop.f32.mrf.mxu2 }
 0x298   :  { %v927_v11 = vadd.f32 %v926_v56, %v5316_v0  ;;  %v1095_v35 = vpop.f32.mrf.mxu3  ;;  %v590_v4 = vpop.f32.mrf.mxu0 }
 0x299   :  { %v591_v6 = vadd.f32 %v590_v4, %v5307_v55  ;;  %v759_v1 = vpop.f32.mrf.mxu1 }
 0x29a   :  { %v1096_v21 = vadd.f32 %v1095_v35, %v927_v11 }
 0x29b   :  { %v760_v39 = vadd.f32 %v759_v1, %v591_v6 }
 0x29c   :  { %v1417_v60 = vmax.f32 %v1096_v21, 0.0 }
 0x29d   :  { %v1418_v13 = vmax.f32 %v760_v39, 0.0 }
 0x29f   :  { %v928_v27 = vpop.f32.mrf.mxu2  ;;  %v6073_v62 = vpack.c.bf16 %v1418_v13, %v1416_v45 }
 0x2a0   :  { %v929_v28 = vadd.f32 %v928_v27, %v5316_v0  ;;  %v1097_v26 = vpop.f32.mrf.mxu3  ;;  %v1691_v53 = vpop.f32.mrf.mxu0 }
 0x2a1   :  { %v1692_v55 = vadd.f32 %v1691_v53, %v6071_v36  ;;  %v1860_v52 = vpop.f32.mrf.mxu1 }
 0x2a2   :  { %v1098_v14 = vadd.f32 %v1097_v26, %v929_v28 }
 0x2a3   :  { %v1861_v9 = vadd.f32 %v1860_v52, %v1692_v55  ;;  %1730 = vmatmul.bf16.gmra.mxu0 %v5540_v49 }
 0x2a4   :  { %v1419_v56 = vmax.f32 %v1098_v14, 0.0  ;;  %1899 = vmatmul.bf16.gmra.mxu1 %v5544_v2  ;;  %2068 = vmatmul.bf16.gmra.mxu2 %v5540_v49 }
 0x2a5   :  { %2237 = vmatmul.bf16.gmra.mxu3 %v5544_v2  ;;  %v2550_v13 = vmax.f32 %v1861_v9, 0.0 }
 0x2a6   :  { %v6083_v0 = vpack.c.bf16 %v1419_v56, %v1417_v60 }
 0x2a7   :  { %v2029_v11 = vpop.f32.mrf.mxu2 }
 0x2a8   :  { %v2030_v35 = vadd.f32 %v2029_v11, %v6080_v33  ;;  %v2198_v4 = vpop.f32.mrf.mxu3  ;;  %v1693_v6 = vpop.f32.mrf.mxu0 }
 0x2a9   :  { %v1694_v1 = vadd.f32 %v1693_v6, %v6071_v36  ;;  %v1862_v39 = vpop.f32.mrf.mxu1 }
 0x2aa   :  { %v2199_v21 = vadd.f32 %v2198_v4, %v2030_v35 }
 0x2ab   :  { %v1863_v45 = vadd.f32 %v1862_v39, %v1694_v1 }
 0x2ac   :  { %v2551_v60 = vmax.f32 %v2199_v21, 0.0 }
 0x2ad   :  { %v2552_v27 = vmax.f32 %v1863_v45, 0.0 }
 0x2af   :  { %v6087_v28 = vpack.c.bf16 %v2552_v27, %v2550_v13  ;;  %v2031_v49 = vpop.f32.mrf.mxu2 }
 0x2b0   :  { %v2032_v50 = vadd.f32 %v2031_v49, %v6080_v33  ;;  %v2200_v2 = vpop.f32.mrf.mxu3  ;;  %v1696_v26 = vpop.f32.mrf.mxu0 }
 0x2b1   :  { %v1697_v53 = vadd.f32 %v1696_v26, %v6071_v36  ;;  %v1865_v55 = vpop.f32.mrf.mxu1 }
 0x2b2   :  { %v2201_v52 = vadd.f32 %v2200_v2, %v2032_v50 }
 0x2b3   :  { %v1866_v14 = vadd.f32 %v1865_v55, %v1697_v53  ;;  %1735 = vmatmul.bf16.gmra.mxu0 %v5560_v25 }
 0x2b4   :  { %v2553_v56 = vmax.f32 %v2201_v52, 0.0  ;;  %1904 = vmatmul.bf16.gmra.mxu1 %v5576_v47  ;;  %2073 = vmatmul.bf16.gmra.mxu2 %v5560_v25 }
 0x2b5   :  { %2242 = vmatmul.bf16.gmra.mxu3 %v5576_v47  ;;  %v2554_v21 = vmax.f32 %v1866_v14, 0.0  ;;  %v4836_v14 = vld [vmem:[%s7210_s5 + $0x44] sm:$0xf] }
 0x2b6   :  { %v6095_v9 = vpack.c.bf16 %v2553_v56, %v2551_v60 }
 0x2b7   :  { %v2034_v11 = vpop.f32.mrf.mxu2 }
 0x2b8   :  { %v2035_v35 = vadd.f32 %v2034_v11, %v6080_v33  ;;  %v2203_v4 = vpop.f32.mrf.mxu3  ;;  %v1698_v6 = vpop.f32.mrf.mxu0  ;;  %v4672_v11 = vld [vmem:[%s7210_s5 + $0x48] sm:$0xf0] }
 0x2b9   :  { %v1699_v1 = vadd.f32 %v1698_v6, %v6071_v36  ;;  %v1867_v39 = vpop.f32.mrf.mxu1  ;;  %v4736_v6 = vld [vmem:[%s7210_s5 + $0xc8] sm:$0xf0] }
 0x2ba   :  { %v2204_v45 = vadd.f32 %v2203_v4, %v2035_v35  ;;  %v4675_v35 = vor.u32 %v4836_v14, %v4672_v11  ;;  %v4852_v4 = vld [vmem:[%s7210_s5 + $0xc4] sm:$0xf] }
 0x2bb   :  { %v1868_v13 = vadd.f32 %v1867_v39, %v1699_v1  ;;  %v4739_v1 = vor.u32 %v4852_v4, %v4736_v6 }
 0x2bc   :  { %v2555_v60 = vmax.f32 %v2204_v45, 0.0  ;;  %3281 = vmatpush.bf16.msra.mxu2 %v4675_v35 }
 0x2bd   :  { %v2556_v27 = vmax.f32 %v1868_v13, 0.0  ;;  %3450 = vmatpush.bf16.msra.mxu3 %v4739_v1 }
 0x2bf   :  { %v2036_v49 = vpop.f32.mrf.mxu2  ;;  %v6099_v50 = vpack.c.bf16 %v2556_v27, %v2554_v21 }
 0x2c0   :  { %v2037_v25 = vadd.f32 %v2036_v49, %v6080_v33  ;;  %v2205_v47 = vpop.f32.mrf.mxu3  ;;  %v1701_v2 = vpop.f32.mrf.mxu0 }
 0x2c1   :  { %v1702_v26 = vadd.f32 %v1701_v2, %v6071_v36  ;;  %v1870_v53 = vpop.f32.mrf.mxu1 }
 0x2c2   :  { %v2206_v55 = vadd.f32 %v2205_v47, %v2037_v25 }
 0x2c3   :  { %v1871_v52 = vadd.f32 %v1870_v53, %v1702_v26  ;;  %1740 = vmatmul.bf16.gmra.mxu0 %v5604_v19  ;;  %v4670_v26 = vld [vmem:[%s7210_s5 + $0x40] sm:$0xf]  ;;  %v4837_v53 = vld [vmem:[%s7210_s5 + $0x44] sm:$0xf0] }
 0x2c4   :  { %v2557_v56 = vmax.f32 %v2206_v55, 0.0  ;;  %1909 = vmatmul.bf16.gmra.mxu1 %v5608_v37  ;;  %2078 = vmatmul.bf16.gmra.mxu2 %v5604_v19  ;;  %v4671_v55 = vor.u32 %v4837_v53, %v4670_v26 }
 0x2c5   :  { %2247 = vmatmul.bf16.gmra.mxu3 %v5608_v37  ;;  %v2558_v47 = vmax.f32 %v1871_v52, 0.0 }
 0x2c6   :  { %v6119_v19 = vpack.c.bf16 %v2557_v56, %v2555_v60  ;;  %v4734_v60 = vld [vmem:[%s7210_s5 + $0xc0] sm:$0xf]  ;;  %v4853_v56 = vld [vmem:[%s7210_s5 + $0xc4] sm:$0xf0]  ;;  %2943 = vmatpush.bf16.msra.mxu0 %v4671_v55 }
 0x2c7   :  { %v2039_v37 = vpop.f32.mrf.mxu2  ;;  %v4735_v52 = vor.u32 %v4853_v56, %v4734_v60 }
 0x2c8   :  { %v2040_v39 = vadd.f32 %v2039_v37, %v6080_v33  ;;  %v2208_v45 = vpop.f32.mrf.mxu3  ;;  %v1703_v13 = vpop.f32.mrf.mxu0 }
 0x2c9   :  { %v1704_v21 = vadd.f32 %v1703_v13, %v6071_v36  ;;  %v1872_v27 = vpop.f32.mrf.mxu1  ;;  %3112 = vmatpush.bf16.msra.mxu1 %v4735_v52 }
 0x2ca   :  { %v2209_v49 = vadd.f32 %v2208_v45, %v2040_v39 }
 0x2cb   :  { %v1873_v25 = vadd.f32 %v1872_v27, %v1704_v21 }
 0x2cc   :  { %v2559_v13 = vmax.f32 %v2209_v49, 0.0 }
 0x2cd   :  { %v2560_v2 = vmax.f32 %v1873_v25, 0.0 }
 0x2cf   :  { %v2041_v14 = vpop.f32.mrf.mxu2  ;;  %v6135_v11 = vpack.c.bf16 %v2560_v2, %v2558_v47 }
 0x2d0   :  { %v2042_v35 = vadd.f32 %v2041_v14, %v6080_v33  ;;  %v2210_v4 = vpop.f32.mrf.mxu3  ;;  %v1706_v6 = vpop.f32.mrf.mxu0 }
 0x2d1   :  { %v1707_v37 = vadd.f32 %v1706_v6, %v6071_v36  ;;  %v1875_v1 = vpop.f32.mrf.mxu1 }
 0x2d2   :  { %v2211_v39 = vadd.f32 %v2210_v4, %v2042_v35 }
 0x2d3   :  { %v1876_v45 = vadd.f32 %v1875_v1, %v1707_v37  ;;  %1745 = vmatmul.bf16.gmra.mxu0 %v5624_v63 }
 0x2d4   :  { %v2561_v21 = vmax.f32 %v2211_v39, 0.0  ;;  %1914 = vmatmul.bf16.gmra.mxu1 %v5628_v16  ;;  %2083 = vmatmul.bf16.gmra.mxu2 %v5624_v63 }
 0x2d5   :  { %2252 = vmatmul.bf16.gmra.mxu3 %v5628_v16  ;;  %v2562_v49 = vmax.f32 %v1876_v45, 0.0 }
 0x2d6   :  { %v6143_v27 = vpack.c.bf16 %v2561_v21, %v2559_v13 }
 0x2d7   :  { %v2044_v25 = vpop.f32.mrf.mxu2 }
 0x2d8   :  { %v2045_v47 = vadd.f32 %v2044_v25, %v6080_v33  ;;  %v2213_v2 = vpop.f32.mrf.mxu3  ;;  %v1708_v26 = vpop.f32.mrf.mxu0 }
 0x2d9   :  { %v1709_v53 = vadd.f32 %v1708_v26, %v6071_v36  ;;  %v1877_v55 = vpop.f32.mrf.mxu1 }
 0x2da   :  { %v2214_v60 = vadd.f32 %v2213_v2, %v2045_v47 }
 0x2db   :  { %v1878_v56 = vadd.f32 %v1877_v55, %v1709_v53 }
 0x2dc   :  { %v2563_v13 = vmax.f32 %v2214_v60, 0.0 }
 0x2dd   :  { %v2564_v14 = vmax.f32 %v1878_v56, 0.0 }
 0x2df   :  { %v2046_v52 = vpop.f32.mrf.mxu2  ;;  %v6147_v35 = vpack.c.bf16 %v2564_v14, %v2562_v49 }
 0x2e0   :  { %v2047_v63 = vadd.f32 %v2046_v52, %v6080_v33  ;;  %v2215_v16 = vpop.f32.mrf.mxu3  ;;  %v1711_v4 = vpop.f32.mrf.mxu0 }
 0x2e1   :  { %v1712_v6 = vadd.f32 %v1711_v4, %v6071_v36  ;;  %v1880_v37 = vpop.f32.mrf.mxu1 }
 0x2e2   :  { %v2216_v1 = vadd.f32 %v2215_v16, %v2047_v63 }
 0x2e3   :  { %v1881_v39 = vadd.f32 %v1880_v37, %v1712_v6  ;;  %1750 = vmatmul.bf16.gmra.mxu0 %v5644_v43 }
 0x2e4   :  { %v2565_v21 = vmax.f32 %v2216_v1, 0.0  ;;  %1919 = vmatmul.bf16.gmra.mxu1 %v5648_v61  ;;  %2088 = vmatmul.bf16.gmra.mxu2 %v5644_v43 }
 0x2e5   :  { %2257 = vmatmul.bf16.gmra.mxu3 %v5648_v61  ;;  %v2566_v60 = vmax.f32 %v1881_v39, 0.0 }
 0x2e6   :  { %v6155_v45 = vpack.c.bf16 %v2565_v21, %v2563_v13 }
 0x2e7   :  { %v2049_v25 = vpop.f32.mrf.mxu2 }
 0x2e8   :  { %v2050_v47 = vadd.f32 %v2049_v25, %v6080_v33  ;;  %v2218_v2 = vpop.f32.mrf.mxu3  ;;  %v1713_v26 = vpop.f32.mrf.mxu0 }
 0x2e9   :  { %v1714_v53 = vadd.f32 %v1713_v26, %v6071_v36  ;;  %v1882_v55 = vpop.f32.mrf.mxu1 }
 0x2ea   :  { %v2219_v56 = vadd.f32 %v2218_v2, %v2050_v47 }
 0x2eb   :  { %v1883_v49 = vadd.f32 %v1882_v55, %v1714_v53 }
 0x2ec   :  { %v2567_v13 = vmax.f32 %v2219_v56, 0.0 }
 0x2ed   :  { %v2568_v14 = vmax.f32 %v1883_v49, 0.0 }
 0x2ef   :  { %v2051_v52 = vpop.f32.mrf.mxu2  ;;  %v6159_v63 = vpack.c.bf16 %v2568_v14, %v2566_v60 }
 0x2f0   :  { %v2052_v43 = vadd.f32 %v2051_v52, %v6080_v33  ;;  %v2220_v61 = vpop.f32.mrf.mxu3  ;;  %v1716_v16 = vpop.f32.mrf.mxu0 }
 0x2f1   :  { %v1717_v4 = vadd.f32 %v1716_v16, %v6071_v36  ;;  %v1885_v6 = vpop.f32.mrf.mxu1 }
 0x2f2   :  { %v2221_v37 = vadd.f32 %v2220_v61, %v2052_v43 }
 0x2f3   :  { %v1886_v1 = vadd.f32 %v1885_v6, %v1717_v4  ;;  %1755 = vmatmul.bf16.gmra.mxu0 %v5664_v29 }
 0x2f4   :  { %v2569_v21 = vmax.f32 %v2221_v37, 0.0  ;;  %1924 = vmatmul.bf16.gmra.mxu1 %v5680_v57  ;;  %2093 = vmatmul.bf16.gmra.mxu2 %v5664_v29 }
 0x2f5   :  { %2262 = vmatmul.bf16.gmra.mxu3 %v5680_v57  ;;  %v2570_v56 = vmax.f32 %v1886_v1, 0.0  ;;  %v4834_v1 = vld [vmem:[%s7210_s5 + $0x34] sm:$0xf] }
 0x2f6   :  { %v6167_v39 = vpack.c.bf16 %v2569_v21, %v2567_v13 }
 0x2f7   :  { %v2054_v25 = vpop.f32.mrf.mxu2 }
 0x2f8   :  { %v2055_v47 = vadd.f32 %v2054_v25, %v6080_v33  ;;  %v2223_v2 = vpop.f32.mrf.mxu3  ;;  %v1718_v26 = vpop.f32.mrf.mxu0  ;;  %v4664_v25 = vld [vmem:[%s7210_s5 + $0x38] sm:$0xf0] }
 0x2f9   :  { %v1719_v53 = vadd.f32 %v1718_v26, %v6071_v36  ;;  %v1887_v55 = vpop.f32.mrf.mxu1  ;;  %v4728_v26 = vld [vmem:[%s7210_s5 + $0xb8] sm:$0xf0] }
 0x2fa   :  { %v2224_v49 = vadd.f32 %v2223_v2, %v2055_v47  ;;  %v4667_v47 = vor.u32 %v4834_v1, %v4664_v25  ;;  %v4850_v2 = vld [vmem:[%s7210_s5 + $0xb4] sm:$0xf] }
 0x2fb   :  { %v1888_v60 = vadd.f32 %v1887_v55, %v1719_v53  ;;  %v4731_v53 = vor.u32 %v4850_v2, %v4728_v26 }
 0x2fc   :  { %v2571_v13 = vmax.f32 %v2224_v49, 0.0  ;;  %3282 = vmatpush.bf16.msra.mxu2 %v4667_v47 }
 0x2fd   :  { %v2572_v14 = vmax.f32 %v1888_v60, 0.0  ;;  %3451 = vmatpush.bf16.msra.mxu3 %v4731_v53 }
 0x2ff   :  { %v2056_v52 = vpop.f32.mrf.mxu2  ;;  %v6171_v43 = vpack.c.bf16 %v2572_v14, %v2570_v56 }
 0x300   :  { %v2057_v29 = vadd.f32 %v2056_v52, %v6080_v33  ;;  %v2225_v57 = vpop.f32.mrf.mxu3  ;;  %v1721_v61 = vpop.f32.mrf.mxu0 }
 0x301   :  { %v1722_v16 = vadd.f32 %v1721_v61, %v6071_v36  ;;  %v1890_v4 = vpop.f32.mrf.mxu1 }
 0x302   :  { %v2226_v6 = vadd.f32 %v2225_v57, %v2057_v29 }
 0x303   :  { %v1891_v37 = vadd.f32 %v1890_v4, %v1722_v16  ;;  %1760 = vmatmul.bf16.gmra.mxu0 %v5708_v34  ;;  %v4662_v16 = vld [vmem:[%s7210_s5 + $0x30] sm:$0xf]  ;;  %v4835_v4 = vld [vmem:[%s7210_s5 + $0x34] sm:$0xf0] }
 0x304   :  { %v2573_v21 = vmax.f32 %v2226_v6, 0.0  ;;  %1929 = vmatmul.bf16.gmra.mxu1 %v5712_v58  ;;  %2098 = vmatmul.bf16.gmra.mxu2 %v5708_v34  ;;  %v4663_v6 = vor.u32 %v4835_v4, %v4662_v16 }
 0x305   :  { %2267 = vmatmul.bf16.gmra.mxu3 %v5712_v58  ;;  %v2574_v57 = vmax.f32 %v1891_v37, 0.0 }
 0x306   :  { %v6191_v34 = vpack.c.bf16 %v2573_v21, %v2571_v13  ;;  %v4726_v13 = vld [vmem:[%s7210_s5 + $0xb0] sm:$0xf]  ;;  %v4851_v21 = vld [vmem:[%s7210_s5 + $0xb4] sm:$0xf0]  ;;  %2944 = vmatpush.bf16.msra.mxu0 %v4663_v6 }
 0x307   :  { %v2059_v58 = vpop.f32.mrf.mxu2  ;;  %v4727_v37 = vor.u32 %v4851_v21, %v4726_v13 }
 0x308   :  { %v2060_v55 = vadd.f32 %v2059_v58, %v6080_v33  ;;  %v2228_v49 = vpop.f32.mrf.mxu3  ;;  %v1723_v60 = vpop.f32.mrf.mxu0 }
 0x309   :  { %v1724_v56 = vadd.f32 %v1723_v60, %v6071_v36  ;;  %v1892_v14 = vpop.f32.mrf.mxu1  ;;  %3113 = vmatpush.bf16.msra.mxu1 %v4727_v37 }
 0x30a   :  { %v2229_v52 = vadd.f32 %v2228_v49, %v2060_v55 }
 0x30b   :  { %v1893_v29 = vadd.f32 %v1892_v14, %v1724_v56 }
 0x30c   :  { %v2575_v60 = vmax.f32 %v2229_v52, 0.0 }
 0x30d   :  { %v2576_v61 = vmax.f32 %v1893_v29, 0.0 }
 0x30f   :  { %v2061_v1 = vpop.f32.mrf.mxu2  ;;  %v6207_v25 = vpack.c.bf16 %v2576_v61, %v2574_v57 }
 0x310   :  { %v2062_v47 = vadd.f32 %v2061_v1, %v6080_v33  ;;  %v2230_v2 = vpop.f32.mrf.mxu3  ;;  %v1726_v26 = vpop.f32.mrf.mxu0 }
 0x311   :  { %v1727_v58 = vadd.f32 %v1726_v26, %v6071_v36  ;;  %v1895_v53 = vpop.f32.mrf.mxu1 }
 0x312   :  { %v2231_v55 = vadd.f32 %v2230_v2, %v2062_v47 }
 0x313   :  { %v1896_v49 = vadd.f32 %v1895_v53, %v1727_v58  ;;  %1765 = vmatmul.bf16.gmra.mxu0 %v5728_v23 }
 0x314   :  { %v2577_v56 = vmax.f32 %v2231_v55, 0.0  ;;  %1934 = vmatmul.bf16.gmra.mxu1 %v5732_v46  ;;  %2103 = vmatmul.bf16.gmra.mxu2 %v5728_v23 }
 0x315   :  { %2272 = vmatmul.bf16.gmra.mxu3 %v5732_v46  ;;  %v2578_v52 = vmax.f32 %v1896_v49, 0.0 }
 0x316   :  { %v6215_v14 = vpack.c.bf16 %v2577_v56, %v2575_v60 }
 0x317   :  { %v2064_v29 = vpop.f32.mrf.mxu2 }
 0x318   :  { %v2065_v57 = vadd.f32 %v2064_v29, %v6080_v33  ;;  %v2233_v61 = vpop.f32.mrf.mxu3  ;;  %v1728_v16 = vpop.f32.mrf.mxu0 }
 0x319   :  { %v1729_v4 = vadd.f32 %v1728_v16, %v6071_v36  ;;  %v1897_v6 = vpop.f32.mrf.mxu1 }
 0x31a   :  { %v2234_v13 = vadd.f32 %v2233_v61, %v2065_v57 }
 0x31b   :  { %v1898_v21 = vadd.f32 %v1897_v6, %v1729_v4 }
 0x31c   :  { %v2579_v60 = vmax.f32 %v2234_v13, 0.0 }
 0x31d   :  { %v2580_v1 = vmax.f32 %v1898_v21, 0.0 }
 0x31f   :  { %v2066_v37 = vpop.f32.mrf.mxu2  ;;  %v6219_v47 = vpack.c.bf16 %v2580_v1, %v2578_v52 }
 0x320   :  { %v2067_v23 = vadd.f32 %v2066_v37, %v6080_v33  ;;  %v2235_v46 = vpop.f32.mrf.mxu3  ;;  %v1731_v2 = vpop.f32.mrf.mxu0 }
 0x321   :  { %v1732_v26 = vadd.f32 %v1731_v2, %v6071_v36  ;;  %v1900_v58 = vpop.f32.mrf.mxu1 }
 0x322   :  { %v2236_v53 = vadd.f32 %v2235_v46, %v2067_v23 }
 0x323   :  { %v1901_v55 = vadd.f32 %v1900_v58, %v1732_v26  ;;  %1770 = vmatmul.bf16.gmra.mxu0 %v5748_v17 }
 0x324   :  { %v2581_v56 = vmax.f32 %v2236_v53, 0.0  ;;  %1939 = vmatmul.bf16.gmra.mxu1 %v5752_v40  ;;  %2108 = vmatmul.bf16.gmra.mxu2 %v5748_v17 }
 0x325   :  { %2277 = vmatmul.bf16.gmra.mxu3 %v5752_v40  ;;  %v2582_v13 = vmax.f32 %v1901_v55, 0.0 }
 0x326   :  { %v6227_v49 = vpack.c.bf16 %v2581_v56, %v2579_v60 }
 0x327   :  { %v2069_v29 = vpop.f32.mrf.mxu2 }
 0x328   :  { %v2070_v57 = vadd.f32 %v2069_v29, %v6080_v33  ;;  %v2238_v61 = vpop.f32.mrf.mxu3  ;;  %v1733_v16 = vpop.f32.mrf.mxu0 }
 0x329   :  { %v1734_v4 = vadd.f32 %v1733_v16, %v6071_v36  ;;  %v1902_v6 = vpop.f32.mrf.mxu1 }
 0x32a   :  { %v2239_v21 = vadd.f32 %v2238_v61, %v2070_v57 }
 0x32b   :  { %v1903_v52 = vadd.f32 %v1902_v6, %v1734_v4 }
 0x32c   :  { %v2583_v60 = vmax.f32 %v2239_v21, 0.0 }
 0x32d   :  { %v2584_v1 = vmax.f32 %v1903_v52, 0.0 }
 0x32f   :  { %v2071_v37 = vpop.f32.mrf.mxu2  ;;  %v6231_v23 = vpack.c.bf16 %v2584_v1, %v2582_v13 }
 0x330   :  { %v2072_v17 = vadd.f32 %v2071_v37, %v6080_v33  ;;  %v2240_v40 = vpop.f32.mrf.mxu3  ;;  %v1736_v46 = vpop.f32.mrf.mxu0 }
 0x331   :  { %v1737_v2 = vadd.f32 %v1736_v46, %v6071_v36  ;;  %v1905_v26 = vpop.f32.mrf.mxu1 }
 0x332   :  { %v2241_v58 = vadd.f32 %v2240_v40, %v2072_v17 }
 0x333   :  { %v1906_v53 = vadd.f32 %v1905_v26, %v1737_v2  ;;  %1775 = vmatmul.bf16.gmra.mxu0 %v5768_v12 }
 0x334   :  { %v2585_v56 = vmax.f32 %v2241_v58, 0.0  ;;  %1944 = vmatmul.bf16.gmra.mxu1 %v5784_v51  ;;  %2113 = vmatmul.bf16.gmra.mxu2 %v5768_v12 }
 0x335   :  { %2282 = vmatmul.bf16.gmra.mxu3 %v5784_v51  ;;  %v2586_v21 = vmax.f32 %v1906_v53, 0.0  ;;  %v4832_v53 = vld [vmem:[%s7210_s5 + $0x24] sm:$0xf] }
 0x336   :  { %v6239_v55 = vpack.c.bf16 %v2585_v56, %v2583_v60 }
 0x337   :  { %v2074_v29 = vpop.f32.mrf.mxu2 }
 0x338   :  { %v2075_v57 = vadd.f32 %v2074_v29, %v6080_v33  ;;  %v2243_v61 = vpop.f32.mrf.mxu3  ;;  %v1738_v16 = vpop.f32.mrf.mxu0  ;;  %v4656_v29 = vld [vmem:[%s7210_s5 + $0x28] sm:$0xf0] }
 0x339   :  { %v1739_v4 = vadd.f32 %v1738_v16, %v6071_v36  ;;  %v1907_v6 = vpop.f32.mrf.mxu1  ;;  %v4720_v16 = vld [vmem:[%s7210_s5 + $0xa8] sm:$0xf0] }
 0x33a   :  { %v2244_v52 = vadd.f32 %v2243_v61, %v2075_v57  ;;  %v4659_v57 = vor.u32 %v4832_v53, %v4656_v29  ;;  %v4848_v61 = vld [vmem:[%s7210_s5 + $0xa4] sm:$0xf] }
 0x33b   :  { %v1908_v13 = vadd.f32 %v1907_v6, %v1739_v4  ;;  %v4723_v4 = vor.u32 %v4848_v61, %v4720_v16 }
 0x33c   :  { %v2587_v60 = vmax.f32 %v2244_v52, 0.0  ;;  %3283 = vmatpush.bf16.msra.mxu2 %v4659_v57 }
 0x33d   :  { %v2588_v1 = vmax.f32 %v1908_v13, 0.0  ;;  %3452 = vmatpush.bf16.msra.mxu3 %v4723_v4 }
 0x33f   :  { %v2076_v37 = vpop.f32.mrf.mxu2  ;;  %v6243_v17 = vpack.c.bf16 %v2588_v1, %v2586_v21 }
 0x340   :  { %v2077_v12 = vadd.f32 %v2076_v37, %v6080_v33  ;;  %v2245_v51 = vpop.f32.mrf.mxu3  ;;  %v1741_v40 = vpop.f32.mrf.mxu0 }
 0x341   :  { %v1742_v46 = vadd.f32 %v1741_v40, %v6071_v36  ;;  %v1910_v2 = vpop.f32.mrf.mxu1 }
 0x342   :  { %v2246_v26 = vadd.f32 %v2245_v51, %v2077_v12 }
 0x343   :  { %v1911_v58 = vadd.f32 %v1910_v2, %v1742_v46  ;;  %1780 = vmatmul.bf16.gmra.mxu0 %v5812_v44  ;;  %v4654_v46 = vld [vmem:[%s7210_s5 + $0x20] sm:$0xf]  ;;  %v4833_v2 = vld [vmem:[%s7210_s5 + $0x24] sm:$0xf0] }
 0x344   :  { %v2589_v56 = vmax.f32 %v2246_v26, 0.0  ;;  %1949 = vmatmul.bf16.gmra.mxu1 %v5816_v7  ;;  %2118 = vmatmul.bf16.gmra.mxu2 %v5812_v44  ;;  %v4655_v26 = vor.u32 %v4833_v2, %v4654_v46 }
 0x345   :  { %2287 = vmatmul.bf16.gmra.mxu3 %v5816_v7  ;;  %v2590_v51 = vmax.f32 %v1911_v58, 0.0 }
 0x346   :  { %v6263_v44 = vpack.c.bf16 %v2589_v56, %v2587_v60  ;;  %v4718_v60 = vld [vmem:[%s7210_s5 + $0xa0] sm:$0xf]  ;;  %v4849_v56 = vld [vmem:[%s7210_s5 + $0xa4] sm:$0xf0]  ;;  %2945 = vmatpush.bf16.msra.mxu0 %v4655_v26 }
 0x347   :  { %v2079_v7 = vpop.f32.mrf.mxu2  ;;  %v4719_v58 = vor.u32 %v4849_v56, %v4718_v60 }
 0x348   :  { %v2080_v6 = vadd.f32 %v2079_v7, %v6080_v33  ;;  %v2248_v52 = vpop.f32.mrf.mxu3  ;;  %v1743_v13 = vpop.f32.mrf.mxu0 }
 0x349   :  { %v1744_v21 = vadd.f32 %v1743_v13, %v6071_v36  ;;  %v1912_v1 = vpop.f32.mrf.mxu1  ;;  %3114 = vmatpush.bf16.msra.mxu1 %v4719_v58  ;;  %v7233_v13 = vld [vmem:[#allocation6_spill] sm:$0xff] }
 0x34a   :  { %v2249_v37 = vadd.f32 %v2248_v52, %v2080_v6 }
 0x34b   :  { %v1913_v12 = vadd.f32 %v1912_v1, %v1744_v21 }
 0x34c   :  { %v2591_v21 = vmax.f32 %v2249_v37, 0.0 }
 0x34d   :  { %v2592_v40 = vmax.f32 %v1913_v12, 0.0  ;;  %v7234_v12 = vld [vmem:[#allocation7_spill] sm:$0xff] }
 0x34f   :  { %v2081_v53 = vpop.f32.mrf.mxu2  ;;  %v6279_v29 = vpack.c.bf16 %v2592_v40, %v2590_v51 }
 0x350   :  { %v2082_v57 = vadd.f32 %v2081_v53, %v6080_v33  ;;  %v2250_v61 = vpop.f32.mrf.mxu3  ;;  %v1746_v16 = vpop.f32.mrf.mxu0 }
 0x351   :  { %v1747_v7 = vadd.f32 %v1746_v16, %v6071_v36  ;;  %v1915_v4 = vpop.f32.mrf.mxu1 }
 0x352   :  { %v2251_v6 = vadd.f32 %v2250_v61, %v2082_v57 }
 0x353   :  { %v1916_v52 = vadd.f32 %v1915_v4, %v1747_v7  ;;  %1785 = vmatmul.bf16.gmra.mxu0 %v7233_v13 }
 0x354   :  { %v2593_v1 = vmax.f32 %v2251_v6, 0.0  ;;  %1954 = vmatmul.bf16.gmra.mxu1 %v7234_v12  ;;  %2123 = vmatmul.bf16.gmra.mxu2 %v7233_v13 }
 0x355   :  { %2292 = vmatmul.bf16.gmra.mxu3 %v7234_v12  ;;  %v2594_v37 = vmax.f32 %v1916_v52, 0.0 }
 0x356   :  { %v6287_v51 = vpack.c.bf16 %v2593_v1, %v2591_v21 }
 0x357   :  { %v2084_v40 = vpop.f32.mrf.mxu2 }
 0x358   :  { %7235 = vst [vmem:[#allocation6_spill] sm:$0xff] %v6287_v51  ;;  %v2085_v46 = vadd.f32 %v2084_v40, %v6080_v33  ;;  %v2253_v2 = vpop.f32.mrf.mxu3  ;;  %v1748_v26 = vpop.f32.mrf.mxu0  ;;  %v7237_v40 = vld [vmem:[#allocation8_spill] sm:$0xff] }
 0x359   :  { %v1749_v60 = vadd.f32 %v1748_v26, %v6071_v36  ;;  %v1917_v56 = vpop.f32.mrf.mxu1 }
 0x35a   :  { %v2254_v53 = vadd.f32 %v2253_v2, %v2085_v46  ;;  %v7238_v46 = vld [vmem:[#allocation9_spill] sm:$0xff] }
 0x35b   :  { %v1918_v58 = vadd.f32 %v1917_v56, %v1749_v60 }
 0x35c   :  { %v2595_v26 = vmax.f32 %v2254_v53, 0.0 }
 0x35d   :  { %v2596_v57 = vmax.f32 %v1918_v58, 0.0 }
 0x35f   :  { %v2086_v61 = vpop.f32.mrf.mxu2  ;;  %v6291_v16 = vpack.c.bf16 %v2596_v57, %v2594_v37 }
 0x360   :  { %v2087_v7 = vadd.f32 %v2086_v61, %v6080_v33  ;;  %v2255_v4 = vpop.f32.mrf.mxu3  ;;  %v1751_v6 = vpop.f32.mrf.mxu0 }
 0x361   :  { %7236 = vst [vmem:[#allocation7_spill] sm:$0xff] %v6291_v16  ;;  %v1752_v13 = vadd.f32 %v1751_v6, %v6071_v36  ;;  %v1920_v21 = vpop.f32.mrf.mxu1 }
 0x362   :  { %v2256_v1 = vadd.f32 %v2255_v4, %v2087_v7 }
 0x363   :  { %v1921_v12 = vadd.f32 %v1920_v21, %v1752_v13  ;;  %1790 = vmatmul.bf16.gmra.mxu0 %v7237_v40 }
 0x364   :  { %v2597_v51 = vmax.f32 %v2256_v1, 0.0  ;;  %1959 = vmatmul.bf16.gmra.mxu1 %v7238_v46  ;;  %2128 = vmatmul.bf16.gmra.mxu2 %v7237_v40 }
 0x365   :  { %2297 = vmatmul.bf16.gmra.mxu3 %v7238_v46  ;;  %v2598_v53 = vmax.f32 %v1921_v12, 0.0 }
 0x366   :  { %v6299_v52 = vpack.c.bf16 %v2597_v51, %v2595_v26 }
 0x367   :  { %v2089_v2 = vpop.f32.mrf.mxu2 }
 0x368   :  { %7239 = vst [vmem:[#allocation8_spill] sm:$0xff] %v6299_v52  ;;  %v2090_v60 = vadd.f32 %v2089_v2, %v6080_v33  ;;  %v2258_v56 = vpop.f32.mrf.mxu3  ;;  %v1753_v58 = vpop.f32.mrf.mxu0  ;;  %v7240_v52 = vld [vmem:[#allocation10_spill] sm:$0xff] }
 0x369   :  { %v1754_v37 = vadd.f32 %v1753_v58, %v6071_v36  ;;  %v1922_v57 = vpop.f32.mrf.mxu1 }
 0x36a   :  { %v2259_v61 = vadd.f32 %v2258_v56, %v2090_v60  ;;  %v7241_v60 = vld [vmem:[#allocation11_spill] sm:$0xff] }
 0x36b   :  { %v1923_v7 = vadd.f32 %v1922_v57, %v1754_v37 }
 0x36c   :  { %v2599_v58 = vmax.f32 %v2259_v61, 0.0 }
 0x36d   :  { %v2600_v4 = vmax.f32 %v1923_v7, 0.0 }
 0x36f   :  { %v2091_v6 = vpop.f32.mrf.mxu2  ;;  %v6303_v13 = vpack.c.bf16 %v2600_v4, %v2598_v53 }
 0x370   :  { %v2092_v21 = vadd.f32 %v2091_v6, %v6080_v33  ;;  %v2260_v1 = vpop.f32.mrf.mxu3  ;;  %v1756_v51 = vpop.f32.mrf.mxu0 }
 0x371   :  { %v1757_v40 = vadd.f32 %v1756_v51, %v6071_v36  ;;  %v1925_v26 = vpop.f32.mrf.mxu1 }
 0x372   :  { %v2261_v46 = vadd.f32 %v2260_v1, %v2092_v21 }
 0x373   :  { %v1926_v2 = vadd.f32 %v1925_v26, %v1757_v40  ;;  %1795 = vmatmul.bf16.gmra.mxu0 %v7240_v52 }
 0x374   :  { %v2601_v16 = vmax.f32 %v2261_v46, 0.0  ;;  %1964 = vmatmul.bf16.gmra.mxu1 %v7241_v60  ;;  %2133 = vmatmul.bf16.gmra.mxu2 %v7240_v52 }
 0x375   :  { %2302 = vmatmul.bf16.gmra.mxu3 %v7241_v60  ;;  %v2602_v61 = vmax.f32 %v1926_v2, 0.0  ;;  %v4830_v2 = vld [vmem:[%s7210_s5 + $0x14] sm:$0xf] }
 0x376   :  { %v6311_v12 = vpack.c.bf16 %v2601_v16, %v2599_v58 }
 0x377   :  { %v2094_v56 = vpop.f32.mrf.mxu2 }
 0x378   :  { %7242 = vst [vmem:[#allocation9_spill] sm:$0xff] %v6311_v12  ;;  %v2095_v37 = vadd.f32 %v2094_v56, %v6080_v33  ;;  %v2263_v57 = vpop.f32.mrf.mxu3  ;;  %v1758_v7 = vpop.f32.mrf.mxu0 }
 0x379   :  { %v1759_v53 = vadd.f32 %v1758_v7, %v6071_v36  ;;  %v1927_v4 = vpop.f32.mrf.mxu1 }
 0x37a   :  { %v2264_v6 = vadd.f32 %v2263_v57, %v2095_v37  ;;  %v4648_v37 = vld [vmem:[%s7210_s5 + $0x18] sm:$0xf0] }
 0x37b   :  { %v1928_v21 = vadd.f32 %v1927_v4, %v1759_v53  ;;  %v4651_v57 = vor.u32 %v4830_v2, %v4648_v37  ;;  %v4846_v53 = vld [vmem:[%s7210_s5 + $0x94] sm:$0xf]  ;;  %v4712_v4 = vld [vmem:[%s7210_s5 + $0x98] sm:$0xf0]  ;;  %v4710_v2 = vld [vmem:[%s7210_s5 + $0x90] sm:$0xf] }
 0x37c   :  { %v2603_v7 = vmax.f32 %v2264_v6, 0.0  ;;  %v4715_v6 = vor.u32 %v4846_v53, %v4712_v4  ;;  %v4847_v37 = vld [vmem:[%s7210_s5 + $0x94] sm:$0xf0] }
 0x37d   :  { %v2604_v1 = vmax.f32 %v1928_v21, 0.0  ;;  %3284 = vmatpush.bf16.msra.mxu2 %v4651_v57 }
 0x37e   :  { %3453 = vmatpush.bf16.msra.mxu3 %v4715_v6 }
 0x37f   :  { %v2096_v51 = vpop.f32.mrf.mxu2  ;;  %v6315_v40 = vpack.c.bf16 %v2604_v1, %v2602_v61 }
 0x380   :  { %v2097_v52 = vadd.f32 %v2096_v51, %v6080_v33  ;;  %v2265_v26 = vpop.f32.mrf.mxu3  ;;  %v1761_v16 = vpop.f32.mrf.mxu0 }
 0x381   :  { %v1762_v46 = vadd.f32 %v1761_v16, %v6071_v36  ;;  %v1930_v58 = vpop.f32.mrf.mxu1 }
 0x382   :  { %v2266_v60 = vadd.f32 %v2265_v26, %v2097_v52 }
 0x383   :  { %v1931_v56 = vadd.f32 %v1930_v58, %v1762_v46  ;;  %1800 = vmatmul.bf16.gmra.mxu0 %v5916_v32 }
 0x384   :  { %v2605_v12 = vmax.f32 %v2266_v60, 0.0  ;;  %1969 = vmatmul.bf16.gmra.mxu1 %v5920_v48  ;;  %2138 = vmatmul.bf16.gmra.mxu2 %v5916_v32  ;;  %v4831_v60 = vld [vmem:[%s7210_s5 + $0x14] sm:$0xf0] }
 0x385   :  { %2307 = vmatmul.bf16.gmra.mxu3 %v5920_v48  ;;  %v2606_v46 = vmax.f32 %v1931_v56, 0.0  ;;  %v4711_v56 = vor.u32 %v4847_v37, %v4710_v2 }
 0x386   :  { %v6335_v32 = vpack.c.bf16 %v2605_v12, %v2603_v7  ;;  %v4646_v12 = vld [vmem:[%s7210_s5 + $0x10] sm:$0xf] }
 0x387   :  { %v2099_v48 = vpop.f32.mrf.mxu2  ;;  %v4647_v7 = vor.u32 %v4831_v60, %v4646_v12  ;;  %3115 = vmatpush.bf16.msra.mxu1 %v4711_v56 }
 0x388   :  { %v2100_v21 = vadd.f32 %v2099_v48, %v6080_v33  ;;  %v2268_v61 = vpop.f32.mrf.mxu3  ;;  %v1763_v1 = vpop.f32.mrf.mxu0 }
 0x389   :  { %v1764_v51 = vadd.f32 %v1763_v1, %v6071_v36  ;;  %v1932_v52 = vpop.f32.mrf.mxu1  ;;  %2946 = vmatpush.bf16.msra.mxu0 %v4647_v7 }
 0x38a   :  { %v2269_v26 = vadd.f32 %v2268_v61, %v2100_v21 }
 0x38b   :  { %v1933_v16 = vadd.f32 %v1932_v52, %v1764_v51 }
 0x38c   :  { %v2607_v52 = vmax.f32 %v2269_v26, 0.0 }
 0x38d   :  { %v2608_v58 = vmax.f32 %v1933_v16, 0.0 }
 0x38f   :  { %v2101_v57 = vpop.f32.mrf.mxu2  ;;  %v6351_v53 = vpack.c.bf16 %v2608_v58, %v2606_v46 }
 0x390   :  { %v2102_v4 = vadd.f32 %v2101_v57, %v6080_v33  ;;  %v2270_v48 = vpop.f32.mrf.mxu3  ;;  %v1766_v6 = vpop.f32.mrf.mxu0 }
 0x391   :  { %v1767_v21 = vadd.f32 %v1766_v6, %v6071_v36  ;;  %v1935_v61 = vpop.f32.mrf.mxu1 }
 0x392   :  { %v2271_v1 = vadd.f32 %v2270_v48, %v2102_v4 }
 0x393   :  { %v1936_v51 = vadd.f32 %v1935_v61, %v1767_v21  ;;  %1805 = vmatmul.bf16.gmra.mxu0 %v5924_v31 }
 0x394   :  { %v2609_v16 = vmax.f32 %v2271_v1, 0.0  ;;  %1974 = vmatmul.bf16.gmra.mxu1 %v5932_v5  ;;  %2143 = vmatmul.bf16.gmra.mxu2 %v5924_v31 }
 0x395   :  { %2312 = vmatmul.bf16.gmra.mxu3 %v5932_v5  ;;  %v2610_v26 = vmax.f32 %v1936_v51, 0.0 }
 0x396   :  { %v6359_v46 = vpack.c.bf16 %v2609_v16, %v2607_v52 }
 0x397   :  { %v2104_v58 = vpop.f32.mrf.mxu2 }
 0x398   :  { %v2105_v12 = vadd.f32 %v2104_v58, %v6080_v33  ;;  %v2273_v60 = vpop.f32.mrf.mxu3  ;;  %v1768_v7 = vpop.f32.mrf.mxu0 }
 0x399   :  { %v1769_v2 = vadd.f32 %v1768_v7, %v6071_v36  ;;  %v1937_v37 = vpop.f32.mrf.mxu1 }
 0x39a   :  { %v2274_v57 = vadd.f32 %v2273_v60, %v2105_v12 }
 0x39b   :  { %v1938_v56 = vadd.f32 %v1937_v37, %v1769_v2 }
 0x39c   :  { %v2611_v58 = vmax.f32 %v2274_v57, 0.0 }
 0x39d   :  { %v2612_v4 = vmax.f32 %v1938_v56, 0.0 }
 0x39f   :  { %v2106_v48 = vpop.f32.mrf.mxu2  ;;  %v6363_v6 = vpack.c.bf16 %v2612_v4, %v2610_v26 }
 0x3a0   :  { %v2107_v31 = vadd.f32 %v2106_v48, %v6080_v33  ;;  %v2275_v5 = vpop.f32.mrf.mxu3  ;;  %v1771_v21 = vpop.f32.mrf.mxu0 }
 0x3a1   :  { %v1772_v61 = vadd.f32 %v1771_v21, %v6071_v36  ;;  %v1940_v1 = vpop.f32.mrf.mxu1 }
 0x3a2   :  { %v2276_v52 = vadd.f32 %v2275_v5, %v2107_v31 }
 0x3a3   :  { %v1941_v16 = vadd.f32 %v1940_v1, %v1772_v61  ;;  %1810 = vmatmul.bf16.gmra.mxu0 %v5936_v38 }
 0x3a4   :  { %v2613_v7 = vmax.f32 %v2276_v52, 0.0  ;;  %1979 = vmatmul.bf16.gmra.mxu1 %v5944_v42  ;;  %2148 = vmatmul.bf16.gmra.mxu2 %v5936_v38 }
 0x3a5   :  { %2317 = vmatmul.bf16.gmra.mxu3 %v5944_v42  ;;  %v2614_v57 = vmax.f32 %v1941_v16, 0.0 }
 0x3a6   :  { %v6371_v51 = vpack.c.bf16 %v2613_v7, %v2611_v58 }
 0x3a7   :  { %v2109_v12 = vpop.f32.mrf.mxu2 }
 0x3a8   :  { %v2110_v60 = vadd.f32 %v2109_v12, %v6080_v33  ;;  %v2278_v2 = vpop.f32.mrf.mxu3  ;;  %v1773_v37 = vpop.f32.mrf.mxu0 }
 0x3a9   :  { %v1774_v56 = vadd.f32 %v1773_v37, %v6071_v36  ;;  %v1942_v26 = vpop.f32.mrf.mxu1 }
 0x3aa   :  { %v2279_v4 = vadd.f32 %v2278_v2, %v2110_v60 }
 0x3ab   :  { %v1943_v48 = vadd.f32 %v1942_v26, %v1774_v56 }
 0x3ac   :  { %v2615_v12 = vmax.f32 %v2279_v4, 0.0 }
 0x3ad   :  { %v2616_v31 = vmax.f32 %v1943_v48, 0.0 }
 0x3af   :  { %v2111_v5 = vpop.f32.mrf.mxu2  ;;  %v6375_v21 = vpack.c.bf16 %v2616_v31, %v2614_v57 }
 0x3b0   :  { %v2112_v38 = vadd.f32 %v2111_v5, %v6080_v33  ;;  %v2280_v42 = vpop.f32.mrf.mxu3  ;;  %v1776_v61 = vpop.f32.mrf.mxu0 }
 0x3b1   :  { %v1777_v1 = vadd.f32 %v1776_v61, %v6071_v36  ;;  %v1945_v52 = vpop.f32.mrf.mxu1 }
 0x3b2   :  { %v2281_v58 = vadd.f32 %v2280_v42, %v2112_v38 }
 0x3b3   :  { %v1946_v7 = vadd.f32 %v1945_v52, %v1777_v1  ;;  %1815 = vmatmul.bf16.gmra.mxu0 %v5948_v15 }
 0x3b4   :  { %v2617_v37 = vmax.f32 %v2281_v58, 0.0  ;;  %1984 = vmatmul.bf16.gmra.mxu1 %v5968_v24  ;;  %2153 = vmatmul.bf16.gmra.mxu2 %v5948_v15 }
 0x3b5   :  { %2322 = vmatmul.bf16.gmra.mxu3 %v5968_v24  ;;  %v2618_v4 = vmax.f32 %v1946_v7, 0.0  ;;  %v4828_v7 = vld [vmem:[%s7210_s5 + $0x4] sm:$0xf] }
 0x3b6   :  { %v6383_v16 = vpack.c.bf16 %v2617_v37, %v2615_v12 }
 0x3b7   :  { %v2114_v60 = vpop.f32.mrf.mxu2 }
 0x3b8   :  { %v2115_v2 = vadd.f32 %v2114_v60, %v6080_v33  ;;  %v2283_v56 = vpop.f32.mrf.mxu3  ;;  %v1778_v26 = vpop.f32.mrf.mxu0 }
 0x3b9   :  { %v1779_v48 = vadd.f32 %v1778_v26, %v6071_v36  ;;  %v1947_v57 = vpop.f32.mrf.mxu1 }
 0x3ba   :  { %v2284_v31 = vadd.f32 %v2283_v56, %v2115_v2  ;;  %v4640_v2 = vld [vmem:[%s7210_s5 + $0x8] sm:$0xf0] }
 0x3bb   :  { %v1948_v5 = vadd.f32 %v1947_v57, %v1779_v48  ;;  %v4643_v56 = vor.u32 %v4828_v7, %v4640_v2  ;;  %v4844_v48 = vld [vmem:[%s7210_s5 + $0x84] sm:$0xf]  ;;  %v4704_v57 = vld [vmem:[%s7210_s5 + $0x88] sm:$0xf0]  ;;  %v4702_v7 = vld [vmem:[%s7210_s5 + $0x80] sm:$0xf] }
 0x3bc   :  { %v2619_v60 = vmax.f32 %v2284_v31, 0.0  ;;  %v4707_v31 = vor.u32 %v4844_v48, %v4704_v57  ;;  %v4845_v2 = vld [vmem:[%s7210_s5 + $0x84] sm:$0xf0] }
 0x3bd   :  { %v2620_v38 = vmax.f32 %v1948_v5, 0.0  ;;  %3285 = vmatpush.bf16.msra.mxu2 %v4643_v56 }
 0x3be   :  { %3454 = vmatpush.bf16.msra.mxu3 %v4707_v31 }
 0x3bf   :  { %v2116_v42 = vpop.f32.mrf.mxu2  ;;  %v6387_v61 = vpack.c.bf16 %v2620_v38, %v2618_v4 }
 0x3c0   :  { %v2117_v15 = vadd.f32 %v2116_v42, %v6080_v33  ;;  %v2285_v24 = vpop.f32.mrf.mxu3  ;;  %v1781_v1 = vpop.f32.mrf.mxu0 }
 0x3c1   :  { %v1782_v52 = vadd.f32 %v1781_v1, %v6071_v36  ;;  %v1950_v58 = vpop.f32.mrf.mxu1 }
 0x3c2   :  { %v2286_v12 = vadd.f32 %v2285_v24, %v2117_v15 }
 0x3c3   :  { %v1951_v37 = vadd.f32 %v1950_v58, %v1782_v52  ;;  %1820 = vmatmul.bf16.gmra.mxu0 %v5984_v59 }
 0x3c4   :  { %v2621_v26 = vmax.f32 %v2286_v12, 0.0  ;;  %1989 = vmatmul.bf16.gmra.mxu1 %v5992_v8  ;;  %2158 = vmatmul.bf16.gmra.mxu2 %v5984_v59  ;;  %v4638_v12 = vld [vmem:[%s7210_s5] sm:$0xf] }
 0x3c5   :  { %2327 = vmatmul.bf16.gmra.mxu3 %v5992_v8  ;;  %v2622_v52 = vmax.f32 %v1951_v37, 0.0  ;;  %v4703_v37 = vor.u32 %v4845_v2, %v4702_v7 }
 0x3c6   :  { %v6407_v59 = vpack.c.bf16 %v2621_v26, %v2619_v60  ;;  %v4829_v60 = vld [vmem:[%s7210_s5 + $0x4] sm:$0xf0] }
 0x3c7   :  { %v2119_v8 = vpop.f32.mrf.mxu2  ;;  %v4639_v26 = vor.u32 %v4829_v60, %v4638_v12  ;;  %3116 = vmatpush.bf16.msra.mxu1 %v4703_v37 }
 0x3c8   :  { %v2120_v5 = vadd.f32 %v2119_v8, %v6080_v33  ;;  %v2288_v4 = vpop.f32.mrf.mxu3  ;;  %v1783_v38 = vpop.f32.mrf.mxu0 }
 0x3c9   :  { %v1784_v42 = vadd.f32 %v1783_v38, %v6071_v36  ;;  %v1952_v15 = vpop.f32.mrf.mxu1  ;;  %2947 = vmatpush.bf16.msra.mxu0 %v4639_v26 }
 0x3ca   :  { %v2289_v24 = vadd.f32 %v2288_v4, %v2120_v5 }
 0x3cb   :  { %v1953_v1 = vadd.f32 %v1952_v15, %v1784_v42 }
 0x3cc   :  { %v2623_v15 = vmax.f32 %v2289_v24, 0.0 }
 0x3cd   :  { %v2624_v58 = vmax.f32 %v1953_v1, 0.0 }
 0x3cf   :  { %v2121_v56 = vpop.f32.mrf.mxu2  ;;  %v6423_v48 = vpack.c.bf16 %v2624_v58, %v2622_v52 }
 0x3d0   :  { %v2122_v57 = vadd.f32 %v2121_v56, %v6080_v33  ;;  %v2290_v8 = vpop.f32.mrf.mxu3  ;;  %v1786_v31 = vpop.f32.mrf.mxu0 }
 0x3d1   :  { %v1787_v5 = vadd.f32 %v1786_v31, %v6071_v36  ;;  %v1955_v4 = vpop.f32.mrf.mxu1 }
 0x3d2   :  { %v2291_v38 = vadd.f32 %v2290_v8, %v2122_v57 }
 0x3d3   :  { %v1956_v42 = vadd.f32 %v1955_v4, %v1787_v5  ;;  %1825 = vmatmul.bf16.gmra.mxu0 %v5996_v3 }
 0x3d4   :  { %v2625_v1 = vmax.f32 %v2291_v38, 0.0  ;;  %1994 = vmatmul.bf16.gmra.mxu1 %v6004_v18  ;;  %2163 = vmatmul.bf16.gmra.mxu2 %v5996_v3 }
 0x3d5   :  { %2332 = vmatmul.bf16.gmra.mxu3 %v6004_v18  ;;  %v2626_v24 = vmax.f32 %v1956_v42, 0.0 }
 0x3d6   :  { %v6431_v52 = vpack.c.bf16 %v2625_v1, %v2623_v15 }
 0x3d7   :  { %v2124_v58 = vpop.f32.mrf.mxu2 }
 0x3d8   :  { %v2125_v12 = vadd.f32 %v2124_v58, %v6080_v33  ;;  %v2293_v60 = vpop.f32.mrf.mxu3  ;;  %v1788_v26 = vpop.f32.mrf.mxu0 }
 0x3d9   :  { %v1789_v7 = vadd.f32 %v1788_v26, %v6071_v36  ;;  %v1957_v2 = vpop.f32.mrf.mxu1 }
 0x3da   :  { %v2294_v56 = vadd.f32 %v2293_v60, %v2125_v12 }
 0x3db   :  { %v1958_v37 = vadd.f32 %v1957_v2, %v1789_v7 }
 0x3dc   :  { %v2627_v58 = vmax.f32 %v2294_v56, 0.0 }
 0x3dd   :  { %v2628_v57 = vmax.f32 %v1958_v37, 0.0 }
 0x3df   :  { %v2126_v8 = vpop.f32.mrf.mxu2  ;;  %v6435_v31 = vpack.c.bf16 %v2628_v57, %v2626_v24 }
 0x3e0   :  { %v2127_v3 = vadd.f32 %v2126_v8, %v6080_v33  ;;  %v2295_v18 = vpop.f32.mrf.mxu3  ;;  %v1791_v5 = vpop.f32.mrf.mxu0 }
 0x3e1   :  { %v1792_v4 = vadd.f32 %v1791_v5, %v6071_v36  ;;  %v1960_v38 = vpop.f32.mrf.mxu1 }
 0x3e2   :  { %v2296_v15 = vadd.f32 %v2295_v18, %v2127_v3 }
 0x3e3   :  { %v1961_v1 = vadd.f32 %v1960_v38, %v1792_v4  ;;  %1830 = vmatmul.bf16.gmra.mxu0 %v6008_v54 }
 0x3e4   :  { %v2629_v26 = vmax.f32 %v2296_v15, 0.0  ;;  %1999 = vmatmul.bf16.gmra.mxu1 %v6016_v20  ;;  %2168 = vmatmul.bf16.gmra.mxu2 %v6008_v54 }
 0x3e5   :  { %2337 = vmatmul.bf16.gmra.mxu3 %v6016_v20  ;;  %v2630_v56 = vmax.f32 %v1961_v1, 0.0 }
 0x3e6   :  { %v6443_v42 = vpack.c.bf16 %v2629_v26, %v2627_v58 }
 0x3e7   :  { %v2129_v12 = vpop.f32.mrf.mxu2 }
 0x3e8   :  { %v2130_v60 = vadd.f32 %v2129_v12, %v6080_v33  ;;  %v2298_v7 = vpop.f32.mrf.mxu3  ;;  %v1793_v2 = vpop.f32.mrf.mxu0 }
 0x3e9   :  { %v1794_v37 = vadd.f32 %v1793_v2, %v6071_v36  ;;  %v1962_v24 = vpop.f32.mrf.mxu1 }
 0x3ea   :  { %v2299_v57 = vadd.f32 %v2298_v7, %v2130_v60 }
 0x3eb   :  { %v1963_v8 = vadd.f32 %v1962_v24, %v1794_v37 }
 0x3ec   :  { %v2631_v12 = vmax.f32 %v2299_v57, 0.0 }
 0x3ed   :  { %v2632_v3 = vmax.f32 %v1963_v8, 0.0 }
 0x3ef   :  { %v2131_v18 = vpop.f32.mrf.mxu2  ;;  %v6447_v5 = vpack.c.bf16 %v2632_v3, %v2630_v56 }
 0x3f0   :  { %v2132_v54 = vadd.f32 %v2131_v18, %v6080_v33  ;;  %v2300_v20 = vpop.f32.mrf.mxu3  ;;  %v1796_v4 = vpop.f32.mrf.mxu0 }
 0x3f1   :  { %v1797_v38 = vadd.f32 %v1796_v4, %v6071_v36  ;;  %v1965_v15 = vpop.f32.mrf.mxu1 }
 0x3f2   :  { %v2301_v58 = vadd.f32 %v2300_v20, %v2132_v54 }
 0x3f3   :  { %v1966_v26 = vadd.f32 %v1965_v15, %v1797_v38  ;;  %1835 = vmatmul.bf16.gmra.mxu0 %v6020_v22 }
 0x3f4   :  { %v2633_v2 = vmax.f32 %v2301_v58, 0.0  ;;  %2004 = vmatmul.bf16.gmra.mxu1 %v6040_v41  ;;  %2173 = vmatmul.bf16.gmra.mxu2 %v6020_v22 }
 0x3f5   :  { %2342 = vmatmul.bf16.gmra.mxu3 %v6040_v41  ;;  %v2634_v57 = vmax.f32 %v1966_v26, 0.0 }
 0x3f6   :  { %v6455_v1 = vpack.c.bf16 %v2633_v2, %v2631_v12 }
 0x3f7   :  { %v2134_v60 = vpop.f32.mrf.mxu2 }
 0x3f8   :  { %v2135_v7 = vadd.f32 %v2134_v60, %v6080_v33  ;;  %v2303_v37 = vpop.f32.mrf.mxu3  ;;  %v1798_v24 = vpop.f32.mrf.mxu0 }
 0x3f9   :  { %v1799_v8 = vadd.f32 %v1798_v24, %v6071_v36  ;;  %v1967_v56 = vpop.f32.mrf.mxu1 }
 0x3fa   :  { %v2304_v3 = vadd.f32 %v2303_v37, %v2135_v7 }
 0x3fb   :  { %v1968_v18 = vadd.f32 %v1967_v56, %v1799_v8 }
 0x3fc   :  { %v2635_v60 = vmax.f32 %v2304_v3, 0.0 }
 0x3fd   :  { %v2636_v54 = vmax.f32 %v1968_v18, 0.0 }
 0x3ff   :  { %v2136_v20 = vpop.f32.mrf.mxu2  ;;  %v6459_v4 = vpack.c.bf16 %v2636_v54, %v2634_v57 }
 0x400   :  { %v2137_v22 = vadd.f32 %v2136_v20, %v6080_v33  ;;  %v2305_v41 = vpop.f32.mrf.mxu3  ;;  %v1801_v38 = vpop.f32.mrf.mxu0 }
 0x401   :  { %v1802_v15 = vadd.f32 %v1801_v38, %v6071_v36  ;;  %v1970_v58 = vpop.f32.mrf.mxu1 }
 0x402   :  { %v2306_v12 = vadd.f32 %v2305_v41, %v2137_v22 }
 0x403   :  { %v1971_v2 = vadd.f32 %v1970_v58, %v1802_v15  ;;  %1840 = vmatmul.bf16.gmra.mxu0 %v6053_v10 }
 0x404   :  { %v2637_v24 = vmax.f32 %v2306_v12, 0.0  ;;  %2009 = vmatmul.bf16.gmra.mxu1 %v6064_v30  ;;  %2178 = vmatmul.bf16.gmra.mxu2 %v6053_v10 }
 0x405   :  { %2347 = vmatmul.bf16.gmra.mxu3 %v6064_v30  ;;  %v2638_v3 = vmax.f32 %v1971_v2, 0.0 }
 0x406   :  { %v6467_v26 = vpack.c.bf16 %v2637_v24, %v2635_v60 }
 0x407   :  { %v2139_v7 = vpop.f32.mrf.mxu2 }
 0x408   :  { %v2140_v37 = vadd.f32 %v2139_v7, %v6080_v33  ;;  %v2308_v8 = vpop.f32.mrf.mxu3  ;;  %v1803_v56 = vpop.f32.mrf.mxu0 }
 0x409   :  { %v1804_v18 = vadd.f32 %v1803_v56, %v6071_v36  ;;  %v1972_v57 = vpop.f32.mrf.mxu1 }
 0x40a   :  { %v2309_v54 = vadd.f32 %v2308_v8, %v2140_v37 }
 0x40b   :  { %v1973_v20 = vadd.f32 %v1972_v57, %v1804_v18 }
 0x40c   :  { %v2639_v7 = vmax.f32 %v2309_v54, 0.0 }
 0x40d   :  { %v2640_v22 = vmax.f32 %v1973_v20, 0.0 }
 0x40f   :  { %v2141_v41 = vpop.f32.mrf.mxu2  ;;  %v6471_v38 = vpack.c.bf16 %v2640_v22, %v2638_v3 }
 0x410   :  { %v2142_v10 = vadd.f32 %v2141_v41, %v6080_v33  ;;  %v2310_v30 = vpop.f32.mrf.mxu3  ;;  %v1806_v15 = vpop.f32.mrf.mxu0 }
 0x411   :  { %v1807_v58 = vadd.f32 %v1806_v15, %v6071_v36  ;;  %v1975_v12 = vpop.f32.mrf.mxu1 }
 0x412   :  { %v2311_v60 = vadd.f32 %v2310_v30, %v2142_v10 }
 0x413   :  { %v1976_v24 = vadd.f32 %v1975_v12, %v1807_v58  ;;  %1845 = vmatmul.bf16.gmra.mxu0 %v6073_v62 }
 0x414   :  { %v2641_v56 = vmax.f32 %v2311_v60, 0.0  ;;  %2014 = vmatmul.bf16.gmra.mxu1 %v6083_v0  ;;  %2183 = vmatmul.bf16.gmra.mxu2 %v6073_v62 }
 0x415   :  { %2352 = vmatmul.bf16.gmra.mxu3 %v6083_v0  ;;  %v2642_v54 = vmax.f32 %v1976_v24, 0.0 }
 0x416   :  { %v6479_v2 = vpack.c.bf16 %v2641_v56, %v2639_v7 }
 0x417   :  { %v2144_v37 = vpop.f32.mrf.mxu2 }
 0x418   :  { %v2145_v8 = vadd.f32 %v2144_v37, %v6080_v33  ;;  %v2313_v18 = vpop.f32.mrf.mxu3  ;;  %v1808_v57 = vpop.f32.mrf.mxu0 }
 0x419   :  { %v1809_v20 = vadd.f32 %v1808_v57, %v6071_v36  ;;  %v1977_v3 = vpop.f32.mrf.mxu1 }
 0x41a   :  { %v2314_v22 = vadd.f32 %v2313_v18, %v2145_v8 }
 0x41b   :  { %v1978_v41 = vadd.f32 %v1977_v3, %v1809_v20 }
 0x41c   :  { %v2643_v37 = vmax.f32 %v2314_v22, 0.0 }
 0x41d   :  { %v2644_v10 = vmax.f32 %v1978_v41, 0.0 }
 0x41f   :  { %v2146_v30 = vpop.f32.mrf.mxu2  ;;  %v6483_v15 = vpack.c.bf16 %v2644_v10, %v2642_v54 }
 0x420   :  { %v2147_v62 = vadd.f32 %v2146_v30, %v6080_v33  ;;  %v2315_v0 = vpop.f32.mrf.mxu3  ;;  %v1811_v58 = vpop.f32.mrf.mxu0 }
 0x421   :  { %v1812_v12 = vadd.f32 %v1811_v58, %v6071_v36  ;;  %v1980_v60 = vpop.f32.mrf.mxu1 }
 0x422   :  { %v2316_v7 = vadd.f32 %v2315_v0, %v2147_v62 }
 0x423   :  { %v1981_v56 = vadd.f32 %v1980_v60, %v1812_v12  ;;  %2948 = vmatmul.bf16.vlgmr.msra.gmra.mxu0 %v6087_v28 }
 0x424   :  { %v2645_v57 = vmax.f32 %v2316_v7, 0.0  ;;  %3117 = vmatmul.bf16.vlgmr.msra.gmra.mxu1 %v6095_v9  ;;  %3286 = vmatmul.bf16.vlgmr.msra.gmra.mxu2 %v6087_v28 }
 0x425   :  { %3455 = vmatmul.bf16.vlgmr.msra.gmra.mxu3 %v6095_v9  ;;  %v2646_v22 = vmax.f32 %v1981_v56, 0.0 }
 0x426   :  { %v6491_v24 = vpack.c.bf16 %v2645_v57, %v2643_v37 }
 0x427   :  { %v2149_v8 = vpop.f32.mrf.mxu2 }
 0x428   :  { %v2150_v18 = vadd.f32 %v2149_v8, %v6080_v33  ;;  %v2318_v20 = vpop.f32.mrf.mxu3  ;;  %v1813_v3 = vpop.f32.mrf.mxu0 }
 0x429   :  { %v1814_v41 = vadd.f32 %v1813_v3, %v6071_v36  ;;  %v1982_v54 = vpop.f32.mrf.mxu1 }
 0x42a   :  { %v2319_v10 = vadd.f32 %v2318_v20, %v2150_v18 }
 0x42b   :  { %v1983_v30 = vadd.f32 %v1982_v54, %v1814_v41 }
 0x42c   :  { %v2647_v8 = vmax.f32 %v2319_v10, 0.0 }
 0x42d   :  { %v2648_v62 = vmax.f32 %v1983_v30, 0.0 }
 0x42f   :  { %v2151_v0 = vpop.f32.mrf.mxu2  ;;  %v6495_v58 = vpack.c.bf16 %v2648_v62, %v2646_v22 }
 0x430   :  { %v2152_v28 = vadd.f32 %v2151_v0, %v6080_v33  ;;  %v2320_v9 = vpop.f32.mrf.mxu3  ;;  %v1816_v12 = vpop.f32.mrf.mxu0 }
 0x431   :  { %v1817_v60 = vadd.f32 %v1816_v12, %v6071_v36  ;;  %v1985_v7 = vpop.f32.mrf.mxu1 }
 0x432   :  { %v2321_v37 = vadd.f32 %v2320_v9, %v2152_v28 }
 0x433   :  { %v1986_v57 = vadd.f32 %v1985_v7, %v1817_v60  ;;  %2953 = vmatmul.bf16.gmra.mxu0 %v6099_v50 }
 0x434   :  { %v2649_v3 = vmax.f32 %v2321_v37, 0.0  ;;  %3122 = vmatmul.bf16.gmra.mxu1 %v6119_v19  ;;  %3291 = vmatmul.bf16.gmra.mxu2 %v6099_v50 }
 0x435   :  { %3460 = vmatmul.bf16.gmra.mxu3 %v6119_v19  ;;  %v2650_v10 = vmax.f32 %v1986_v57, 0.0 }
 0x436   :  { %v6503_v56 = vpack.c.bf16 %v2649_v3, %v2647_v8 }
 0x437   :  { %v2154_v18 = vpop.f32.mrf.mxu2 }
 0x438   :  { %v2155_v20 = vadd.f32 %v2154_v18, %v6080_v33  ;;  %v2323_v41 = vpop.f32.mrf.mxu3  ;;  %v1818_v54 = vpop.f32.mrf.mxu0 }
 0x439   :  { %v1819_v30 = vadd.f32 %v1818_v54, %v6071_v36  ;;  %v1987_v22 = vpop.f32.mrf.mxu1 }
 0x43a   :  { %v2324_v62 = vadd.f32 %v2323_v41, %v2155_v20 }
 0x43b   :  { %v1988_v0 = vadd.f32 %v1987_v22, %v1819_v30 }
 0x43c   :  { %v2651_v18 = vmax.f32 %v2324_v62, 0.0 }
 0x43d   :  { %v2652_v28 = vmax.f32 %v1988_v0, 0.0 }
 0x43f   :  { %v2156_v9 = vpop.f32.mrf.mxu2  ;;  %v6507_v12 = vpack.c.bf16 %v2652_v28, %v2650_v10 }
 0x440   :  { %v2157_v50 = vadd.f32 %v2156_v9, %v6080_v33  ;;  %v2325_v19 = vpop.f32.mrf.mxu3  ;;  %v1821_v60 = vpop.f32.mrf.mxu0 }
 0x441   :  { %v1822_v7 = vadd.f32 %v1821_v60, %v6071_v36  ;;  %v1990_v37 = vpop.f32.mrf.mxu1 }
 0x442   :  { %v2326_v8 = vadd.f32 %v2325_v19, %v2157_v50 }
 0x443   :  { %v1991_v3 = vadd.f32 %v1990_v37, %v1822_v7  ;;  %2958 = vmatmul.bf16.gmra.mxu0 %v6135_v11 }
 0x444   :  { %v2653_v54 = vmax.f32 %v2326_v8, 0.0  ;;  %3127 = vmatmul.bf16.gmra.mxu1 %v6143_v27  ;;  %3296 = vmatmul.bf16.gmra.mxu2 %v6135_v11 }
 0x445   :  { %3465 = vmatmul.bf16.gmra.mxu3 %v6143_v27  ;;  %v2654_v62 = vmax.f32 %v1991_v3, 0.0 }
 0x446   :  { %v6515_v57 = vpack.c.bf16 %v2653_v54, %v2651_v18 }
 0x447   :  { %v2159_v20 = vpop.f32.mrf.mxu2 }
 0x448   :  { %v2160_v41 = vadd.f32 %v2159_v20, %v6080_v33  ;;  %v2328_v30 = vpop.f32.mrf.mxu3  ;;  %v1823_v22 = vpop.f32.mrf.mxu0 }
 0x449   :  { %v1824_v0 = vadd.f32 %v1823_v22, %v6071_v36  ;;  %v1992_v10 = vpop.f32.mrf.mxu1 }
 0x44a   :  { %v2329_v28 = vadd.f32 %v2328_v30, %v2160_v41 }
 0x44b   :  { %v1993_v9 = vadd.f32 %v1992_v10, %v1824_v0 }
 0x44c   :  { %v2655_v20 = vmax.f32 %v2329_v28, 0.0 }
 0x44d   :  { %v2656_v50 = vmax.f32 %v1993_v9, 0.0 }
 0x44f   :  { %v2161_v19 = vpop.f32.mrf.mxu2  ;;  %v6519_v60 = vpack.c.bf16 %v2656_v50, %v2654_v62 }
 0x450   :  { %v2162_v11 = vadd.f32 %v2161_v19, %v6080_v33  ;;  %v2330_v27 = vpop.f32.mrf.mxu3  ;;  %v1826_v7 = vpop.f32.mrf.mxu0 }
 0x451   :  { %v1827_v37 = vadd.f32 %v1826_v7, %v6071_v36  ;;  %v1995_v8 = vpop.f32.mrf.mxu1 }
 0x452   :  { %v2331_v18 = vadd.f32 %v2330_v27, %v2162_v11 }
 0x453   :  { %v1996_v54 = vadd.f32 %v1995_v8, %v1827_v37  ;;  %2963 = vmatmul.bf16.gmra.mxu0 %v6147_v35 }
 0x454   :  { %v2657_v22 = vmax.f32 %v2331_v18, 0.0  ;;  %3132 = vmatmul.bf16.gmra.mxu1 %v6155_v45  ;;  %3301 = vmatmul.bf16.gmra.mxu2 %v6147_v35 }
 0x455   :  { %3470 = vmatmul.bf16.gmra.mxu3 %v6155_v45  ;;  %v2658_v28 = vmax.f32 %v1996_v54, 0.0 }
 0x456   :  { %v6527_v3 = vpack.c.bf16 %v2657_v22, %v2655_v20 }
 0x457   :  { %v2164_v41 = vpop.f32.mrf.mxu2 }
 0x458   :  { %v2165_v30 = vadd.f32 %v2164_v41, %v6080_v33  ;;  %v2333_v0 = vpop.f32.mrf.mxu3  ;;  %v1828_v10 = vpop.f32.mrf.mxu0 }
 0x459   :  { %v1829_v9 = vadd.f32 %v1828_v10, %v6071_v36  ;;  %v1997_v62 = vpop.f32.mrf.mxu1 }
 0x45a   :  { %v2334_v50 = vadd.f32 %v2333_v0, %v2165_v30 }
 0x45b   :  { %v1998_v19 = vadd.f32 %v1997_v62, %v1829_v9 }
 0x45c   :  { %v2659_v41 = vmax.f32 %v2334_v50, 0.0 }
 0x45d   :  { %v2660_v11 = vmax.f32 %v1998_v19, 0.0 }
 0x45f   :  { %v2166_v27 = vpop.f32.mrf.mxu2  ;;  %v6531_v7 = vpack.c.bf16 %v2660_v11, %v2658_v28 }
 0x460   :  { %v2167_v35 = vadd.f32 %v2166_v27, %v6080_v33  ;;  %v2335_v45 = vpop.f32.mrf.mxu3  ;;  %v1831_v37 = vpop.f32.mrf.mxu0 }
 0x461   :  { %v1832_v8 = vadd.f32 %v1831_v37, %v6071_v36  ;;  %v2000_v18 = vpop.f32.mrf.mxu1 }
 0x462   :  { %v2336_v20 = vadd.f32 %v2335_v45, %v2167_v35 }
 0x463   :  { %v2001_v22 = vadd.f32 %v2000_v18, %v1832_v8  ;;  %2968 = vmatmul.bf16.gmra.mxu0 %v6159_v63 }
 0x464   :  { %v2661_v10 = vmax.f32 %v2336_v20, 0.0  ;;  %3137 = vmatmul.bf16.gmra.mxu1 %v6167_v39  ;;  %3306 = vmatmul.bf16.gmra.mxu2 %v6159_v63 }
 0x465   :  { %3475 = vmatmul.bf16.gmra.mxu3 %v6167_v39  ;;  %v2662_v50 = vmax.f32 %v2001_v22, 0.0 }
 0x466   :  { %v6539_v54 = vpack.c.bf16 %v2661_v10, %v2659_v41 }
 0x467   :  { %v2169_v30 = vpop.f32.mrf.mxu2 }
 0x468   :  { %v2170_v0 = vadd.f32 %v2169_v30, %v6080_v33  ;;  %v2338_v9 = vpop.f32.mrf.mxu3  ;;  %v1833_v62 = vpop.f32.mrf.mxu0 }
 0x469   :  { %v1834_v19 = vadd.f32 %v1833_v62, %v6071_v36  ;;  %v2002_v28 = vpop.f32.mrf.mxu1 }
 0x46a   :  { %v2339_v11 = vadd.f32 %v2338_v9, %v2170_v0 }
 0x46b   :  { %v2003_v27 = vadd.f32 %v2002_v28, %v1834_v19 }
 0x46c   :  { %v2663_v30 = vmax.f32 %v2339_v11, 0.0 }
 0x46d   :  { %v2664_v35 = vmax.f32 %v2003_v27, 0.0 }
 0x46f   :  { %v2171_v45 = vpop.f32.mrf.mxu2  ;;  %v6543_v37 = vpack.c.bf16 %v2664_v35, %v2662_v50 }
 0x470   :  { %v2172_v63 = vadd.f32 %v2171_v45, %v6080_v33  ;;  %v2340_v39 = vpop.f32.mrf.mxu3  ;;  %v1836_v8 = vpop.f32.mrf.mxu0 }
 0x471   :  { %v1837_v18 = vadd.f32 %v1836_v8, %v6071_v36  ;;  %v2005_v20 = vpop.f32.mrf.mxu1 }
 0x472   :  { %v2341_v41 = vadd.f32 %v2340_v39, %v2172_v63 }
 0x473   :  { %v2006_v10 = vadd.f32 %v2005_v20, %v1837_v18  ;;  %2973 = vmatmul.bf16.gmra.mxu0 %v6171_v43 }
 0x474   :  { %v2665_v62 = vmax.f32 %v2341_v41, 0.0  ;;  %3142 = vmatmul.bf16.gmra.mxu1 %v6191_v34  ;;  %3311 = vmatmul.bf16.gmra.mxu2 %v6171_v43 }
 0x475   :  { %3480 = vmatmul.bf16.gmra.mxu3 %v6191_v34  ;;  %v2666_v11 = vmax.f32 %v2006_v10, 0.0 }
 0x476   :  { %v6551_v22 = vpack.c.bf16 %v2665_v62, %v2663_v30 }
 0x477   :  { %v2174_v0 = vpop.f32.mrf.mxu2 }
 0x478   :  { %v2175_v9 = vadd.f32 %v2174_v0, %v6080_v33  ;;  %v2343_v19 = vpop.f32.mrf.mxu3  ;;  %v1838_v28 = vpop.f32.mrf.mxu0 }
 0x479   :  { %v1839_v27 = vadd.f32 %v1838_v28, %v6071_v36  ;;  %v2007_v50 = vpop.f32.mrf.mxu1 }
 0x47a   :  { %v2344_v35 = vadd.f32 %v2343_v19, %v2175_v9 }
 0x47b   :  { %v2008_v45 = vadd.f32 %v2007_v50, %v1839_v27 }
 0x47c   :  { %v2667_v0 = vmax.f32 %v2344_v35, 0.0 }
 0x47d   :  { %v2668_v63 = vmax.f32 %v2008_v45, 0.0 }
 0x47f   :  { %v2176_v39 = vpop.f32.mrf.mxu2  ;;  %v6555_v8 = vpack.c.bf16 %v2668_v63, %v2666_v11 }
 0x480   :  { %v2177_v43 = vadd.f32 %v2176_v39, %v6080_v33  ;;  %v2345_v34 = vpop.f32.mrf.mxu3  ;;  %v1841_v18 = vpop.f32.mrf.mxu0 }
 0x481   :  { %v1842_v20 = vadd.f32 %v1841_v18, %v6071_v36  ;;  %v2010_v41 = vpop.f32.mrf.mxu1 }
 0x482   :  { %v2346_v30 = vadd.f32 %v2345_v34, %v2177_v43 }
 0x483   :  { %v2011_v62 = vadd.f32 %v2010_v41, %v1842_v20  ;;  %2978 = vmatmul.bf16.gmra.mxu0 %v6207_v25 }
 0x484   :  { %v2669_v28 = vmax.f32 %v2346_v30, 0.0  ;;  %3147 = vmatmul.bf16.gmra.mxu1 %v6215_v14  ;;  %3316 = vmatmul.bf16.gmra.mxu2 %v6207_v25 }
 0x485   :  { %3485 = vmatmul.bf16.gmra.mxu3 %v6215_v14  ;;  %v2670_v35 = vmax.f32 %v2011_v62, 0.0 }
 0x486   :  { %v6563_v10 = vpack.c.bf16 %v2669_v28, %v2667_v0 }
 0x487   :  { %v2179_v9 = vpop.f32.mrf.mxu2 }
 0x488   :  { %v2180_v19 = vadd.f32 %v2179_v9, %v6080_v33  ;;  %v2348_v27 = vpop.f32.mrf.mxu3  ;;  %v1843_v50 = vpop.f32.mrf.mxu0 }
 0x489   :  { %v1844_v45 = vadd.f32 %v1843_v50, %v6071_v36  ;;  %v2012_v11 = vpop.f32.mrf.mxu1 }
 0x48a   :  { %v2349_v63 = vadd.f32 %v2348_v27, %v2180_v19 }
 0x48b   :  { %v2013_v39 = vadd.f32 %v2012_v11, %v1844_v45 }
 0x48c   :  { %v2671_v9 = vmax.f32 %v2349_v63, 0.0  ;;  %v2774_v63 = vld [vmem:[%s7211_s6] sm:$0x3] }
 0x48d   :  { %v2672_v43 = vmax.f32 %v2013_v39, 0.0 }
 0x48f   :  { %v2181_v34 = vpop.f32.mrf.mxu2  ;;  %v6567_v18 = vpack.c.bf16 %v2672_v43, %v2670_v35 }
 0x490   :  { %v2182_v25 = vadd.f32 %v2181_v34, %v6080_v33  ;;  %v2350_v14 = vpop.f32.mrf.mxu3  ;;  %v1846_v20 = vpop.f32.mrf.mxu0 }
 0x491   :  { %v1847_v41 = vadd.f32 %v1846_v20, %v6071_v36  ;;  %v2015_v30 = vpop.f32.mrf.mxu1 }
 0x492   :  { %v2351_v0 = vadd.f32 %v2350_v14, %v2182_v25  ;;  %v6582_v14 = vperm.slane %v2774_v63, 0 }
 0x493   :  { %v2016_v28 = vadd.f32 %v2015_v30, %v1847_v41  ;;  %2983 = vmatmul.bf16.gmra.mxu0 %v6219_v47 }
 0x494   :  { %v2673_v50 = vmax.f32 %v2351_v0, 0.0  ;;  %3152 = vmatmul.bf16.gmra.mxu1 %v6227_v49  ;;  %3321 = vmatmul.bf16.gmra.mxu2 %v6219_v47 }
 0x495   :  { %3490 = vmatmul.bf16.gmra.mxu3 %v6227_v49  ;;  %v2674_v25 = vmax.f32 %v2016_v28, 0.0  ;;  %v6591_v28 = vperm.slane %v2774_v63, 1 }
 0x496   :  { %v6575_v62 = vpack.c.bf16 %v2673_v50, %v2671_v9 }
 0x497   :  { %v2184_v19 = vpop.f32.mrf.mxu2 }
 0x498   :  { %v2185_v27 = vadd.f32 %v2184_v19, %v6080_v33  ;;  %v2353_v45 = vpop.f32.mrf.mxu3  ;;  %v1848_v11 = vpop.f32.mrf.mxu0 }
 0x499   :  { %v1849_v39 = vadd.f32 %v1848_v11, %v6071_v36  ;;  %v2017_v35 = vpop.f32.mrf.mxu1 }
 0x49a   :  { %v2354_v43 = vadd.f32 %v2353_v45, %v2185_v27 }
 0x49b   :  { %v2018_v34 = vadd.f32 %v2017_v35, %v1849_v39 }
 0x49c   :  { %v2675_v19 = vmax.f32 %v2354_v43, 0.0 }
 0x49d   :  { %v2676_v47 = vmax.f32 %v2018_v34, 0.0 }
 0x49f   :  { %v2186_v49 = vpop.f32.mrf.mxu2  ;;  %v6584_v20 = vpack.c.bf16 %v2676_v47, %v2674_v25 }
 0x4a0   :  { %v2187_v41 = vadd.f32 %v2186_v49, %v6080_v33  ;;  %v2355_v30 = vpop.f32.mrf.mxu3  ;;  %v2949_v0 = vpop.f32.mrf.mxu0  ;;  %v3744_v33 = vld [vmem:[%s7212_s7] sm:$0x3] }
 0x4a1   :  { %7243 = vst [vmem:[#allocation10_spill] sm:$0xff] %v6584_v20  ;;  %v3118_v9 = vpop.f32.mrf.mxu1  ;;  %v2950_v50 = vadd.f32 %v2949_v0, %v6582_v14  ;;  %v6600_v47 = vperm.slane %v3744_v33, 0 }
 0x4a2   :  { %v2356_v36 = vadd.f32 %v2355_v30, %v2187_v41 }
 0x4a3   :  { %2988 = vmatmul.bf16.gmra.mxu0 %v6231_v23  ;;  %v3119_v45 = vadd.f32 %v3118_v9, %v2950_v50 }
 0x4a4   :  { %v2677_v27 = vmax.f32 %v2356_v36, 0.0  ;;  %3157 = vmatmul.bf16.gmra.mxu1 %v6239_v55  ;;  %3326 = vmatmul.bf16.gmra.mxu2 %v6231_v23 }
 0x4a5   :  { %3495 = vmatmul.bf16.gmra.mxu3 %v6239_v55  ;;  %v3616_v23 = vmax.f32 %v3119_v45, 0.0  ;;  %v6603_v55 = vperm.slane %v3744_v33, 1 }
 0x4a6   :  { %v6597_v11 = vpack.c.bf16 %v2677_v27, %v2675_v19 }
 0x4a7   :  { %v3287_v39 = vpop.f32.mrf.mxu2  ;;  %v3750_v0 = vmul.f32 %v6600_v47, %v3616_v23 }
 0x4a8   :  { %7244 = vst [vmem:[#allocation11_spill] sm:$0xff] %v6597_v11  ;;  %v3288_v35 = vadd.f32 %v3287_v39, %v6591_v28  ;;  %v3456_v43 = vpop.f32.mrf.mxu3  ;;  %v2951_v34 = vpop.f32.mrf.mxu0 }
 0x4a9   :  { %v3120_v25 = vpop.f32.mrf.mxu1  ;;  %v2952_v49 = vadd.f32 %v2951_v34, %v6582_v14 }
 0x4aa   :  { %v3457_v63 = vadd.f32 %v3456_v43, %v3288_v35 }
 0x4ab   :  { %v3121_v30 = vadd.f32 %v3120_v25, %v2952_v49 }
 0x4ac   :  { %v3617_v41 = vmax.f32 %v3457_v63, 0.0 }
 0x4ad   :  { %v3618_v20 = vmax.f32 %v3121_v30, 0.0 }
 0x4ae   :  { %v3751_v9 = vmul.f32 %v6603_v55, %v3617_v41 }
 0x4af   :  { %v3289_v36 = vpop.f32.mrf.mxu2  ;;  %v3752_v34 = vmul.f32 %v6600_v47, %v3618_v20 }
 0x4b0   :  { %v3290_v50 = vadd.f32 %v3289_v36, %v6591_v28  ;;  %v3458_v19 = vpop.f32.mrf.mxu3  ;;  %v2954_v27 = vpop.f32.mrf.mxu0  ;;  %v3878_v39 = vadd.f32 %v3751_v9, %v3750_v0 }
 0x4b1   :  { %v3123_v11 = vpop.f32.mrf.mxu1  ;;  %v2955_v35 = vadd.f32 %v2954_v27, %v6582_v14 }
 0x4b2   :  { %v3459_v45 = vadd.f32 %v3458_v19, %v3290_v50  ;;  %3879 = vadd.xlane.f32.xlu0 %v3878_v39 }
 0x4b3   :  { %2993 = vmatmul.bf16.gmra.mxu0 %v6243_v17  ;;  %v3124_v43 = vadd.f32 %v3123_v11, %v2955_v35 }
 0x4b4   :  { %v3619_v33 = vmax.f32 %v3459_v45, 0.0  ;;  %3162 = vmatmul.bf16.gmra.mxu1 %v6263_v44  ;;  %3331 = vmatmul.bf16.gmra.mxu2 %v6243_v17 }
 0x4b5   :  { %3500 = vmatmul.bf16.gmra.mxu3 %v6263_v44  ;;  %v3620_v9 = vmax.f32 %v3124_v43, 0.0 }
 0x4b6   :  { %v3753_v25 = vmul.f32 %v6603_v55, %v3619_v33 }
 0x4b7   :  { %v3292_v23 = vpop.f32.mrf.mxu2  ;;  %v3754_v44 = vmul.f32 %v6600_v47, %v3620_v9 }
 0x4b8   :  { %v3293_v63 = vadd.f32 %v3292_v23, %v6591_v28  ;;  %v3461_v49 = vpop.f32.mrf.mxu3  ;;  %v2956_v41 = vpop.f32.mrf.mxu0  ;;  %v3881_v30 = vadd.f32 %v3753_v25, %v3752_v34 }
 0x4b9   :  { %v3125_v0 = vpop.f32.mrf.mxu1  ;;  %v2957_v50 = vadd.f32 %v2956_v41, %v6582_v14 }
 0x4ba   :  { %v3462_v36 = vadd.f32 %v3461_v49, %v3293_v63  ;;  %3882 = vadd.xlane.f32.xlu0 %v3881_v30  ;;  %v7245_v63 = vld [vmem:[#allocation6_spill] sm:$0xff] }
 0x4bb   :  { %v3126_v19 = vadd.f32 %v3125_v0, %v2957_v50 }
 0x4bc   :  { %v3621_v17 = vmax.f32 %v3462_v36, 0.0 }
 0x4bd   :  { %v3622_v34 = vmax.f32 %v3126_v19, 0.0 }
 0x4be   :  { %v3755_v20 = vmul.f32 %v6603_v55, %v3621_v17 }
 0x4bf   :  { %v3294_v11 = vpop.f32.mrf.mxu2  ;;  %v3756_v41 = vmul.f32 %v6600_v47, %v3622_v34 }
 0x4c0   :  { %v3295_v27 = vadd.f32 %v3294_v11, %v6591_v28  ;;  %v3463_v39 = vpop.f32.mrf.mxu3  ;;  %v2959_v45 = vpop.f32.mrf.mxu0  ;;  %v3884_v35 = vadd.f32 %v3755_v20, %v3754_v44 }
 0x4c1   :  { %v3128_v33 = vpop.f32.mrf.mxu1  ;;  %v2960_v43 = vadd.f32 %v2959_v45, %v6582_v14 }
 0x4c2   :  { %v3464_v25 = vadd.f32 %v3463_v39, %v3295_v27  ;;  %3885 = vadd.xlane.f32.xlu1 %v3884_v35 }
 0x4c3   :  { %2998 = vmatmul.bf16.gmra.mxu0 %v6279_v29  ;;  %v3129_v49 = vadd.f32 %v3128_v33, %v2960_v43 }
 0x4c4   :  { %v3623_v23 = vmax.f32 %v3464_v25, 0.0  ;;  %3167 = vmatmul.bf16.gmra.mxu1 %v7245_v63  ;;  %3336 = vmatmul.bf16.gmra.mxu2 %v6279_v29 }
 0x4c5   :  { %3505 = vmatmul.bf16.gmra.mxu3 %v7245_v63  ;;  %v3624_v44 = vmax.f32 %v3129_v49, 0.0 }
 0x4c6   :  { %v3757_v30 = vmul.f32 %v6603_v55, %v3623_v23 }
 0x4c7   :  { %v3297_v0 = vpop.f32.mrf.mxu2  ;;  %v3758_v39 = vmul.f32 %v6600_v47, %v3624_v44 }
 0x4c8   :  { %v3298_v9 = vadd.f32 %v3297_v0, %v6591_v28  ;;  %v3466_v36 = vpop.f32.mrf.mxu3  ;;  %v2961_v50 = vpop.f32.mrf.mxu0  ;;  %v3887_v17 = vadd.f32 %v3757_v30, %v3756_v41  ;;  %v7246_v30 = vld [vmem:[#allocation7_spill] sm:$0xff] }
 0x4c9   :  { %v3130_v19 = vpop.f32.mrf.mxu1  ;;  %v2962_v11 = vadd.f32 %v2961_v50, %v6582_v14 }
 0x4ca   :  { %v3467_v20 = vadd.f32 %v3466_v36, %v3298_v9  ;;  %3888 = vadd.xlane.f32.xlu1 %v3887_v17  ;;  %v7247_v9 = vld [vmem:[#allocation8_spill] sm:$0xff] }
 0x4cb   :  { %v3131_v27 = vadd.f32 %v3130_v19, %v2962_v11 }
 0x4cc   :  { %v3625_v29 = vmax.f32 %v3467_v20, 0.0 }
 0x4cd   :  { %v3626_v63 = vmax.f32 %v3131_v27, 0.0 }
 0x4ce   :  { %v3759_v45 = vmul.f32 %v6603_v55, %v3625_v29 }
 0x4cf   :  { %v3299_v35 = vpop.f32.mrf.mxu2  ;;  %v3760_v50 = vmul.f32 %v6600_v47, %v3626_v63 }
 0x4d0   :  { %v3300_v33 = vadd.f32 %v3299_v35, %v6591_v28  ;;  %v3468_v34 = vpop.f32.mrf.mxu3  ;;  %v2964_v25 = vpop.f32.mrf.mxu0  ;;  %v3890_v43 = vadd.f32 %v3759_v45, %v3758_v39 }
 0x4d1   :  { %v3133_v23 = vpop.f32.mrf.mxu1  ;;  %v2965_v49 = vadd.f32 %v2964_v25, %v6582_v14 }
 0x4d2   :  { %v3469_v41 = vadd.f32 %v3468_v34, %v3300_v33  ;;  %3891 = vadd.xlane.f32.xlu2 %v3890_v43 }
 0x4d3   :  { %3003 = vmatmul.bf16.gmra.mxu0 %v7246_v30  ;;  %v3134_v36 = vadd.f32 %v3133_v23, %v2965_v49 }
 0x4d4   :  { %v3627_v0 = vmax.f32 %v3469_v41, 0.0  ;;  %3172 = vmatmul.bf16.gmra.mxu1 %v7247_v9  ;;  %3341 = vmatmul.bf16.gmra.mxu2 %v7246_v30 }
 0x4d5   :  { %3510 = vmatmul.bf16.gmra.mxu3 %v7247_v9  ;;  %v3628_v39 = vmax.f32 %v3134_v36, 0.0 }
 0x4d6   :  { %v3761_v17 = vmul.f32 %v6603_v55, %v3627_v0 }
 0x4d7   :  { %v3302_v19 = vpop.f32.mrf.mxu2  ;;  %v3762_v34 = vmul.f32 %v6600_v47, %v3628_v39 }
 0x4d8   :  { %v3303_v44 = vadd.f32 %v3302_v19, %v6591_v28  ;;  %v3471_v20 = vpop.f32.mrf.mxu3  ;;  %v2966_v11 = vpop.f32.mrf.mxu0  ;;  %v3893_v29 = vadd.f32 %v3761_v17, %v3760_v50  ;;  %v7248_v19 = vld [vmem:[#allocation9_spill] sm:$0xff] }
 0x4d9   :  { %v3135_v27 = vpop.f32.mrf.mxu1  ;;  %v2967_v35 = vadd.f32 %v2966_v11, %v6582_v14 }
 0x4da   :  { %v3472_v45 = vadd.f32 %v3471_v20, %v3303_v44  ;;  %3894 = vadd.xlane.f32.xlu2 %v3893_v29 }
 0x4db   :  { %v3136_v43 = vadd.f32 %v3135_v27, %v2967_v35 }
 0x4dc   :  { %v3629_v33 = vmax.f32 %v3472_v45, 0.0 }
 0x4dd   :  { %v3630_v9 = vmax.f32 %v3136_v43, 0.0 }
 0x4de   :  { %v3763_v25 = vmul.f32 %v6603_v55, %v3629_v33 }
 0x4df   :  { %v3304_v23 = vpop.f32.mrf.mxu2  ;;  %v3764_v20 = vmul.f32 %v6600_v47, %v3630_v9 }
 0x4e0   :  { %v3305_v63 = vadd.f32 %v3304_v23, %v6591_v28  ;;  %v3473_v41 = vpop.f32.mrf.mxu3  ;;  %v2969_v49 = vpop.f32.mrf.mxu0  ;;  %v3896_v30 = vadd.f32 %v3763_v25, %v3762_v34 }
 0x4e1   :  { %v3138_v0 = vpop.f32.mrf.mxu1  ;;  %v2970_v36 = vadd.f32 %v2969_v49, %v6582_v14 }
 0x4e2   :  { %v3474_v50 = vadd.f32 %v3473_v41, %v3305_v63  ;;  %3897 = vadd.xlane.f32.xlu0 %v3896_v30 }
 0x4e3   :  { %3008 = vmatmul.bf16.gmra.mxu0 %v6303_v13  ;;  %v3139_v44 = vadd.f32 %v3138_v0, %v2970_v36 }
 0x4e4   :  { %v3631_v17 = vmax.f32 %v3474_v50, 0.0  ;;  %3177 = vmatmul.bf16.gmra.mxu1 %v7248_v19  ;;  %3346 = vmatmul.bf16.gmra.mxu2 %v6303_v13 }
 0x4e5   :  { %3515 = vmatmul.bf16.gmra.mxu3 %v7248_v19  ;;  %v3632_v34 = vmax.f32 %v3139_v44, 0.0 }
 0x4e6   :  { %v3765_v11 = vmul.f32 %v6603_v55, %v3631_v17 }
 0x4e7   :  { %v3307_v29 = vpop.f32.mrf.mxu2  ;;  %v3766_v23 = vmul.f32 %v6600_v47, %v3632_v34 }
 0x4e8   :  { %v3308_v27 = vadd.f32 %v3307_v29, %v6591_v28  ;;  %v3476_v39 = vpop.f32.mrf.mxu3  ;;  %v2971_v45 = vpop.f32.mrf.mxu0  ;;  %v3899_v35 = vadd.f32 %v3765_v11, %v3764_v20 }
 0x4e9   :  { %v3140_v33 = vpop.f32.mrf.mxu1  ;;  %v2972_v43 = vadd.f32 %v2971_v45, %v6582_v14 }
 0x4ea   :  { %v3477_v25 = vadd.f32 %v3476_v39, %v3308_v27  ;;  %3900 = vadd.xlane.f32.xlu1 %v3899_v35 }
 0x4eb   :  { %v3141_v41 = vadd.f32 %v3140_v33, %v2972_v43 }
 0x4ec   :  { %v3633_v13 = vmax.f32 %v3477_v25, 0.0 }
 0x4ed   :  { %v3634_v17 = vmax.f32 %v3141_v41, 0.0 }
 0x4ee   :  { %v3767_v63 = vmul.f32 %v6603_v55, %v3633_v13 }
 0x4ef   :  { %v3309_v49 = vpop.f32.mrf.mxu2  ;;  %v3768_v29 = vmul.f32 %v6600_v47, %v3634_v17 }
 0x4f0   :  { %v3310_v30 = vadd.f32 %v3309_v49, %v6591_v28  ;;  %v3478_v0 = vpop.f32.mrf.mxu3  ;;  %v2974_v9 = vpop.f32.mrf.mxu0  ;;  %v3902_v50 = vadd.f32 %v3767_v63, %v3766_v23 }
 0x4f1   :  { %v3143_v36 = vpop.f32.mrf.mxu1  ;;  %v2975_v44 = vadd.f32 %v2974_v9, %v6582_v14 }
 0x4f2   :  { %v3479_v19 = vadd.f32 %v3478_v0, %v3310_v30  ;;  %3903 = vadd.xlane.f32.xlu2 %v3902_v50 }
 0x4f3   :  { %3013 = vmatmul.bf16.gmra.mxu0 %v6315_v40  ;;  %v3144_v11 = vadd.f32 %v3143_v36, %v2975_v44 }
 0x4f4   :  { %v3635_v20 = vmax.f32 %v3479_v19, 0.0  ;;  %3182 = vmatmul.bf16.gmra.mxu1 %v6335_v32  ;;  %3351 = vmatmul.bf16.gmra.mxu2 %v6315_v40 }
 0x4f5   :  { %3520 = vmatmul.bf16.gmra.mxu3 %v6335_v32  ;;  %v3636_v43 = vmax.f32 %v3144_v11, 0.0 }
 0x4f6   :  { %v3769_v27 = vmul.f32 %v6603_v55, %v3635_v20 }
 0x4f7   :  { %v3312_v39 = vpop.f32.mrf.mxu2  ;;  %v3770_v32 = vmul.f32 %v6600_v47, %v3636_v43 }
 0x4f8   :  { %v3313_v45 = vadd.f32 %v3312_v39, %v6591_v28  ;;  %v3481_v35 = vpop.f32.mrf.mxu3  ;;  %v2976_v33 = vpop.f32.mrf.mxu0  ;;  %v3905_v34 = vadd.f32 %v3769_v27, %v3768_v29 }
 0x4f9   :  { %v3145_v25 = vpop.f32.mrf.mxu1  ;;  %v2977_v23 = vadd.f32 %v2976_v33, %v6582_v14 }
 0x4fa   :  { %v3482_v13 = vadd.f32 %v3481_v35, %v3313_v45  ;;  %3906 = vadd.xlane.f32.xlu0 %v3905_v34 }
 0x4fb   :  { %v3146_v41 = vadd.f32 %v3145_v25, %v2977_v23 }
 0x4fc   :  { %v3637_v40 = vmax.f32 %v3482_v13, 0.0 }
 0x4fd   :  { %v3638_v17 = vmax.f32 %v3146_v41, 0.0 }
 0x4fe   :  { %v3771_v63 = vmul.f32 %v6603_v55, %v3637_v40 }
 0x4ff   :  { %v3314_v49 = vpop.f32.mrf.mxu2  ;;  %v3772_v29 = vmul.f32 %v6600_v47, %v3638_v17 }
 0x500   :  { %v3315_v30 = vadd.f32 %v3314_v49, %v6591_v28  ;;  %v3483_v0 = vpop.f32.mrf.mxu3  ;;  %v2979_v9 = vpop.f32.mrf.mxu0  ;;  %v3908_v50 = vadd.f32 %v3771_v63, %v3770_v32 }
 0x501   :  { %v3148_v36 = vpop.f32.mrf.mxu1  ;;  %v2980_v44 = vadd.f32 %v2979_v9, %v6582_v14 }
 0x502   :  { %v3484_v19 = vadd.f32 %v3483_v0, %v3315_v30  ;;  %3909 = vadd.xlane.f32.xlu1 %v3908_v50 }
 0x503   :  { %3018 = vmatmul.bf16.gmra.mxu0 %v6351_v53  ;;  %v3149_v11 = vadd.f32 %v3148_v36, %v2980_v44 }
 0x504   :  { %v3639_v20 = vmax.f32 %v3484_v19, 0.0  ;;  %3187 = vmatmul.bf16.gmra.mxu1 %v6359_v46  ;;  %3356 = vmatmul.bf16.gmra.mxu2 %v6351_v53 }
 0x505   :  { %3525 = vmatmul.bf16.gmra.mxu3 %v6359_v46  ;;  %v3640_v43 = vmax.f32 %v3149_v11, 0.0 }
 0x506   :  { %v3773_v27 = vmul.f32 %v6603_v55, %v3639_v20 }
 0x507   :  { %v3317_v39 = vpop.f32.mrf.mxu2  ;;  %v3774_v46 = vmul.f32 %v6600_v47, %v3640_v43 }
 0x508   :  { %v3318_v45 = vadd.f32 %v3317_v39, %v6591_v28  ;;  %v3486_v35 = vpop.f32.mrf.mxu3  ;;  %v2981_v33 = vpop.f32.mrf.mxu0  ;;  %v3911_v34 = vadd.f32 %v3773_v27, %v3772_v29 }
 0x509   :  { %v3150_v25 = vpop.f32.mrf.mxu1  ;;  %v2982_v23 = vadd.f32 %v2981_v33, %v6582_v14 }
 0x50a   :  { %v3487_v13 = vadd.f32 %v3486_v35, %v3318_v45  ;;  %3912 = vadd.xlane.f32.xlu2 %v3911_v34 }
 0x50b   :  { %v3151_v32 = vadd.f32 %v3150_v25, %v2982_v23 }
 0x50c   :  { %v3641_v53 = vmax.f32 %v3487_v13, 0.0 }
 0x50d   :  { %v3642_v50 = vmax.f32 %v3151_v32, 0.0 }
 0x50e   :  { %v3775_v40 = vmul.f32 %v6603_v55, %v3641_v53 }
 0x50f   :  { %v3319_v63 = vpop.f32.mrf.mxu2  ;;  %v3776_v20 = vmul.f32 %v6600_v47, %v3642_v50 }
 0x510   :  { %v3320_v41 = vadd.f32 %v3319_v63, %v6591_v28  ;;  %v3488_v49 = vpop.f32.mrf.mxu3  ;;  %v2984_v30 = vpop.f32.mrf.mxu0  ;;  %v3914_v0 = vadd.f32 %v3775_v40, %v3774_v46 }
 0x511   :  { %v3153_v9 = vpop.f32.mrf.mxu1  ;;  %v2985_v17 = vadd.f32 %v2984_v30, %v6582_v14 }
 0x512   :  { %v3489_v36 = vadd.f32 %v3488_v49, %v3320_v41  ;;  %3915 = vadd.xlane.f32.xlu0 %v3914_v0 }
 0x513   :  { %3023 = vmatmul.bf16.gmra.mxu0 %v6363_v6  ;;  %v3154_v44 = vadd.f32 %v3153_v9, %v2985_v17  ;;  %v4200_v17 = vlaneseq }
 0x514   :  { %v3643_v19 = vmax.f32 %v3489_v36, 0.0  ;;  %3192 = vmatmul.bf16.gmra.mxu1 %v6371_v51  ;;  %3361 = vmatmul.bf16.gmra.mxu2 %v6363_v6 }
 0x515   :  { %3530 = vmatmul.bf16.gmra.mxu3 %v6371_v51  ;;  %v3644_v34 = vmax.f32 %v3154_v44, 0.0 }
 0x516   :  { %v3777_v11 = vmul.f32 %v6603_v55, %v3643_v19 }
 0x517   :  { %v3322_v29 = vpop.f32.mrf.mxu2  ;;  %v3778_v51 = vmul.f32 %v6600_v47, %v3644_v34 }
 0x518   :  { %v3323_v27 = vadd.f32 %v3322_v29, %v6591_v28  ;;  %v3491_v39 = vpop.f32.mrf.mxu3  ;;  %v2986_v45 = vpop.f32.mrf.mxu0  ;;  %v3917_v35 = vadd.f32 %v3777_v11, %v3776_v20 }
 0x519   :  { %v3155_v33 = vpop.f32.mrf.mxu1  ;;  %v2987_v43 = vadd.f32 %v2986_v45, %v6582_v14  ;;  %v6703_v45 = vstv %s7213_s8  ;;  %s4887_s8 = smov [#allocation3]  }
 0x51a   :  { %v3492_v25 = vadd.f32 %v3491_v39, %v3323_v27  ;;  %3918 = vadd.xlane.f32.xlu1 %v3917_v35  ;;  %v6705_v35 = vand.u32 127, %v4200_v17  ;;  %s4369_s13 = sshll.u32 %s4887_s8, 4  ;;  %s4370_s13 = int_to_ptr.vmem [resolvable:$true] %s4369_s13 }
 0x51b   :  { %v3156_v23 = vadd.f32 %v3155_v33, %v2987_v43 }
 0x51c   :  { %v3645_v6 = vmax.f32 %v3492_v25, 0.0 }
 0x51d   :  { %v3646_v49 = vmax.f32 %v3156_v23, 0.0 }
 0x51e   :  { %v3779_v13 = vmul.f32 %v6603_v55, %v3645_v6  ;;  %v6710_v6 = vadd.s32 4294967288, %v6705_v35 }
 0x51f   :  { %v3324_v53 = vpop.f32.mrf.mxu2  ;;  %v3780_v19 = vmul.f32 %v6600_v47, %v3646_v49 }
 0x520   :  { %v3325_v46 = vadd.f32 %v3324_v53, %v6591_v28  ;;  %v3493_v40 = vpop.f32.mrf.mxu3  ;;  %v2989_v32 = vpop.f32.mrf.mxu0  ;;  %v3920_v63 = vadd.f32 %v3779_v13, %v3778_v51 }
 0x521   :  { %v3158_v41 = vpop.f32.mrf.mxu1  ;;  %v2990_v0 = vadd.f32 %v2989_v32, %v6582_v14 }
 0x522   :  { %v3494_v30 = vadd.f32 %v3493_v40, %v3325_v46  ;;  %3921 = vadd.xlane.f32.xlu2 %v3920_v63 }
 0x523   :  { %3028 = vmatmul.bf16.gmra.mxu0 %v6375_v21  ;;  %v3159_v36 = vadd.f32 %v3158_v41, %v2990_v0 }
 0x524   :  { %v3647_v9 = vmax.f32 %v3494_v30, 0.0  ;;  %3197 = vmatmul.bf16.gmra.mxu1 %v6383_v16  ;;  %3366 = vmatmul.bf16.gmra.mxu2 %v6375_v21 }
 0x525   :  { %3535 = vmatmul.bf16.gmra.mxu3 %v6383_v16  ;;  %v3880_v50 = vpop.xlane.xlu0 %3879  ;;  %v3648_v16 = vmax.f32 %v3159_v36, 0.0 }
 0x526   :  { %v3781_v44 = vmul.f32 %v6603_v55, %v3647_v9  ;;  %v4072_v25 = vadd.f32 %v6703_v45, %v3880_v50 }
 0x527   :  { %v3327_v20 = vpop.f32.mrf.mxu2  ;;  %v3782_v13 = vmul.f32 %v6600_v47, %v3648_v16 }
 0x528   :  { %v3328_v11 = vadd.f32 %v3327_v20, %v6591_v28  ;;  %v3496_v29 = vpop.f32.mrf.mxu3  ;;  %v2991_v27 = vpop.f32.mrf.mxu0  ;;  %v3923_v39 = vadd.f32 %v3781_v44, %v3780_v19  ;;  %v4202_v32 = vperm.slane %v4072_v25, %v6705_v35  ;;  %v6724_v20 = vadd.s32 4294967280, %v6705_v35 }
 0x529   :  { %v3160_v21 = vpop.f32.mrf.mxu1  ;;  %v2992_v34 = vadd.f32 %v2991_v27, %v6582_v14 }
 0x52a   :  { %v3497_v33 = vadd.f32 %v3496_v29, %v3328_v11  ;;  %3924 = vadd.xlane.f32.xlu0 %v3923_v39 }
 0x52b   :  { %v3161_v53 = vadd.f32 %v3160_v21, %v2992_v34 }
 0x52c   :  { %v3649_v43 = vmax.f32 %v3497_v33, 0.0 }
 0x52d   :  { %v3883_v51 = vpop.xlane.xlu0 %3882  ;;  %v3650_v50 = vmax.f32 %v3161_v53, 0.0 }
 0x52e   :  { %v3783_v23 = vmul.f32 %v6603_v55, %v3649_v43  ;;  %v4073_v46 = vadd.f32 %v6703_v45, %v3883_v51 }
 0x52f   :  { %v3329_v40 = vpop.f32.mrf.mxu2  ;;  %v3784_v39 = vmul.f32 %v6600_v47, %v3650_v50 }
 0x530   :  { %v4204_v63 = vperm.slane %v4073_v46, %v6710_v6  ;;  %v3330_v41 = vadd.f32 %v3329_v40, %v6591_v28  ;;  %v3498_v49 = vpop.f32.mrf.mxu3  ;;  %v2994_v30 = vpop.f32.mrf.mxu0  ;;  %v3926_v0 = vadd.f32 %v3783_v23, %v3782_v13  ;;  %v6735_v40 = vadd.s32 4294967272, %v6705_v35 }
 0x531   :  { %v3163_v9 = vpop.f32.mrf.mxu1  ;;  %v2995_v19 = vadd.f32 %v2994_v30, %v6582_v14 }
 0x532   :  { %v4206_v36 = vsel %vm4205_vm0, %v4204_v63, %v4202_v32  ;;  %v3499_v17 = vadd.f32 %v3498_v49, %v3330_v41  ;;  %3927 = vadd.xlane.f32.xlu1 %v3926_v0 }
 0x533   :  { %3033 = vmatmul.bf16.gmra.mxu0 %v6387_v61  ;;  %v3164_v29 = vadd.f32 %v3163_v9, %v2995_v19 }
 0x534   :  { %v3651_v44 = vmax.f32 %v3499_v17, 0.0  ;;  %3202 = vmatmul.bf16.gmra.mxu1 %v6407_v59  ;;  %3371 = vmatmul.bf16.gmra.mxu2 %v6387_v61 }
 0x535   :  { %3540 = vmatmul.bf16.gmra.mxu3 %v6407_v59  ;;  %v3886_v11 = vpop.xlane.xlu1 %3885  ;;  %v3652_v13 = vmax.f32 %v3164_v29, 0.0 }
 0x536   :  { %v4074_v27 = vadd.f32 %v6703_v45, %v3886_v11  ;;  %v3785_v21 = vmul.f32 %v6603_v55, %v3651_v44 }
 0x537   :  { %v3332_v16 = vpop.f32.mrf.mxu2  ;;  %v3786_v63 = vmul.f32 %v6600_v47, %v3652_v13 }
 0x538   :  { %v4208_v33 = vperm.slane %v4074_v27, %v6724_v20  ;;  %v3333_v34 = vadd.f32 %v3332_v16, %v6591_v28  ;;  %v3501_v61 = vpop.f32.mrf.mxu3  ;;  %v2996_v25 = vpop.f32.mrf.mxu0  ;;  %v3929_v43 = vadd.f32 %v3785_v21, %v3784_v39  ;;  %v6748_v16 = vadd.s32 4294967264, %v6705_v35 }
 0x539   :  { %v3165_v51 = vpop.f32.mrf.mxu1  ;;  %v2997_v53 = vadd.f32 %v2996_v25, %v6582_v14 }
 0x53a   :  { %v4210_v59 = vsel %vm4209_vm1, %v4208_v33, %v4206_v36  ;;  %v3502_v23 = vadd.f32 %v3501_v61, %v3333_v34  ;;  %3930 = vadd.xlane.f32.xlu2 %v3929_v43 }
 0x53b   :  { %v3166_v49 = vadd.f32 %v3165_v51, %v2997_v53 }
 0x53c   :  { %v3653_v46 = vmax.f32 %v3502_v23, 0.0 }
 0x53d   :  { %v3889_v32 = vpop.xlane.xlu1 %3888  ;;  %v3654_v11 = vmax.f32 %v3166_v49, 0.0 }
 0x53e   :  { %v3787_v41 = vmul.f32 %v6603_v55, %v3653_v46  ;;  %v4075_v30 = vadd.f32 %v6703_v45, %v3889_v32 }
 0x53f   :  { %v3334_v0 = vpop.f32.mrf.mxu2  ;;  %v3788_v25 = vmul.f32 %v6600_v47, %v3654_v11 }
 0x540   :  { %v4212_v9 = vperm.slane %v4075_v30, %v6735_v40  ;;  %v3335_v50 = vadd.f32 %v3334_v0, %v6591_v28  ;;  %v3503_v36 = vpop.f32.mrf.mxu3  ;;  %v2999_v17 = vpop.f32.mrf.mxu0  ;;  %v3932_v19 = vadd.f32 %v3787_v41, %v3786_v63  ;;  %v6759_v30 = vadd.s32 4294967256, %v6705_v35 }
 0x541   :  { %v3168_v44 = vpop.f32.mrf.mxu1  ;;  %v3000_v39 = vadd.f32 %v2999_v17, %v6582_v14 }
 0x542   :  { %v4214_v29 = vsel %vm4213_vm2, %v4212_v9, %v4210_v59  ;;  %v3504_v27 = vadd.f32 %v3503_v36, %v3335_v50  ;;  %3933 = vadd.xlane.f32.xlu0 %v3932_v19 }
 0x543   :  { %3038 = vmatmul.bf16.gmra.mxu0 %v6423_v48  ;;  %v3169_v34 = vadd.f32 %v3168_v44, %v3000_v39 }
 0x544   :  { %v3655_v21 = vmax.f32 %v3504_v27, 0.0  ;;  %3207 = vmatmul.bf16.gmra.mxu1 %v6431_v52  ;;  %3376 = vmatmul.bf16.gmra.mxu2 %v6423_v48 }
 0x545   :  { %3545 = vmatmul.bf16.gmra.mxu3 %v6431_v52  ;;  %v3892_v33 = vpop.xlane.xlu2 %3891  ;;  %v3656_v32 = vmax.f32 %v3169_v34, 0.0 }
 0x546   :  { %v4076_v61 = vadd.f32 %v6703_v45, %v3892_v33  ;;  %v3789_v43 = vmul.f32 %v6603_v55, %v3655_v21 }
 0x547   :  { %v3337_v51 = vpop.f32.mrf.mxu2  ;;  %v3790_v9 = vmul.f32 %v6600_v47, %v3656_v32 }
 0x548   :  { %v4216_v13 = vperm.slane %v4076_v61, %v6748_v16  ;;  %v3338_v59 = vadd.f32 %v3337_v51, %v6591_v28  ;;  %v3506_v48 = vpop.f32.mrf.mxu3  ;;  %v3001_v23 = vpop.f32.mrf.mxu0  ;;  %v3935_v53 = vadd.f32 %v3789_v43, %v3788_v25  ;;  %v6772_v51 = vadd.s32 4294967248, %v6705_v35 }
 0x549   :  { %v3170_v46 = vpop.f32.mrf.mxu1  ;;  %v3002_v41 = vadd.f32 %v3001_v23, %v6582_v14 }
 0x54a   :  { %v4218_v52 = vsel %vm4217_vm3, %v4216_v13, %v4214_v29  ;;  %v3507_v63 = vadd.f32 %v3506_v48, %v3338_v59  ;;  %3936 = vadd.xlane.f32.xlu1 %v3935_v53 }
 0x54b   :  { %v3171_v36 = vadd.f32 %v3170_v46, %v3002_v41 }
 0x54c   :  { %v3657_v49 = vmax.f32 %v3507_v63, 0.0 }
 0x54d   :  { %v3895_v0 = vpop.xlane.xlu2 %3894  ;;  %v3658_v33 = vmax.f32 %v3171_v36, 0.0 }
 0x54e   :  { %v3791_v50 = vmul.f32 %v6603_v55, %v3657_v49  ;;  %v4077_v17 = vadd.f32 %v6703_v45, %v3895_v0 }
 0x54f   :  { %v3339_v19 = vpop.f32.mrf.mxu2  ;;  %v3792_v23 = vmul.f32 %v6600_v47, %v3658_v33 }
 0x550   :  { %v4220_v44 = vperm.slane %v4077_v17, %v6759_v30  ;;  %v3340_v11 = vadd.f32 %v3339_v19, %v6591_v28  ;;  %v3508_v29 = vpop.f32.mrf.mxu3  ;;  %v3004_v27 = vpop.f32.mrf.mxu0  ;;  %v3938_v39 = vadd.f32 %v3791_v50, %v3790_v9  ;;  %v6783_v17 = vadd.s32 4294967240, %v6705_v35 }
 0x551   :  { %v3173_v21 = vpop.f32.mrf.mxu1  ;;  %v3005_v25 = vadd.f32 %v3004_v27, %v6582_v14 }
 0x552   :  { %v4222_v34 = vsel %vm4221_vm4, %v4220_v44, %v4218_v52  ;;  %v3509_v61 = vadd.f32 %v3508_v29, %v3340_v11  ;;  %3939 = vadd.xlane.f32.xlu2 %v3938_v39 }
 0x553   :  { %3043 = vmatmul.bf16.gmra.mxu0 %v6435_v31  ;;  %v3174_v59 = vadd.f32 %v3173_v21, %v3005_v25 }
 0x554   :  { %v3659_v43 = vmax.f32 %v3509_v61, 0.0  ;;  %3212 = vmatmul.bf16.gmra.mxu1 %v6443_v42  ;;  %3381 = vmatmul.bf16.gmra.mxu2 %v6435_v31 }
 0x555   :  { %3550 = vmatmul.bf16.gmra.mxu3 %v6443_v42  ;;  %v3898_v13 = vpop.xlane.xlu0 %3897  ;;  %v3660_v0 = vmax.f32 %v3174_v59, 0.0 }
 0x556   :  { %v4078_v48 = vadd.f32 %v6703_v45, %v3898_v13  ;;  %v3793_v53 = vmul.f32 %v6603_v55, %v3659_v43 }
 0x557   :  { %v3342_v46 = vpop.f32.mrf.mxu2  ;;  %v3794_v44 = vmul.f32 %v6600_v47, %v3660_v0 }
 0x558   :  { %v4224_v32 = vperm.slane %v4078_v48, %v6772_v51  ;;  %v3343_v52 = vadd.f32 %v3342_v46, %v6591_v28  ;;  %v3511_v31 = vpop.f32.mrf.mxu3  ;;  %v3006_v63 = vpop.f32.mrf.mxu0  ;;  %v3941_v41 = vadd.f32 %v3793_v53, %v3792_v23  ;;  %v6796_v46 = vadd.s32 4294967232, %v6705_v35 }
 0x559   :  { %v3175_v49 = vpop.f32.mrf.mxu1  ;;  %v3007_v50 = vadd.f32 %v3006_v63, %v6582_v14 }
 0x55a   :  { %v4226_v42 = vsel %vm4225_vm5, %v4224_v32, %v4222_v34  ;;  %v3512_v9 = vadd.f32 %v3511_v31, %v3343_v52  ;;  %3942 = vadd.xlane.f32.xlu0 %v3941_v41 }
 0x55b   :  { %v3176_v29 = vadd.f32 %v3175_v49, %v3007_v50 }
 0x55c   :  { %v3661_v36 = vmax.f32 %v3512_v9, 0.0 }
 0x55d   :  { %v3901_v19 = vpop.xlane.xlu1 %3900  ;;  %v3662_v13 = vmax.f32 %v3176_v29, 0.0 }
 0x55e   :  { %v3795_v11 = vmul.f32 %v6603_v55, %v3661_v36  ;;  %v4079_v27 = vadd.f32 %v6703_v45, %v3901_v19 }
 0x55f   :  { %v3344_v39 = vpop.f32.mrf.mxu2  ;;  %v3796_v63 = vmul.f32 %v6600_v47, %v3662_v13 }
 0x560   :  { %v4228_v21 = vperm.slane %v4079_v27, %v6783_v17  ;;  %v3345_v33 = vadd.f32 %v3344_v39, %v6591_v28  ;;  %v3513_v34 = vpop.f32.mrf.mxu3  ;;  %v3009_v61 = vpop.f32.mrf.mxu0  ;;  %v3944_v25 = vadd.f32 %v3795_v11, %v3794_v44  ;;  %v6807_v27 = vadd.s32 4294967224, %v6705_v35 }
 0x561   :  { %v3178_v43 = vpop.f32.mrf.mxu1  ;;  %v3010_v23 = vadd.f32 %v3009_v61, %v6582_v14 }
 0x562   :  { %v4230_v59 = vsel %vm4229_vm6, %v4228_v21, %v4226_v42  ;;  %v3514_v48 = vadd.f32 %v3513_v34, %v3345_v33  ;;  %3945 = vadd.xlane.f32.xlu1 %v3944_v25 }
 0x563   :  { %3048 = vmatmul.bf16.gmra.mxu0 %v6447_v5  ;;  %v3179_v52 = vadd.f32 %v3178_v43, %v3010_v23 }
 0x564   :  { %v3663_v53 = vmax.f32 %v3514_v48, 0.0  ;;  %3217 = vmatmul.bf16.gmra.mxu1 %v6455_v1  ;;  %3386 = vmatmul.bf16.gmra.mxu2 %v6447_v5 }
 0x565   :  { %3555 = vmatmul.bf16.gmra.mxu3 %v6455_v1  ;;  %v3904_v32 = vpop.xlane.xlu2 %3903  ;;  %v3664_v19 = vmax.f32 %v3179_v52, 0.0 }
 0x566   :  { %v4080_v31 = vadd.f32 %v6703_v45, %v3904_v32  ;;  %v3797_v41 = vmul.f32 %v6603_v55, %v3663_v53 }
 0x567   :  { %v3347_v49 = vpop.f32.mrf.mxu2  ;;  %v3798_v21 = vmul.f32 %v6600_v47, %v3664_v19 }
 0x568   :  { %v4232_v0 = vperm.slane %v4080_v31, %v6796_v46  ;;  %v3348_v42 = vadd.f32 %v3347_v49, %v6591_v28  ;;  %v3516_v5 = vpop.f32.mrf.mxu3  ;;  %v3011_v9 = vpop.f32.mrf.mxu0  ;;  %v3947_v50 = vadd.f32 %v3797_v41, %v3796_v63  ;;  %v6820_v49 = vadd.s32 4294967216, %v6705_v35 }
 0x569   :  { %v3180_v36 = vpop.f32.mrf.mxu1  ;;  %v3012_v11 = vadd.f32 %v3011_v9, %v6582_v14 }
 0x56a   :  { %v4234_v1 = vsel %vm4233_vm7, %v4232_v0, %v4230_v59  ;;  %v3517_v44 = vadd.f32 %v3516_v5, %v3348_v42  ;;  %3948 = vadd.xlane.f32.xlu2 %v3947_v50 }
 0x56b   :  { %v3181_v34 = vadd.f32 %v3180_v36, %v3012_v11 }
 0x56c   :  { %v3665_v29 = vmax.f32 %v3517_v44, 0.0 }
 0x56d   :  { %v3907_v39 = vpop.xlane.xlu0 %3906  ;;  %v3666_v32 = vmax.f32 %v3181_v34, 0.0 }
 0x56e   :  { %v3799_v33 = vmul.f32 %v6603_v55, %v3665_v29  ;;  %v4081_v61 = vadd.f32 %v6703_v45, %v3907_v39 }
 0x56f   :  { %v3349_v25 = vpop.f32.mrf.mxu2  ;;  %v3800_v9 = vmul.f32 %v6600_v47, %v3666_v32 }
 0x570   :  { %v4236_v43 = vperm.slane %v4081_v61, %v6807_v27  ;;  %v3350_v13 = vadd.f32 %v3349_v25, %v6591_v28  ;;  %v3518_v59 = vpop.f32.mrf.mxu3  ;;  %v3014_v48 = vpop.f32.mrf.mxu0  ;;  %v3950_v23 = vadd.f32 %v3799_v33, %v3798_v21  ;;  %v6831_v61 = vadd.s32 4294967208, %v6705_v35 }
 0x571   :  { %v3183_v53 = vpop.f32.mrf.mxu1  ;;  %v3015_v63 = vadd.f32 %v3014_v48, %v6582_v14 }
 0x572   :  { %v4238_v52 = vsel %vm4237_vm8, %v4236_v43, %v4234_v1  ;;  %v3519_v31 = vadd.f32 %v3518_v59, %v3350_v13  ;;  %3951 = vadd.xlane.f32.xlu0 %v3950_v23 }
 0x573   :  { %3053 = vmatmul.bf16.gmra.mxu0 %v6459_v4  ;;  %v3184_v42 = vadd.f32 %v3183_v53, %v3015_v63 }
 0x574   :  { %v3667_v41 = vmax.f32 %v3519_v31, 0.0  ;;  %3222 = vmatmul.bf16.gmra.mxu1 %v6467_v26  ;;  %3391 = vmatmul.bf16.gmra.mxu2 %v6459_v4 }
 0x575   :  { %3560 = vmatmul.bf16.gmra.mxu3 %v6467_v26  ;;  %v3910_v0 = vpop.xlane.xlu1 %3909  ;;  %v3668_v39 = vmax.f32 %v3184_v42, 0.0 }
 0x576   :  { %v4082_v5 = vadd.f32 %v6703_v45, %v3910_v0  ;;  %v3801_v50 = vmul.f32 %v6603_v55, %v3667_v41 }
 0x577   :  { %v3352_v36 = vpop.f32.mrf.mxu2  ;;  %v3802_v43 = vmul.f32 %v6600_v47, %v3668_v39 }
 0x578   :  { %v4240_v19 = vperm.slane %v4082_v5, %v6820_v49  ;;  %v3353_v1 = vadd.f32 %v3352_v36, %v6591_v28  ;;  %v3521_v4 = vpop.f32.mrf.mxu3  ;;  %v3016_v44 = vpop.f32.mrf.mxu0  ;;  %v3953_v11 = vadd.f32 %v3801_v50, %v3800_v9  ;;  %v6844_v36 = vadd.s32 4294967200, %v6705_v35 }
 0x579   :  { %v3185_v29 = vpop.f32.mrf.mxu1  ;;  %v3017_v33 = vadd.f32 %v3016_v44, %v6582_v14 }
 0x57a   :  { %v4242_v26 = vsel %vm4241_vm9, %v4240_v19, %v4238_v52  ;;  %v3522_v21 = vadd.f32 %v3521_v4, %v3353_v1  ;;  %3954 = vadd.xlane.f32.xlu1 %v3953_v11 }
 0x57b   :  { %v3186_v59 = vadd.f32 %v3185_v29, %v3017_v33 }
 0x57c   :  { %v3669_v34 = vmax.f32 %v3522_v21, 0.0 }
 0x57d   :  { %v3913_v25 = vpop.xlane.xlu2 %3912  ;;  %v3670_v0 = vmax.f32 %v3186_v59, 0.0 }
 0x57e   :  { %v3803_v13 = vmul.f32 %v6603_v55, %v3669_v34  ;;  %v4083_v48 = vadd.f32 %v6703_v45, %v3913_v25 }
 0x57f   :  { %v3354_v23 = vpop.f32.mrf.mxu2  ;;  %v3804_v44 = vmul.f32 %v6600_v47, %v3670_v0 }
 0x580   :  { %v4244_v53 = vperm.slane %v4083_v48, %v6831_v61  ;;  %v3355_v32 = vadd.f32 %v3354_v23, %v6591_v28  ;;  %v3523_v52 = vpop.f32.mrf.mxu3  ;;  %v3019_v31 = vpop.f32.mrf.mxu0  ;;  %v3956_v63 = vadd.f32 %v3803_v13, %v3802_v43  ;;  %v6855_v48 = vadd.s32 4294967192, %v6705_v35 }
 0x581   :  { %v3188_v41 = vpop.f32.mrf.mxu1  ;;  %v3020_v9 = vadd.f32 %v3019_v31, %v6582_v14 }
 0x582   :  { %v4246_v42 = vsel %vm4245_vm10, %v4244_v53, %v4242_v26  ;;  %v3524_v5 = vadd.f32 %v3523_v52, %v3355_v32  ;;  %3957 = vadd.xlane.f32.xlu2 %v3956_v63 }
 0x583   :  { %3058 = vmatmul.bf16.gmra.mxu0 %v6471_v38  ;;  %v3189_v1 = vadd.f32 %v3188_v41, %v3020_v9 }
 0x584   :  { %v3671_v50 = vmax.f32 %v3524_v5, 0.0  ;;  %3227 = vmatmul.bf16.gmra.mxu1 %v6479_v2  ;;  %3396 = vmatmul.bf16.gmra.mxu2 %v6471_v38 }
 0x585   :  { %3565 = vmatmul.bf16.gmra.mxu3 %v6479_v2  ;;  %v3916_v19 = vpop.xlane.xlu0 %3915  ;;  %v3672_v25 = vmax.f32 %v3189_v1, 0.0 }
 0x586   :  { %v4084_v4 = vadd.f32 %v6703_v45, %v3916_v19  ;;  %v3805_v11 = vmul.f32 %v6603_v55, %v3671_v50 }
 0x587   :  { %v3357_v29 = vpop.f32.mrf.mxu2  ;;  %v3806_v53 = vmul.f32 %v6600_v47, %v3672_v25 }
 0x588   :  { %v4248_v39 = vperm.slane %v4084_v4, %v6844_v36  ;;  %v3358_v26 = vadd.f32 %v3357_v29, %v6591_v28  ;;  %v3526_v38 = vpop.f32.mrf.mxu3  ;;  %v3021_v21 = vpop.f32.mrf.mxu0  ;;  %v3959_v33 = vadd.f32 %v3805_v11, %v3804_v44  ;;  %v6868_v29 = vadd.s32 4294967184, %v6705_v35 }
 0x589   :  { %v3190_v34 = vpop.f32.mrf.mxu1  ;;  %v3022_v13 = vadd.f32 %v3021_v21, %v6582_v14 }
 0x58a   :  { %v4250_v2 = vsel %vm4249_vm11, %v4248_v39, %v4246_v42  ;;  %v3527_v43 = vadd.f32 %v3526_v38, %v3358_v26  ;;  %3960 = vadd.xlane.f32.xlu0 %v3959_v33 }
 0x58b   :  { %v3191_v52 = vadd.f32 %v3190_v34, %v3022_v13 }
 0x58c   :  { %v3673_v59 = vmax.f32 %v3527_v43, 0.0 }
 0x58d   :  { %v3919_v23 = vpop.xlane.xlu1 %3918  ;;  %v3674_v19 = vmax.f32 %v3191_v52, 0.0 }
 0x58e   :  { %v3807_v32 = vmul.f32 %v6603_v55, %v3673_v59  ;;  %v4085_v31 = vadd.f32 %v6703_v45, %v3919_v23 }
 0x58f   :  { %v3359_v63 = vpop.f32.mrf.mxu2  ;;  %v3808_v21 = vmul.f32 %v6600_v47, %v3674_v19 }
 0x590   :  { %v4252_v41 = vperm.slane %v4085_v31, %v6855_v48  ;;  %v3360_v0 = vadd.f32 %v3359_v63, %v6591_v28  ;;  %v3528_v42 = vpop.f32.mrf.mxu3  ;;  %v3024_v5 = vpop.f32.mrf.mxu0  ;;  %v3962_v9 = vadd.f32 %v3807_v32, %v3806_v53  ;;  %v6879_v31 = vadd.s32 4294967176, %v6705_v35 }
 0x591   :  { %v3193_v50 = vpop.f32.mrf.mxu1  ;;  %v3025_v44 = vadd.f32 %v3024_v5, %v6582_v14 }
 0x592   :  { %v4254_v1 = vsel %vm4253_vm12, %v4252_v41, %v4250_v2  ;;  %v3529_v4 = vadd.f32 %v3528_v42, %v3360_v0  ;;  %3963 = vadd.xlane.f32.xlu1 %v3962_v9 }
 0x593   :  { %3063 = vmatmul.bf16.gmra.mxu0 %v6483_v15  ;;  %v3194_v26 = vadd.f32 %v3193_v50, %v3025_v44 }
 0x594   :  { %v3675_v11 = vmax.f32 %v3529_v4, 0.0  ;;  %3232 = vmatmul.bf16.gmra.mxu1 %v6491_v24  ;;  %3401 = vmatmul.bf16.gmra.mxu2 %v6483_v15 }
 0x595   :  { %3570 = vmatmul.bf16.gmra.mxu3 %v6491_v24  ;;  %v3922_v39 = vpop.xlane.xlu2 %3921  ;;  %v3676_v23 = vmax.f32 %v3194_v26, 0.0 }
 0x596   :  { %v4086_v38 = vadd.f32 %v6703_v45, %v3922_v39  ;;  %v3809_v33 = vmul.f32 %v6603_v55, %v3675_v11 }
 0x597   :  { %v3362_v34 = vpop.f32.mrf.mxu2  ;;  %v3810_v41 = vmul.f32 %v6600_v47, %v3676_v23 }
 0x598   :  { %v4256_v25 = vperm.slane %v4086_v38, %v6868_v29  ;;  %v3363_v2 = vadd.f32 %v3362_v34, %v6591_v28  ;;  %v3531_v15 = vpop.f32.mrf.mxu3  ;;  %v3026_v43 = vpop.f32.mrf.mxu0  ;;  %v3965_v13 = vadd.f32 %v3809_v33, %v3808_v21 }
 0x599   :  { %v3195_v59 = vpop.f32.mrf.mxu1  ;;  %v3027_v32 = vadd.f32 %v3026_v43, %v6582_v14 }
 0x59a   :  { %v4258_v24 = vsel %vm4257_vm13, %v4256_v25, %v4254_v1  ;;  %v3532_v53 = vadd.f32 %v3531_v15, %v3363_v2  ;;  %3966 = vadd.xlane.f32.xlu2 %v3965_v13 }
 0x59b   :  { %v3196_v42 = vadd.f32 %v3195_v59, %v3027_v32 }
 0x59c   :  { %v3677_v52 = vmax.f32 %v3532_v53, 0.0 }
 0x59d   :  { %v3925_v63 = vpop.xlane.xlu0 %3924  ;;  %v3678_v39 = vmax.f32 %v3196_v42, 0.0 }
 0x59e   :  { %v3811_v0 = vmul.f32 %v6603_v55, %v3677_v52  ;;  %v4087_v5 = vadd.f32 %v6703_v45, %v3925_v63 }
 0x59f   :  { %v3364_v9 = vpop.f32.mrf.mxu2  ;;  %v3812_v25 = vmul.f32 %v6600_v47, %v3678_v39 }
 0x5a0   :  { %v4260_v50 = vperm.slane %v4087_v5, %v6879_v31  ;;  %v3365_v19 = vadd.f32 %v3364_v9, %v6591_v28  ;;  %v3533_v1 = vpop.f32.mrf.mxu3  ;;  %v3029_v4 = vpop.f32.mrf.mxu0  ;;  %v3968_v44 = vadd.f32 %v3811_v0, %v3810_v41 }
 0x5a1   :  { %v3198_v11 = vpop.f32.mrf.mxu1  ;;  %v3030_v21 = vadd.f32 %v3029_v4, %v6582_v14 }
 0x5a2   :  { %v6887_v26 = vsel %vm4261_vm14, %v4260_v50, %v4258_v24  ;;  %v3534_v38 = vadd.f32 %v3533_v1, %v3365_v19  ;;  %3969 = vadd.xlane.f32.xlu0 %v3968_v44 }
 0x5a3   :  { %3068 = vmatmul.bf16.gmra.mxu0 %v6495_v58  ;;  %v3199_v34 = vadd.f32 %v3198_v11, %v3030_v21 }
 0x5a4   :  { %v3679_v33 = vmax.f32 %v3534_v38, 0.0  ;;  %3237 = vmatmul.bf16.gmra.mxu1 %v6503_v56  ;;  %3406 = vmatmul.bf16.gmra.mxu2 %v6495_v58 }
 0x5a5   :  { %3575 = vmatmul.bf16.gmra.mxu3 %v6503_v56  ;;  %v3928_v24 = vpop.xlane.xlu1 %3927  ;;  %v3680_v32 = vmax.f32 %v3199_v34, 0.0 }
 0x5a6   :  { %v3813_v2 = vmul.f32 %v6603_v55, %v3679_v33  ;;  %v4088_v58 = vadd.f32 %v6703_v45, %v3928_v24 }
 0x5a7   :  { %v3367_v15 = vpop.f32.mrf.mxu2  ;;  %v3814_v0 = vmul.f32 %v6600_v47, %v3680_v32 }
 0x5a8   :  { %v3368_v43 = vadd.f32 %v3367_v15, %v6591_v28  ;;  %v3536_v13 = vpop.f32.mrf.mxu3  ;;  %v3031_v59 = vpop.f32.mrf.mxu0  ;;  %v3971_v23 = vadd.f32 %v3813_v2, %v3812_v25  ;;  %v4263_v19 = vperm.slane %v4088_v58, %v6705_v35 }
 0x5a9   :  { %v3200_v53 = vpop.f32.mrf.mxu1  ;;  %v3032_v63 = vadd.f32 %v3031_v59, %v6582_v14 }
 0x5aa   :  { %v3537_v52 = vadd.f32 %v3536_v13, %v3368_v43  ;;  %3972 = vadd.xlane.f32.xlu1 %v3971_v23 }
 0x5ab   :  { %v3201_v5 = vadd.f32 %v3200_v53, %v3032_v63 }
 0x5ac   :  { %v3681_v56 = vmax.f32 %v3537_v52, 0.0 }
 0x5ad   :  { %v3931_v41 = vpop.xlane.xlu2 %3930  ;;  %v3682_v21 = vmax.f32 %v3201_v5, 0.0 }
 0x5ae   :  { %v3815_v42 = vmul.f32 %v6603_v55, %v3681_v56  ;;  %v4089_v9 = vadd.f32 %v6703_v45, %v3931_v41 }
 0x5af   :  { %v3369_v50 = vpop.f32.mrf.mxu2  ;;  %v3816_v59 = vmul.f32 %v6600_v47, %v3682_v21 }
 0x5b0   :  { %v4264_v1 = vperm.slane %v4089_v9, %v6710_v6  ;;  %v3370_v4 = vadd.f32 %v3369_v50, %v6591_v28  ;;  %v3538_v44 = vpop.f32.mrf.mxu3  ;;  %v3034_v11 = vpop.f32.mrf.mxu0  ;;  %v3974_v39 = vadd.f32 %v3815_v42, %v3814_v0 }
 0x5b1   :  { %v3203_v38 = vpop.f32.mrf.mxu1  ;;  %v3035_v25 = vadd.f32 %v3034_v11, %v6582_v14 }
 0x5b2   :  { %v4265_v33 = vsel %vm4205_vm0, %v4264_v1, %v4263_v19  ;;  %v3539_v34 = vadd.f32 %v3538_v44, %v3370_v4  ;;  %3975 = vadd.xlane.f32.xlu2 %v3974_v39 }
 0x5b3   :  { %3073 = vmatmul.bf16.gmra.mxu0 %v6507_v12  ;;  %v3204_v43 = vadd.f32 %v3203_v38, %v3035_v25 }
 0x5b4   :  { %v3683_v2 = vmax.f32 %v3539_v34, 0.0  ;;  %3242 = vmatmul.bf16.gmra.mxu1 %v6515_v57  ;;  %3411 = vmatmul.bf16.gmra.mxu2 %v6507_v12 }
 0x5b5   :  { %3580 = vmatmul.bf16.gmra.mxu3 %v6515_v57  ;;  %v3934_v15 = vpop.xlane.xlu0 %3933  ;;  %v3684_v12 = vmax.f32 %v3204_v43, 0.0 }
 0x5b6   :  { %v4090_v13 = vadd.f32 %v6703_v45, %v3934_v15  ;;  %v3817_v23 = vmul.f32 %v6603_v55, %v3683_v2 }
 0x5b7   :  { %v3372_v24 = vpop.f32.mrf.mxu2  ;;  %v3818_v9 = vmul.f32 %v6600_v47, %v3684_v12 }
 0x5b8   :  { %v4266_v53 = vperm.slane %v4090_v13, %v6724_v20  ;;  %v3373_v32 = vadd.f32 %v3372_v24, %v6591_v28  ;;  %v3541_v52 = vpop.f32.mrf.mxu3  ;;  %v3036_v63 = vpop.f32.mrf.mxu0  ;;  %v3977_v58 = vadd.f32 %v3817_v23, %v3816_v59 }
 0x5b9   :  { %v3205_v56 = vpop.f32.mrf.mxu1  ;;  %v3037_v0 = vadd.f32 %v3036_v63, %v6582_v14 }
 0x5ba   :  { %v4267_v57 = vsel %vm4209_vm1, %v4266_v53, %v4265_v33  ;;  %v3542_v41 = vadd.f32 %v3541_v52, %v3373_v32  ;;  %3978 = vadd.xlane.f32.xlu0 %v3977_v58 }
 0x5bb   :  { %v3206_v19 = vadd.f32 %v3205_v56, %v3037_v0 }
 0x5bc   :  { %v3685_v42 = vmax.f32 %v3542_v41, 0.0 }
 0x5bd   :  { %v3937_v5 = vpop.xlane.xlu1 %3936  ;;  %v3686_v34 = vmax.f32 %v3206_v19, 0.0 }
 0x5be   :  { %v3819_v50 = vmul.f32 %v6603_v55, %v3685_v42  ;;  %v4091_v1 = vadd.f32 %v6703_v45, %v3937_v5 }
 0x5bf   :  { %v3374_v4 = vpop.f32.mrf.mxu2  ;;  %v3820_v24 = vmul.f32 %v6600_v47, %v3686_v34 }
 0x5c0   :  { %v4268_v44 = vperm.slane %v4091_v1, %v6735_v40  ;;  %v3375_v11 = vadd.f32 %v3374_v4, %v6591_v28  ;;  %v3543_v39 = vpop.f32.mrf.mxu3  ;;  %v3039_v38 = vpop.f32.mrf.mxu0  ;;  %v3980_v21 = vadd.f32 %v3819_v50, %v3818_v9 }
 0x5c1   :  { %v3208_v33 = vpop.f32.mrf.mxu1  ;;  %v3040_v15 = vadd.f32 %v3039_v38, %v6582_v14 }
 0x5c2   :  { %v4269_v25 = vsel %vm4213_vm2, %v4268_v44, %v4267_v57  ;;  %v3544_v2 = vadd.f32 %v3543_v39, %v3375_v11  ;;  %3981 = vadd.xlane.f32.xlu1 %v3980_v21 }
 0x5c3   :  { %3078 = vmatmul.bf16.gmra.mxu0 %v6519_v60  ;;  %v3209_v59 = vadd.f32 %v3208_v33, %v3040_v15 }
 0x5c4   :  { %v3687_v43 = vmax.f32 %v3544_v2, 0.0  ;;  %3247 = vmatmul.bf16.gmra.mxu1 %v6527_v3  ;;  %3416 = vmatmul.bf16.gmra.mxu2 %v6519_v60 }
 0x5c5   :  { %3585 = vmatmul.bf16.gmra.mxu3 %v6527_v3  ;;  %v3940_v13 = vpop.xlane.xlu2 %3939  ;;  %v3688_v60 = vmax.f32 %v3209_v59, 0.0 }
 0x5c6   :  { %v4092_v23 = vadd.f32 %v6703_v45, %v3940_v13  ;;  %v3821_v53 = vmul.f32 %v6603_v55, %v3687_v43 }
 0x5c7   :  { %v3377_v32 = vpop.f32.mrf.mxu2  ;;  %v3822_v9 = vmul.f32 %v6600_v47, %v3688_v60 }
 0x5c8   :  { %v4270_v52 = vperm.slane %v4092_v23, %v6748_v16  ;;  %v3378_v63 = vadd.f32 %v3377_v32, %v6591_v28  ;;  %v3546_v58 = vpop.f32.mrf.mxu3  ;;  %v3041_v56 = vpop.f32.mrf.mxu0  ;;  %v3983_v12 = vadd.f32 %v3821_v53, %v3820_v24 }
 0x5c9   :  { %v3210_v57 = vpop.f32.mrf.mxu1  ;;  %v3042_v0 = vadd.f32 %v3041_v56, %v6582_v14 }
 0x5ca   :  { %v4271_v3 = vsel %vm4217_vm3, %v4270_v52, %v4269_v25  ;;  %v3547_v41 = vadd.f32 %v3546_v58, %v3378_v63  ;;  %3984 = vadd.xlane.f32.xlu2 %v3983_v12 }
 0x5cb   :  { %v3211_v19 = vadd.f32 %v3210_v57, %v3042_v0 }
 0x5cc   :  { %v3689_v42 = vmax.f32 %v3547_v41, 0.0 }
 0x5cd   :  { %v3943_v5 = vpop.xlane.xlu0 %3942  ;;  %v3690_v34 = vmax.f32 %v3211_v19, 0.0 }
 0x5ce   :  { %v3823_v50 = vmul.f32 %v6603_v55, %v3689_v42  ;;  %v4093_v1 = vadd.f32 %v6703_v45, %v3943_v5 }
 0x5cf   :  { %v3379_v4 = vpop.f32.mrf.mxu2  ;;  %v3824_v24 = vmul.f32 %v6600_v47, %v3690_v34 }
 0x5d0   :  { %v4272_v44 = vperm.slane %v4093_v1, %v6759_v30  ;;  %v3380_v11 = vadd.f32 %v3379_v4, %v6591_v28  ;;  %v3548_v39 = vpop.f32.mrf.mxu3  ;;  %v3044_v38 = vpop.f32.mrf.mxu0  ;;  %v3986_v21 = vadd.f32 %v3823_v50, %v3822_v9 }
 0x5d1   :  { %v3213_v33 = vpop.f32.mrf.mxu1  ;;  %v3045_v15 = vadd.f32 %v3044_v38, %v6582_v14 }
 0x5d2   :  { %v4273_v25 = vsel %vm4221_vm4, %v4272_v44, %v4271_v3  ;;  %v3549_v2 = vadd.f32 %v3548_v39, %v3380_v11  ;;  %3987 = vadd.xlane.f32.xlu0 %v3986_v21 }
 0x5d3   :  { %3083 = vmatmul.bf16.gmra.mxu0 %v6531_v7  ;;  %v3214_v59 = vadd.f32 %v3213_v33, %v3045_v15 }
 0x5d4   :  { %v3691_v43 = vmax.f32 %v3549_v2, 0.0  ;;  %3252 = vmatmul.bf16.gmra.mxu1 %v6539_v54  ;;  %3421 = vmatmul.bf16.gmra.mxu2 %v6531_v7 }
 0x5d5   :  { %3590 = vmatmul.bf16.gmra.mxu3 %v6539_v54  ;;  %v3946_v13 = vpop.xlane.xlu1 %3945  ;;  %v3692_v7 = vmax.f32 %v3214_v59, 0.0 }
 0x5d6   :  { %v4094_v23 = vadd.f32 %v6703_v45, %v3946_v13  ;;  %v3825_v53 = vmul.f32 %v6603_v55, %v3691_v43 }
 0x5d7   :  { %v3382_v32 = vpop.f32.mrf.mxu2  ;;  %v3826_v42 = vmul.f32 %v6600_v47, %v3692_v7 }
 0x5d8   :  { %v4274_v52 = vperm.slane %v4094_v23, %v6772_v51  ;;  %v3383_v63 = vadd.f32 %v3382_v32, %v6591_v28  ;;  %v3551_v58 = vpop.f32.mrf.mxu3  ;;  %v3046_v56 = vpop.f32.mrf.mxu0  ;;  %v3989_v12 = vadd.f32 %v3825_v53, %v3824_v24 }
 0x5d9   :  { %v3215_v57 = vpop.f32.mrf.mxu1  ;;  %v3047_v3 = vadd.f32 %v3046_v56, %v6582_v14 }
 0x5da   :  { %v4275_v54 = vsel %vm4225_vm5, %v4274_v52, %v4273_v25  ;;  %v3552_v60 = vadd.f32 %v3551_v58, %v3383_v63  ;;  %3990 = vadd.xlane.f32.xlu1 %v3989_v12 }
 0x5db   :  { %v3216_v9 = vadd.f32 %v3215_v57, %v3047_v3 }
 0x5dc   :  { %v3693_v41 = vmax.f32 %v3552_v60, 0.0 }
 0x5dd   :  { %v3949_v0 = vpop.xlane.xlu2 %3948  ;;  %v3694_v21 = vmax.f32 %v3216_v9, 0.0 }
 0x5de   :  { %v3827_v5 = vmul.f32 %v6603_v55, %v3693_v41  ;;  %v4095_v50 = vadd.f32 %v6703_v45, %v3949_v0 }
 0x5df   :  { %v3384_v19 = vpop.f32.mrf.mxu2  ;;  %v3828_v59 = vmul.f32 %v6600_v47, %v3694_v21 }
 0x5e0   :  { %v4276_v1 = vperm.slane %v4095_v50, %v6783_v17  ;;  %v3385_v4 = vadd.f32 %v3384_v19, %v6591_v28  ;;  %v3553_v44 = vpop.f32.mrf.mxu3  ;;  %v3049_v11 = vpop.f32.mrf.mxu0  ;;  %v3992_v39 = vadd.f32 %v3827_v5, %v3826_v42 }
 0x5e1   :  { %v3218_v38 = vpop.f32.mrf.mxu1  ;;  %v3050_v25 = vadd.f32 %v3049_v11, %v6582_v14 }
 0x5e2   :  { %v4277_v33 = vsel %vm4229_vm6, %v4276_v1, %v4275_v54  ;;  %v3554_v34 = vadd.f32 %v3553_v44, %v3385_v4  ;;  %3993 = vadd.xlane.f32.xlu2 %v3992_v39 }
 0x5e3   :  { %3088 = vmatmul.bf16.gmra.mxu0 %v6543_v37  ;;  %v3219_v43 = vadd.f32 %v3218_v38, %v3050_v25 }
 0x5e4   :  { %v3695_v2 = vmax.f32 %v3554_v34, 0.0  ;;  %3257 = vmatmul.bf16.gmra.mxu1 %v6551_v22  ;;  %3426 = vmatmul.bf16.gmra.mxu2 %v6543_v37 }
 0x5e5   :  { %3595 = vmatmul.bf16.gmra.mxu3 %v6551_v22  ;;  %v3952_v15 = vpop.xlane.xlu0 %3951  ;;  %v3696_v37 = vmax.f32 %v3219_v43, 0.0 }
 0x5e6   :  { %v4096_v13 = vadd.f32 %v6703_v45, %v3952_v15  ;;  %v3829_v23 = vmul.f32 %v6603_v55, %v3695_v2 }
 0x5e7   :  { %v3387_v24 = vpop.f32.mrf.mxu2  ;;  %v3830_v60 = vmul.f32 %v6600_v47, %v3696_v37 }
 0x5e8   :  { %v4278_v53 = vperm.slane %v4096_v13, %v6796_v46  ;;  %v3388_v32 = vadd.f32 %v3387_v24, %v6591_v28  ;;  %v3556_v52 = vpop.f32.mrf.mxu3  ;;  %v3051_v63 = vpop.f32.mrf.mxu0  ;;  %v3995_v58 = vadd.f32 %v3829_v23, %v3828_v59 }
 0x5e9   :  { %v3220_v56 = vpop.f32.mrf.mxu1  ;;  %v3052_v57 = vadd.f32 %v3051_v63, %v6582_v14 }
 0x5ea   :  { %v4279_v22 = vsel %vm4233_vm7, %v4278_v53, %v4277_v33  ;;  %v3557_v12 = vadd.f32 %v3556_v52, %v3388_v32  ;;  %3996 = vadd.xlane.f32.xlu0 %v3995_v58 }
 0x5eb   :  { %v3221_v41 = vadd.f32 %v3220_v56, %v3052_v57 }
 0x5ec   :  { %v3697_v7 = vmax.f32 %v3557_v12, 0.0 }
 0x5ed   :  { %v3955_v54 = vpop.xlane.xlu1 %3954  ;;  %v3698_v44 = vmax.f32 %v3221_v41, 0.0 }
 0x5ee   :  { %v3831_v3 = vmul.f32 %v6603_v55, %v3697_v7  ;;  %v4097_v0 = vadd.f32 %v6703_v45, %v3955_v54 }
 0x5ef   :  { %v3389_v42 = vpop.f32.mrf.mxu2  ;;  %v3832_v34 = vmul.f32 %v6600_v47, %v3698_v44 }
 0x5f0   :  { %v4280_v5 = vperm.slane %v4097_v0, %v6807_v27  ;;  %v3390_v9 = vadd.f32 %v3389_v42, %v6591_v28  ;;  %v3558_v50 = vpop.f32.mrf.mxu3  ;;  %v3054_v19 = vpop.f32.mrf.mxu0  ;;  %v3998_v1 = vadd.f32 %v3831_v3, %v3830_v60 }
 0x5f1   :  { %v3223_v4 = vpop.f32.mrf.mxu1  ;;  %v3055_v38 = vadd.f32 %v3054_v19, %v6582_v14 }
 0x5f2   :  { %v4281_v11 = vsel %vm4237_vm8, %v4280_v5, %v4279_v22  ;;  %v3559_v39 = vadd.f32 %v3558_v50, %v3390_v9  ;;  %3999 = vadd.xlane.f32.xlu1 %v3998_v1 }
 0x5f3   :  { %3093 = vmatmul.bf16.gmra.mxu0 %v6555_v8  ;;  %v3224_v2 = vadd.f32 %v3223_v4, %v3055_v38 }
 0x5f4   :  { %v3699_v21 = vmax.f32 %v3559_v39, 0.0  ;;  %3262 = vmatmul.bf16.gmra.mxu1 %v6563_v10  ;;  %3431 = vmatmul.bf16.gmra.mxu2 %v6555_v8 }
 0x5f5   :  { %3600 = vmatmul.bf16.gmra.mxu3 %v6563_v10  ;;  %v3958_v33 = vpop.xlane.xlu2 %3957  ;;  %v3700_v8 = vmax.f32 %v3224_v2, 0.0 }
 0x5f6   :  { %v3833_v25 = vmul.f32 %v6603_v55, %v3699_v21  ;;  %v4098_v15 = vadd.f32 %v6703_v45, %v3958_v33 }
 0x5f7   :  { %v3392_v43 = vpop.f32.mrf.mxu2  ;;  %v3834_v37 = vmul.f32 %v6600_v47, %v3700_v8 }
 0x5f8   :  { %v4282_v13 = vperm.slane %v4098_v15, %v6820_v49  ;;  %v3393_v59 = vadd.f32 %v3392_v43, %v6591_v28  ;;  %v3561_v23 = vpop.f32.mrf.mxu3  ;;  %v3056_v24 = vpop.f32.mrf.mxu0  ;;  %v4001_v53 = vadd.f32 %v3833_v25, %v3832_v34 }
 0x5f9   :  { %v3225_v32 = vpop.f32.mrf.mxu1  ;;  %v3057_v63 = vadd.f32 %v3056_v24, %v6582_v14 }
 0x5fa   :  { %v4283_v10 = vsel %vm4241_vm9, %v4282_v13, %v4281_v11  ;;  %v3562_v52 = vadd.f32 %v3561_v23, %v3393_v59  ;;  %4002 = vadd.xlane.f32.xlu2 %v4001_v53 }
 0x5fb   :  { %v3226_v12 = vadd.f32 %v3225_v32, %v3057_v63 }
 0x5fc   :  { %v3701_v58 = vmax.f32 %v3562_v52, 0.0 }
 0x5fd   :  { %v3961_v56 = vpop.xlane.xlu0 %3960  ;;  %v3702_v5 = vmax.f32 %v3226_v12, 0.0 }
 0x5fe   :  { %v3835_v22 = vmul.f32 %v6603_v55, %v3701_v58  ;;  %v4099_v57 = vadd.f32 %v6703_v45, %v3961_v56 }
 0x5ff   :  { %v3394_v7 = vpop.f32.mrf.mxu2  ;;  %v3836_v44 = vmul.f32 %v6600_v47, %v3702_v5 }
 0x600   :  { %v4284_v54 = vperm.slane %v4099_v57, %v6831_v61  ;;  %v3395_v60 = vadd.f32 %v3394_v7, %v6591_v28  ;;  %v3563_v3 = vpop.f32.mrf.mxu3  ;;  %v3059_v41 = vpop.f32.mrf.mxu0  ;;  %v4004_v0 = vadd.f32 %v3835_v22, %v3834_v37 }
 0x601   :  { %v3228_v42 = vpop.f32.mrf.mxu1  ;;  %v3060_v19 = vadd.f32 %v3059_v41, %v6582_v14 }
 0x602   :  { %v4285_v9 = vsel %vm4245_vm10, %v4284_v54, %v4283_v10  ;;  %v3564_v50 = vadd.f32 %v3563_v3, %v3395_v60  ;;  %4005 = vadd.xlane.f32.xlu0 %v4004_v0  ;;  %v7249_v3 = vld [vmem:[#allocation10_spill] sm:$0xff]  ;;  %v7250_v0 = vld [vmem:[#allocation11_spill] sm:$0xff] }
 0x603   :  { %3098 = vmatmul.bf16.gmra.mxu0 %v6567_v18  ;;  %v3229_v39 = vadd.f32 %v3228_v42, %v3060_v19 }
 0x604   :  { %v3703_v1 = vmax.f32 %v3564_v50, 0.0  ;;  %3267 = vmatmul.bf16.gmra.mxu1 %v6575_v62  ;;  %3436 = vmatmul.bf16.gmra.mxu2 %v6567_v18 }
 0x605   :  { %3605 = vmatmul.bf16.gmra.mxu3 %v6575_v62  ;;  %v3964_v4 = vpop.xlane.xlu1 %3963  ;;  %v3704_v18 = vmax.f32 %v3229_v39, 0.0 }
 0x606   :  { %v3837_v11 = vmul.f32 %v6603_v55, %v3703_v1  ;;  %v4100_v38 = vadd.f32 %v6703_v45, %v3964_v4 }
 0x607   :  { %v3397_v21 = vpop.f32.mrf.mxu2  ;;  %v3838_v53 = vmul.f32 %v6600_v47, %v3704_v18 }
 0x608   :  { %v4286_v33 = vperm.slane %v4100_v38, %v6844_v36  ;;  %v3398_v34 = vadd.f32 %v3397_v21, %v6591_v28  ;;  %v3566_v25 = vpop.f32.mrf.mxu3  ;;  %v3061_v2 = vpop.f32.mrf.mxu0  ;;  %v4007_v15 = vadd.f32 %v3837_v11, %v3836_v44 }
 0x609   :  { %v3230_v43 = vpop.f32.mrf.mxu1  ;;  %v3062_v59 = vadd.f32 %v3061_v2, %v6582_v14 }
 0x60a   :  { %v4287_v62 = vsel %vm4249_vm11, %v4286_v33, %v4285_v9  ;;  %v3567_v13 = vadd.f32 %v3566_v25, %v3398_v34  ;;  %4008 = vadd.xlane.f32.xlu1 %v4007_v15 }
 0x60b   :  { %v3231_v8 = vadd.f32 %v3230_v43, %v3062_v59 }
 0x60c   :  { %v3705_v23 = vmax.f32 %v3567_v13, 0.0 }
 0x60d   :  { %v3967_v24 = vpop.xlane.xlu2 %3966  ;;  %v3706_v57 = vmax.f32 %v3231_v8, 0.0 }
 0x60e   :  { %v3839_v32 = vmul.f32 %v6603_v55, %v3705_v23  ;;  %v4101_v10 = vadd.f32 %v6703_v45, %v3967_v24 }
 0x60f   :  { %v3399_v52 = vpop.f32.mrf.mxu2  ;;  %v3840_v5 = vmul.f32 %v6600_v47, %v3706_v57 }
 0x610   :  { %v4288_v63 = vperm.slane %v4101_v10, %v6855_v48  ;;  %v3400_v58 = vadd.f32 %v3399_v52, %v6591_v28  ;;  %v3568_v56 = vpop.f32.mrf.mxu3  ;;  %v3064_v37 = vpop.f32.mrf.mxu0  ;;  %v4010_v22 = vadd.f32 %v3839_v32, %v3838_v53 }
 0x611   :  { %v3233_v12 = vpop.f32.mrf.mxu1  ;;  %v3065_v60 = vadd.f32 %v3064_v37, %v6582_v14 }
 0x612   :  { %v4289_v7 = vsel %vm4253_vm12, %v4288_v63, %v4287_v62  ;;  %v3569_v54 = vadd.f32 %v3568_v56, %v3400_v58  ;;  %4011 = vadd.xlane.f32.xlu1 %v4010_v22 }
 0x613   :  { %3103 = vmatmul.bf16.gmra.mxu0 %v7249_v3  ;;  %v3234_v50 = vadd.f32 %v3233_v12, %v3065_v60 }
 0x614   :  { %v3707_v41 = vmax.f32 %v3569_v54, 0.0  ;;  %3272 = vmatmul.bf16.gmra.mxu1 %v7250_v0  ;;  %3441 = vmatmul.bf16.gmra.mxu2 %v7249_v3 }
 0x615   :  { %3610 = vmatmul.bf16.gmra.mxu3 %v7250_v0  ;;  %v3970_v42 = vpop.xlane.xlu0 %3969  ;;  %v3708_v34 = vmax.f32 %v3234_v50, 0.0 }
 0x616   :  { %v3841_v9 = vmul.f32 %v6603_v55, %v3707_v41  ;;  %v4102_v19 = vadd.f32 %v6703_v45, %v3970_v42 }
 0x617   :  { %v3402_v1 = vpop.f32.mrf.mxu2  ;;  %v3842_v62 = vmul.f32 %v6600_v47, %v3708_v34 }
 0x618   :  { %v4290_v4 = vperm.slane %v4102_v19, %v6868_v29  ;;  %v3403_v44 = vadd.f32 %v3402_v1, %v6591_v28  ;;  %v3571_v11 = vpop.f32.mrf.mxu3  ;;  %v3066_v39 = vpop.f32.mrf.mxu0  ;;  %v4013_v38 = vadd.f32 %v3841_v9, %v3840_v5 }
 0x619   :  { %v3067_v21 = vadd.f32 %v3066_v39, %v6582_v14  ;;  %v3235_v33 = vpop.f32.mrf.mxu1 }
 0x61a   :  { %v4291_v25 = vsel %vm4257_vm13, %v4290_v4, %v4289_v7  ;;  %v3572_v2 = vadd.f32 %v3571_v11, %v3403_v44  ;;  %4014 = vadd.xlane.f32.xlu0 %v4013_v38 }
 0x61b   :  { %v3236_v15 = vadd.f32 %v3235_v33, %v3067_v21 }
 0x61c   :  { %v3709_v43 = vmax.f32 %v3572_v2, 0.0 }
 0x61d   :  { %v3973_v18 = vpop.xlane.xlu1 %3972  ;;  %v3710_v63 = vmax.f32 %v3236_v15, 0.0 }
 0x61e   :  { %v3843_v13 = vmul.f32 %v6603_v55, %v3709_v43  ;;  %v4103_v59 = vadd.f32 %v6703_v45, %v3973_v18 }
 0x61f   :  { %v3404_v23 = vpop.f32.mrf.mxu2  ;;  %v3844_v57 = vmul.f32 %v6600_v47, %v3710_v63 }
 0x620   :  { %v4292_v24 = vperm.slane %v4103_v59, %v6879_v31  ;;  %v3405_v53 = vadd.f32 %v3404_v23, %v6591_v28  ;;  %v3573_v32 = vpop.f32.mrf.mxu3  ;;  %v3069_v8 = vpop.f32.mrf.mxu0  ;;  %v4016_v10 = vadd.f32 %v3843_v13, %v3842_v62 }
 0x621   :  { %v3238_v52 = vpop.f32.mrf.mxu1  ;;  %v3070_v37 = vadd.f32 %v3069_v8, %v6582_v14 }
 0x622   :  { %v4293_v58 = vsel %vm4261_vm14, %v4292_v24, %v4291_v25  ;;  %v3574_v56 = vadd.f32 %v3573_v32, %v3405_v53  ;;  %4017 = vadd.xlane.f32.xlu2 %v4016_v10 }
 0x623   :  { %v7034_v22 = vsel %vm4356_vm15, %v4293_v58, %v6887_v26  ;;  %v3239_v54 = vadd.f32 %v3238_v52, %v3070_v37  ;;  %vm4358_vm15 = vcmask 1042434  }
 0x624   :  { %v3711_v12 = vmax.f32 %v3574_v56, 0.0 }
 0x625   :  { %v3976_v5 = vpop.xlane.xlu2 %3975  ;;  %v3712_v50 = vmax.f32 %v3239_v54, 0.0 }
 0x626   :  { %v3845_v7 = vmul.f32 %v6603_v55, %v3711_v12  ;;  %v4104_v1 = vadd.f32 %v6703_v45, %v3976_v5 }
 0x627   :  { %v3407_v60 = vpop.f32.mrf.mxu2  ;;  %v3846_v11 = vmul.f32 %v6600_v47, %v3712_v50 }
 0x628   :  { %v3408_v3 = vadd.f32 %v3407_v60, %v6591_v28  ;;  %v3576_v41 = vpop.f32.mrf.mxu3  ;;  %v3071_v0 = vpop.f32.mrf.mxu0  ;;  %v7039_v42 = vadd.f32 %v3845_v7, %v3844_v57  ;;  %v4294_v34 = vperm.slane %v4104_v1, %v6705_v35 }
 0x629   :  { %v3240_v9 = vpop.f32.mrf.mxu1  ;;  %v3072_v26 = vadd.f32 %v3071_v0, %v6582_v14 }
 0x62a   :  { %v3577_v19 = vadd.f32 %v3576_v41, %v3408_v3 }
 0x62b   :  { %v3241_v38 = vadd.f32 %v3240_v9, %v3072_v26 }
 0x62c   :  { %v3713_v4 = vmax.f32 %v3577_v19, 0.0 }
 0x62d   :  { %v3979_v44 = vpop.xlane.xlu0 %3978  ;;  %v3714_v13 = vmax.f32 %v3241_v38, 0.0 }
 0x62e   :  { %v3847_v39 = vmul.f32 %v6603_v55, %v3713_v4  ;;  %v4105_v21 = vadd.f32 %v6703_v45, %v3979_v44 }
 0x62f   :  { %v3409_v33 = vpop.f32.mrf.mxu2  ;;  %v3848_v32 = vmul.f32 %v6600_v47, %v3714_v13 }
 0x630   :  { %v4295_v25 = vperm.slane %v4105_v21, %v6710_v6  ;;  %v3410_v2 = vadd.f32 %v3409_v33, %v6591_v28  ;;  %v3578_v15 = vpop.f32.mrf.mxu3  ;;  %v3074_v43 = vpop.f32.mrf.mxu0  ;;  %v4022_v18 = vadd.f32 %v3847_v39, %v3846_v11 }
 0x631   :  { %v3243_v62 = vpop.f32.mrf.mxu1  ;;  %v3075_v24 = vadd.f32 %v3074_v43, %v6582_v14 }
 0x632   :  { %v7050_v59 = vsel %vm4205_vm0, %v4295_v25, %v4294_v34  ;;  %v3579_v23 = vadd.f32 %v3578_v15, %v3410_v2  ;;  %4023 = vadd.xlane.f32.xlu2 %v4022_v18 }
 0x633   :  { %v3244_v10 = vadd.f32 %v3243_v62, %v3075_v24 }
 0x634   :  { %v3715_v53 = vmax.f32 %v3579_v23, 0.0 }
 0x635   :  { %v3716_v57 = vmax.f32 %v3244_v10, 0.0 }
 0x636   :  { %v3849_v8 = vmul.f32 %v6603_v55, %v3715_v53 }
 0x637   :  { %v3412_v52 = vpop.f32.mrf.mxu2  ;;  %v3850_v3 = vmul.f32 %v6600_v47, %v3716_v57 }
 0x638   :  { %v3413_v63 = vadd.f32 %v3412_v52, %v6591_v28  ;;  %v3581_v58 = vpop.f32.mrf.mxu3  ;;  %v3076_v56 = vpop.f32.mrf.mxu0  ;;  %v4025_v37 = vadd.f32 %v3849_v8, %v3848_v32 }
 0x639   :  { %v3245_v12 = vpop.f32.mrf.mxu1  ;;  %v3077_v54 = vadd.f32 %v3076_v56, %v6582_v14 }
 0x63a   :  { %v3582_v7 = vadd.f32 %v3581_v58, %v3413_v63  ;;  %4026 = vadd.xlane.f32.xlu0 %v4025_v37 }
 0x63b   :  { %v3246_v0 = vadd.f32 %v3245_v12, %v3077_v54 }
 0x63c   :  { %v3717_v60 = vmax.f32 %v3582_v7, 0.0 }
 0x63d   :  { %v3718_v4 = vmax.f32 %v3246_v0, 0.0 }
 0x63e   :  { %v3851_v41 = vmul.f32 %v6603_v55, %v3717_v60 }
 0x63f   :  { %v3414_v5 = vpop.f32.mrf.mxu2  ;;  %v3852_v38 = vmul.f32 %v6600_v47, %v3718_v4 }
 0x640   :  { %v3415_v9 = vadd.f32 %v3414_v5, %v6591_v28  ;;  %v3583_v50 = vpop.f32.mrf.mxu3  ;;  %v3079_v19 = vpop.f32.mrf.mxu0  ;;  %v4028_v26 = vadd.f32 %v3851_v41, %v3850_v3 }
 0x641   :  { %v3248_v1 = vpop.f32.mrf.mxu1  ;;  %v3080_v11 = vadd.f32 %v3079_v19, %v6582_v14 }
 0x642   :  { %v3584_v44 = vadd.f32 %v3583_v50, %v3415_v9  ;;  %4029 = vadd.xlane.f32.xlu1 %v4028_v26 }
 0x643   :  { %v3249_v33 = vadd.f32 %v3248_v1, %v3080_v11 }
 0x644   :  { %v3719_v39 = vmax.f32 %v3584_v44, 0.0 }
 0x645   :  { %v3720_v62 = vmax.f32 %v3249_v33, 0.0 }
 0x646   :  { %v3853_v21 = vmul.f32 %v6603_v55, %v3719_v39 }
 0x647   :  { %v3417_v34 = vpop.f32.mrf.mxu2  ;;  %v3854_v53 = vmul.f32 %v6600_v47, %v3720_v62 }
 0x648   :  { %v3418_v25 = vadd.f32 %v3417_v34, %v6591_v28  ;;  %v3586_v2 = vpop.f32.mrf.mxu3  ;;  %v3081_v15 = vpop.f32.mrf.mxu0  ;;  %v4031_v43 = vadd.f32 %v3853_v21, %v3852_v38 }
 0x649   :  { %v3250_v18 = vpop.f32.mrf.mxu1  ;;  %v3082_v23 = vadd.f32 %v3081_v15, %v6582_v14 }
 0x64a   :  { %v3587_v13 = vadd.f32 %v3586_v2, %v3418_v25  ;;  %4032 = vadd.xlane.f32.xlu2 %v4031_v43 }
 0x64b   :  { %v3251_v8 = vadd.f32 %v3250_v18, %v3082_v23 }
 0x64c   :  { %v3721_v24 = vmax.f32 %v3587_v13, 0.0 }
 0x64d   :  { %v3722_v12 = vmax.f32 %v3251_v8, 0.0 }
 0x64e   :  { %v3855_v32 = vmul.f32 %v6603_v55, %v3721_v24 }
 0x64f   :  { %v3419_v10 = vpop.f32.mrf.mxu2  ;;  %v3856_v60 = vmul.f32 %v6600_v47, %v3722_v12 }
 0x650   :  { %v3420_v52 = vadd.f32 %v3419_v10, %v6591_v28  ;;  %v3588_v63 = vpop.f32.mrf.mxu3  ;;  %v3084_v58 = vpop.f32.mrf.mxu0  ;;  %v4034_v56 = vadd.f32 %v3855_v32, %v3854_v53 }
 0x651   :  { %v3253_v37 = vpop.f32.mrf.mxu1  ;;  %v3085_v7 = vadd.f32 %v3084_v58, %v6582_v14 }
 0x652   :  { %v3589_v57 = vadd.f32 %v3588_v63, %v3420_v52  ;;  %4035 = vadd.xlane.f32.xlu0 %v4034_v56 }
 0x653   :  { %v3254_v41 = vadd.f32 %v3253_v37, %v3085_v7 }
 0x654   :  { %v3723_v54 = vmax.f32 %v3589_v57, 0.0 }
 0x655   :  { %v3724_v1 = vmax.f32 %v3254_v41, 0.0 }
 0x656   :  { %v3857_v3 = vmul.f32 %v6603_v55, %v3723_v54 }
 0x657   :  { %v3422_v0 = vpop.f32.mrf.mxu2  ;;  %v3858_v39 = vmul.f32 %v6600_v47, %v3724_v1 }
 0x658   :  { %v3423_v5 = vadd.f32 %v3422_v0, %v6591_v28  ;;  %v3591_v9 = vpop.f32.mrf.mxu3  ;;  %v3086_v50 = vpop.f32.mrf.mxu0  ;;  %v4037_v19 = vadd.f32 %v3857_v3, %v3856_v60 }
 0x659   :  { %v3255_v26 = vpop.f32.mrf.mxu1  ;;  %v3087_v44 = vadd.f32 %v3086_v50, %v6582_v14 }
 0x65a   :  { %v3592_v4 = vadd.f32 %v3591_v9, %v3423_v5  ;;  %4038 = vadd.xlane.f32.xlu1 %v4037_v19 }
 0x65b   :  { %v3256_v21 = vadd.f32 %v3255_v26, %v3087_v44 }
 0x65c   :  { %v3725_v11 = vmax.f32 %v3592_v4, 0.0 }
 0x65d   :  { %v3726_v18 = vmax.f32 %v3256_v21, 0.0 }
 0x65e   :  { %v3859_v38 = vmul.f32 %v6603_v55, %v3725_v11 }
 0x65f   :  { %v3424_v33 = vpop.f32.mrf.mxu2  ;;  %v3860_v24 = vmul.f32 %v6600_v47, %v3726_v18 }
 0x660   :  { %v3425_v34 = vadd.f32 %v3424_v33, %v6591_v28  ;;  %v3593_v25 = vpop.f32.mrf.mxu3  ;;  %v3089_v2 = vpop.f32.mrf.mxu0  ;;  %v4040_v15 = vadd.f32 %v3859_v38, %v3858_v39 }
 0x661   :  { %v3258_v43 = vpop.f32.mrf.mxu1  ;;  %v3090_v13 = vadd.f32 %v3089_v2, %v6582_v14 }
 0x662   :  { %v3594_v62 = vadd.f32 %v3593_v25, %v3425_v34  ;;  %4041 = vadd.xlane.f32.xlu2 %v4040_v15 }
 0x663   :  { %v3259_v32 = vadd.f32 %v3258_v43, %v3090_v13 }
 0x664   :  { %v3727_v23 = vmax.f32 %v3594_v62, 0.0 }
 0x665   :  { %v3728_v37 = vmax.f32 %v3259_v32, 0.0 }
 0x666   :  { %v3861_v53 = vmul.f32 %v6603_v55, %v3727_v23 }
 0x667   :  { %v3427_v8 = vpop.f32.mrf.mxu2  ;;  %v3862_v54 = vmul.f32 %v6600_v47, %v3728_v37 }
 0x668   :  { %v3428_v10 = vadd.f32 %v3427_v8, %v6591_v28  ;;  %v3596_v52 = vpop.f32.mrf.mxu3  ;;  %v3091_v63 = vpop.f32.mrf.mxu0  ;;  %v4043_v58 = vadd.f32 %v3861_v53, %v3860_v24 }
 0x669   :  { %v3260_v56 = vpop.f32.mrf.mxu1  ;;  %v3092_v57 = vadd.f32 %v3091_v63, %v6582_v14 }
 0x66a   :  { %v3597_v12 = vadd.f32 %v3596_v52, %v3428_v10  ;;  %4044 = vadd.xlane.f32.xlu0 %v4043_v58 }
 0x66b   :  { %v3261_v3 = vadd.f32 %v3260_v56, %v3092_v57 }
 0x66c   :  { %v3729_v7 = vmax.f32 %v3597_v12, 0.0 }
 0x66d   :  { %v3730_v26 = vmax.f32 %v3261_v3, 0.0 }
 0x66e   :  { %v3863_v60 = vmul.f32 %v6603_v55, %v3729_v7 }
 0x66f   :  { %v3429_v41 = vpop.f32.mrf.mxu2  ;;  %v3864_v11 = vmul.f32 %v6600_v47, %v3730_v26 }
 0x670   :  { %v3430_v0 = vadd.f32 %v3429_v41, %v6591_v28  ;;  %v3598_v5 = vpop.f32.mrf.mxu3  ;;  %v3094_v9 = vpop.f32.mrf.mxu0  ;;  %v4046_v50 = vadd.f32 %v3863_v60, %v3862_v54 }
 0x671   :  { %v3263_v19 = vpop.f32.mrf.mxu1  ;;  %v3095_v4 = vadd.f32 %v3094_v9, %v6582_v14 }
 0x672   :  { %v3599_v1 = vadd.f32 %v3598_v5, %v3430_v0  ;;  %4047 = vadd.xlane.f32.xlu1 %v4046_v50 }
 0x673   :  { %v3264_v38 = vadd.f32 %v3263_v19, %v3095_v4 }
 0x674   :  { %v3731_v44 = vmax.f32 %v3599_v1, 0.0 }
 0x675   :  { %v3732_v43 = vmax.f32 %v3264_v38, 0.0 }
 0x676   :  { %v3865_v39 = vmul.f32 %v6603_v55, %v3731_v44 }
 0x677   :  { %v3432_v21 = vpop.f32.mrf.mxu2  ;;  %v3866_v23 = vmul.f32 %v6600_v47, %v3732_v43 }
 0x678   :  { %v3433_v33 = vadd.f32 %v3432_v21, %v6591_v28  ;;  %v3601_v34 = vpop.f32.mrf.mxu3  ;;  %v3096_v25 = vpop.f32.mrf.mxu0  ;;  %v4049_v2 = vadd.f32 %v3865_v39, %v3864_v11 }
 0x679   :  { %v3265_v15 = vpop.f32.mrf.mxu1  ;;  %v3097_v62 = vadd.f32 %v3096_v25, %v6582_v14 }
 0x67a   :  { %v3602_v18 = vadd.f32 %v3601_v34, %v3433_v33  ;;  %4050 = vadd.xlane.f32.xlu2 %v4049_v2 }
 0x67b   :  { %v3266_v53 = vadd.f32 %v3265_v15, %v3097_v62 }
 0x67c   :  { %v3733_v13 = vmax.f32 %v3602_v18, 0.0 }
 0x67d   :  { %v3734_v56 = vmax.f32 %v3266_v53, 0.0 }
 0x67e   :  { %v3867_v24 = vmul.f32 %v6603_v55, %v3733_v13 }
 0x67f   :  { %v3434_v32 = vpop.f32.mrf.mxu2  ;;  %v3868_v7 = vmul.f32 %v6600_v47, %v3734_v56 }
 0x680   :  { %v3435_v8 = vadd.f32 %v3434_v32, %v6591_v28  ;;  %v3603_v10 = vpop.f32.mrf.mxu3  ;;  %v3099_v52 = vpop.f32.mrf.mxu0  ;;  %v4052_v63 = vadd.f32 %v3867_v24, %v3866_v23 }
 0x681   :  { %v3268_v58 = vpop.f32.mrf.mxu1  ;;  %v3100_v12 = vadd.f32 %v3099_v52, %v6582_v14 }
 0x682   :  { %v3604_v37 = vadd.f32 %v3603_v10, %v3435_v8  ;;  %4053 = vadd.xlane.f32.xlu0 %v4052_v63 }
 0x683   :  { %v3269_v60 = vadd.f32 %v3268_v58, %v3100_v12 }
 0x684   :  { %v3735_v57 = vmax.f32 %v3604_v37, 0.0 }
 0x685   :  { %v3736_v19 = vmax.f32 %v3269_v60, 0.0 }
 0x686   :  { %v3869_v54 = vmul.f32 %v6603_v55, %v3735_v57 }
 0x687   :  { %v3437_v3 = vpop.f32.mrf.mxu2  ;;  %v3870_v44 = vmul.f32 %v6600_v47, %v3736_v19 }
 0x688   :  { %v3438_v41 = vadd.f32 %v3437_v3, %v6591_v28  ;;  %v3606_v0 = vpop.f32.mrf.mxu3  ;;  %v3101_v5 = vpop.f32.mrf.mxu0  ;;  %v4055_v9 = vadd.f32 %v3869_v54, %v3868_v7 }
 0x689   :  { %v3270_v50 = vpop.f32.mrf.mxu1  ;;  %v3102_v1 = vadd.f32 %v3101_v5, %v6582_v14 }
 0x68a   :  { %v3607_v26 = vadd.f32 %v3606_v0, %v3438_v41  ;;  %4056 = vadd.xlane.f32.xlu2 %v4055_v9 }
 0x68b   :  { %v3271_v39 = vadd.f32 %v3270_v50, %v3102_v1 }
 0x68c   :  { %v3737_v4 = vmax.f32 %v3607_v26, 0.0  ;;  %v3982_v26 = vpop.xlane.xlu1 %3981 }
 0x68d   :  { %v3738_v2 = vmax.f32 %v3271_v39, 0.0 }
 0x68e   :  { %v3871_v11 = vmul.f32 %v6603_v55, %v3737_v4  ;;  %v3985_v4 = vpop.xlane.xlu2 %3984 }
 0x68f   :  { %v3439_v38 = vpop.f32.mrf.mxu2  ;;  %v3872_v13 = vmul.f32 %v6600_v47, %v3738_v2 }
 0x690   :  { %v3440_v21 = vadd.f32 %v3439_v38, %v6591_v28  ;;  %v3608_v33 = vpop.f32.mrf.mxu3  ;;  %v3104_v34 = vpop.f32.mrf.mxu0  ;;  %v4058_v25 = vadd.f32 %v3871_v11, %v3870_v44 }
 0x691   :  { %v3105_v43 = vadd.f32 %v3104_v34, %v6582_v14  ;;  %v3273_v18 = vpop.f32.mrf.mxu1  ;;  %v3988_v11 = vpop.xlane.xlu0 %3987 }
 0x692   :  { %v3609_v15 = vadd.f32 %v3608_v33, %v3440_v21  ;;  %4059 = vadd.xlane.f32.xlu1 %v4058_v25 }
 0x693   :  { %v3274_v24 = vadd.f32 %v3273_v18, %v3105_v43 }
 0x694   :  { %v3739_v62 = vmax.f32 %v3609_v15, 0.0  ;;  %v3991_v1 = vpop.xlane.xlu1 %3990 }
 0x695   :  { %v3740_v63 = vmax.f32 %v3274_v24, 0.0 }
 0x696   :  { %v3873_v23 = vmul.f32 %v6603_v55, %v3739_v62  ;;  %v3994_v39 = vpop.xlane.xlu2 %3993  ;;  %v4106_v62 = vadd.f32 %v6703_v45, %v3982_v26 }
 0x697   :  { %v3442_v53 = vpop.f32.mrf.mxu2  ;;  %v3874_v57 = vmul.f32 %v6600_v47, %v3740_v63 }
 0x698   :  { %v3443_v32 = vadd.f32 %v3442_v53, %v6591_v28  ;;  %v3611_v8 = vpop.f32.mrf.mxu3  ;;  %v3106_v10 = vpop.f32.mrf.mxu0  ;;  %v4061_v52 = vadd.f32 %v3873_v23, %v3872_v13  ;;  %v4107_v13 = vadd.f32 %v6703_v45, %v3985_v4  ;;  %v4108_v53 = vadd.f32 %v6703_v45, %v3988_v11 }
 0x699   :  { %v3107_v56 = vadd.f32 %v3106_v10, %v6582_v14  ;;  %v3275_v12 = vpop.f32.mrf.mxu1  ;;  %v4297_v10 = vperm.slane %v4106_v62, %v6724_v20 }
 0x69a   :  { %v3612_v58 = vadd.f32 %v3611_v8, %v3443_v32  ;;  %4020 = vadd.xlane.f32.xlu1 %v7039_v42  ;;  %4062 = vadd.xlane.f32.xlu0 %v4061_v52  ;;  %v4109_v8 = vadd.f32 %v6703_v45, %v3991_v1  ;;  %v4110_v52 = vadd.f32 %v6703_v45, %v3994_v39 }
 0x69b   :  { %v3276_v54 = vadd.f32 %v3275_v12, %v3107_v56  ;;  %v4299_v63 = vperm.slane %v4107_v13, %v6735_v40  ;;  %v4301_v56 = vperm.slane %v4108_v53, %v6748_v16 }
 0x69c   :  { %v3741_v37 = vmax.f32 %v3612_v58, 0.0  ;;  %v4000_v44 = vpop.xlane.xlu1 %3999  ;;  %v4303_v12 = vperm.slane %v4109_v8, %v6759_v30 }
 0x69d   :  { %v3742_v5 = vmax.f32 %v3276_v54, 0.0  ;;  %v4305_v54 = vperm.slane %v4110_v52, %v6772_v51 }
 0x69e   :  { %v3875_v7 = vmul.f32 %v6603_v55, %v3741_v37  ;;  %v4003_v21 = vpop.xlane.xlu2 %4002  ;;  %v4112_v37 = vadd.f32 %v6703_v45, %v4000_v44 }
 0x69f   :  { %v3444_v60 = vpop.f32.mrf.mxu2  ;;  %v3876_v14 = vmul.f32 %v6600_v47, %v3742_v5 }
 0x6a0   :  { %v3445_v3 = vadd.f32 %v3444_v60, %v6591_v28  ;;  %v4064_v41 = vadd.f32 %v3875_v7, %v3874_v57  ;;  %v3613_v0 = vpop.f32.mrf.mxu3  ;;  %v3997_v28 = vpop.xlane.xlu0 %3996  ;;  %v4113_v57 = vadd.f32 %v6703_v45, %v4003_v21  ;;  %v4298_v7 = vsel %vm4209_vm1, %v4297_v10, %v7050_v59 }
 0x6a1   :  { %v4111_v58 = vadd.f32 %v6703_v45, %v3997_v28 }
 0x6a2   :  { %v3614_v9 = vadd.f32 %v3613_v0, %v3445_v3  ;;  %4065 = vadd.xlane.f32.xlu2 %v4064_v41  ;;  %v4300_v3 = vsel %vm4213_vm2, %v4299_v63, %v4298_v7  ;;  %v4311_v26 = vperm.slane %v4113_v57, %v6807_v27 }
 0x6a3   :  { %v4307_v41 = vperm.slane %v4111_v58, %v6783_v17 }
 0x6a4   :  { %v3743_v50 = vmax.f32 %v3614_v9, 0.0  ;;  %v4009_v38 = vpop.xlane.xlu1 %4008 }
 0x6a5   :  { %v4115_v0 = vadd.f32 %v6703_v45, %v4009_v38 }
 0x6a6   :  { %v3877_v42 = vmul.f32 %v6603_v55, %v3743_v50  ;;  %v4018_v25 = vpop.xlane.xlu2 %4017  ;;  %v4302_v50 = vsel %vm4217_vm3, %v4301_v56, %v4300_v3 }
 0x6a7   :  { %v4304_v59 = vsel %vm4221_vm4, %v4303_v12, %v4302_v50  ;;  %v4315_v39 = vperm.slane %v4115_v0, %v6831_v61  ;;  %v4118_v38 = vadd.f32 %v6703_v45, %v4018_v25 }
 0x6a8   :  { %v4067_v19 = vadd.f32 %v3877_v42, %v3876_v14  ;;  %v4006_v33 = vpop.xlane.xlu0 %4005  ;;  %v4309_v14 = vperm.slane %v4112_v37, %v6796_v46  ;;  %v4306_v4 = vsel %vm4225_vm5, %v4305_v54, %v4304_v59 }
 0x6a9   :  { %v4114_v60 = vadd.f32 %v6703_v45, %v4006_v33  ;;  %v4308_v11 = vsel %vm4229_vm6, %v4307_v41, %v4306_v4  ;;  %v4321_v53 = vperm.slane %v4118_v38, %v6868_v29 }
 0x6aa   :  { %4068 = vadd.xlane.f32.xlu0 %v4067_v19  ;;  %v4310_v28 = vsel %vm4233_vm7, %v4309_v14, %v4308_v11 }
 0x6ab   :  { %v4313_v44 = vperm.slane %v4114_v60, %v6820_v49  ;;  %v4312_v33 = vsel %vm4237_vm8, %v4311_v26, %v4310_v28 }
 0x6ac   :  { %v4012_v34 = vpop.xlane.xlu1 %4011 }
 0x6ad   :  { %v4116_v42 = vadd.f32 %v6703_v45, %v4012_v34 }
 0x6ae   :  { %v4024_v43 = vpop.xlane.xlu2 %4023 }
 0x6af   :  { %v4317_v21 = vperm.slane %v4116_v42, %v6844_v36  ;;  %v4120_v63 = vadd.f32 %v6703_v45, %v4024_v43 }
 0x6b0   :  { %v4015_v2 = vpop.xlane.xlu0 %4014 }
 0x6b1   :  { %v4117_v1 = vadd.f32 %v6703_v45, %v4015_v2  ;;  %v4314_v2 = vsel %vm4241_vm9, %v4313_v44, %v4312_v33  ;;  %v4325_v60 = vperm.slane %v4120_v63, %v6705_v35 }
 0x6b2   :  { %v4316_v13 = vsel %vm4245_vm10, %v4315_v39, %v4314_v2 }
 0x6b3   :  { %v4319_v34 = vperm.slane %v4117_v1, %v6855_v48  ;;  %v4318_v52 = vsel %vm4249_vm11, %v4317_v21, %v4316_v13 }
 0x6b5   :  { %v4030_v15 = vpop.xlane.xlu1 %4029  ;;  %v4320_v12 = vsel %vm4253_vm12, %v4319_v34, %v4318_v52 }
 0x6b6   :  { %v4122_v8 = vadd.f32 %v6703_v45, %v4030_v15  ;;  %v4322_v54 = vsel %vm4257_vm13, %v4321_v53, %v4320_v12 }
 0x6b8   :  { %v4027_v47 = vpop.xlane.xlu0 %4026  ;;  %v4328_v43 = vperm.slane %v4122_v8, %v6724_v20 }
 0x6b9   :  { %v4121_v62 = vadd.f32 %v6703_v45, %v4027_v47 }
 0x6bb   :  { %v4326_v57 = vperm.slane %v4121_v62, %v6710_v6 }
 0x6bd   :  { %v4033_v55 = vpop.xlane.xlu2 %4032  ;;  %v4327_v50 = vsel %vm4205_vm0, %v4326_v57, %v4325_v60  ;;  %vm4360_vm0 = vcmask 1043459  }
 0x6be   :  { %v4123_v58 = vadd.f32 %v6703_v45, %v4033_v55  ;;  %v4329_v35 = vsel %vm4209_vm1, %v4328_v43, %v4327_v50 }
 0x6c0   :  { %v4330_v3 = vperm.slane %v4123_v58, %v6735_v40 }
 0x6c2   :  { %v4331_v42 = vsel %vm4213_vm2, %v4330_v3, %v4329_v35 }
 0x6c5   :  { %v4036_v23 = vpop.xlane.xlu0 %4035 }
 0x6c6   :  { %v4124_v47 = vadd.f32 %v6703_v45, %v4036_v23 }
 0x6c8   :  { %v4332_v6 = vperm.slane %v4124_v47, %v6748_v16 }
 0x6ca   :  { %v4333_v59 = vsel %vm4217_vm3, %v4332_v6, %v4331_v42 }
 0x6cd   :  { %v4039_v18 = vpop.xlane.xlu1 %4038 }
 0x6ce   :  { %v4125_v7 = vadd.f32 %v6703_v45, %v4039_v18 }
 0x6d0   :  { %v4334_v20 = vperm.slane %v4125_v7, %v6759_v30 }
 0x6d2   :  { %v4335_v26 = vsel %vm4221_vm4, %v4334_v20, %v4333_v59 }
 0x6d5   :  { %v4042_v32 = vpop.xlane.xlu2 %4041 }
 0x6d6   :  { %v4126_v55 = vadd.f32 %v6703_v45, %v4042_v32 }
 0x6d8   :  { %v4336_v40 = vperm.slane %v4126_v55, %v6772_v51 }
 0x6da   :  { %v4337_v4 = vsel %vm4225_vm5, %v4336_v40, %v4335_v26 }
 0x6dd   :  { %v4045_v5 = vpop.xlane.xlu0 %4044 }
 0x6de   :  { %v4127_v41 = vadd.f32 %v6703_v45, %v4045_v5 }
 0x6e0   :  { %v4338_v16 = vperm.slane %v4127_v41, %v6783_v17 }
 0x6e2   :  { %v4339_v11 = vsel %vm4229_vm6, %v4338_v16, %v4337_v4 }
 0x6e5   :  { %v4048_v24 = vpop.xlane.xlu1 %4047 }
 0x6e6   :  { %v4128_v18 = vadd.f32 %v6703_v45, %v4048_v24 }
 0x6e8   :  { %v4340_v30 = vperm.slane %v4128_v18, %v6796_v46 }
 0x6ea   :  { %v4341_v46 = vsel %vm4233_vm7, %v4340_v30, %v4339_v11 }
 0x6ed   :  { %v4051_v19 = vpop.xlane.xlu2 %4050 }
 0x6ee   :  { %v4129_v32 = vadd.f32 %v6703_v45, %v4051_v19 }
 0x6f0   :  { %v4342_v51 = vperm.slane %v4129_v32, %v6807_v27 }
 0x6f2   :  { %v4343_v38 = vsel %vm4237_vm8, %v4342_v51, %v4341_v46 }
 0x6f5   :  { %v4054_v10 = vpop.xlane.xlu0 %4053 }
 0x6f6   :  { %v4130_v5 = vadd.f32 %v6703_v45, %v4054_v10 }
 0x6f8   :  { %v4344_v44 = vperm.slane %v4130_v5, %v6820_v49 }
 0x6fa   :  { %v4345_v28 = vsel %vm4241_vm9, %v4344_v44, %v4343_v38 }
 0x6fd   :  { %v4057_v56 = vpop.xlane.xlu2 %4056 }
 0x6fe   :  { %v4131_v24 = vadd.f32 %v6703_v45, %v4057_v56 }
 0x700   :  { %v4346_v39 = vperm.slane %v4131_v24, %v6831_v61 }
 0x702   :  { %v4347_v49 = vsel %vm4245_vm10, %v4346_v39, %v4345_v28 }
 0x705   :  { %v4060_v9 = vpop.xlane.xlu1 %4059 }
 0x706   :  { %v4132_v19 = vadd.f32 %v6703_v45, %v4060_v9 }
 0x708   :  { %v4348_v9 = vperm.slane %v4132_v19, %v6844_v36 }
 0x70a   :  { %v4349_v2 = vsel %vm4249_vm11, %v4348_v9, %v4347_v49 }
 0x70d   :  { %v4021_v25 = vpop.xlane.xlu1 %4020  ;;  %v4063_v14 = vpop.xlane.xlu0 %4062 }
 0x70e   :  { %v4119_v37 = vadd.f32 %v6703_v45, %v4021_v25  ;;  %v4133_v1 = vadd.f32 %v6703_v45, %v4063_v14 }
 0x710   :  { %v4323_v15 = vperm.slane %v4119_v37, %v6879_v31  ;;  %v4350_v27 = vperm.slane %v4133_v1, %v6855_v48 }
 0x712   :  { %v4324_v23 = vsel %vm4261_vm14, %v4323_v15, %v4322_v54  ;;  %v4351_v61 = vsel %vm4253_vm12, %v4350_v27, %v4349_v2 }
 0x713   :  { %v4359_v0 = vsel %vm4358_vm15, %v4324_v23, %v7034_v22 }
 0x715   :  { %v4066_v22 = vpop.xlane.xlu2 %4065 }
 0x716   :  { %v4134_v17 = vadd.f32 %v6703_v45, %v4066_v22 }
 0x718   :  { %v4352_v21 = vperm.slane %v4134_v17, %v6868_v29 }
 0x71a   :  { %v4353_v48 = vsel %vm4257_vm13, %v4352_v21, %v4351_v61 }
 0x71d   :  { %v4069_v33 = vpop.xlane.xlu0 %4068 }
 0x71e   :  { %v4135_v34 = vadd.f32 %v6703_v45, %v4069_v33 }
 0x720   :  { %v4354_v36 = vperm.slane %v4135_v34, %v6879_v31 }
 0x722   :  { %v4355_v29 = vsel %vm4261_vm14, %v4354_v36, %v4353_v48 }
 0x723   :  { %v4361_v45 = vsel %vm4360_vm0, %v4355_v29, %v4359_v0 }
 0x724   :  { %4363 = vst [vmem:[#allocation3] sm:$0xf] %v4361_v45 }
 0x725   :  { %4374 = dma.vmem_to_hbm [thread:$0]  %s4370_s13, 64, %s4372_s16, [#allocation4]  }
 0x726   :  { %4885 = dma.done.wait [#allocation4], 64  }
 0x727   :  { %4886 = vsyncadd [#allocation4], 4294967232 }
 0x728   :  { %4379 = vsyncpa [#allocation4], 1 }

</bundles_post_ra>
